<compile_context>
chip_gen: v5e
topology: v5e:2x2
jax: 0.10.0
libtpu: 0.0.40
codegen_flags: <defaults>
</compile_context>

<pallas_src>
import functools
import math

import jax
import jax.numpy as jnp
from jax import lax
from jax.experimental import pallas as pl
from jax.experimental.pallas import tpu as pltpu


# ----------------------------------------------------------------------------
# RBF mixture (evaluated inside the stage kernel)
# ----------------------------------------------------------------------------

def _rbf_mixture(z, wc, *, c_mid, dz, precision, data_min, data_max, n_mix,
                 use_horner):
    """u = sum_m wc[:, m] * exp(-0.5 * p^2 * (clamp(z) - c_m)^2), c_m evenly spaced.

    z : (F, Tc) f32, wc : (F, M) f32 (centre constants pre-folded when
    use_horner is True).  Returns (F, Tc) f32.
    """
    p2 = precision * precision
    mid = n_mix // 2
    d = jnp.clip(z, data_min, data_max) - c_mid          # LUT-domain clamp

    if not use_horner:
        # Safe fallback for configs where the factorized form would overflow.
        acc = jnp.zeros_like(z)
        for m in range(n_mix):
            t = d - (m - mid) * dz
            acc = acc + wc[:, m:m + 1] * jnp.exp(-0.5 * p2 * t * t)
        return acc

    # exp(-.5 p^2 (d - k dz)^2) = exp(-.5 p^2 d^2) * exp(p^2 dz d)^k * const_k
    # const_k is folded into wc outside.  Two-sided Horner keeps |exponent| of
    # any intermediate <= p^2*dz*|d|*mid (= 64 < 88 for the default config);
    # a one-sided Horner would need exp(p^2*dz*|d|*(M-1)) = exp(128) -> inf.
    ga = jnp.exp(-0.5 * p2 * d * d)                      # EUP exp
    gb = jnp.exp((p2 * dz) * d)                          # EUP exp
    gbi = pl.reciprocal(gb, approx=True)                 # EUP rcp (3rd exp removed)

    hp = wc[:, n_mix - 1:n_mix]                          # Horner, centres > mid
    for m in range(n_mix - 2, mid, -1):
        hp = hp * gb + wc[:, m:m + 1]
    hn = wc[:, 0:1]                                      # Horner, centres < mid
    for m in range(1, mid):
        hn = hn * gbi + wc[:, m:m + 1]

    acc = wc[:, mid:mid + 1]
    if n_mix - 1 > mid:
        acc = acc + hp * gb
    if mid > 0:
        acc = acc + hn * gbi
    return ga * acc


# ----------------------------------------------------------------------------
# Fused per-stage kernel: conv -> RBF -> adjoint conv (col2im fused)
# ----------------------------------------------------------------------------

def _stage_kernel(x_ref, mask_ref, wf_ref, wc_ref, wa_ref, o_ref, *,
                  H, W, Wp, kh, kw, mix_kwargs, mix_chunk):
    """One image per grid step.

      x_ref   : (1, C, Lx)      bf16  padded image, flattened row-major
                                      (Lx = Hp*Wp + kw - 1, zero tail)
      mask_ref: (1, T)          f32   1 on real columns j < W, 0 on ghost cols
      wf_ref  : (kh*kw, F, C)   bf16  forward conv weights per tap
      wc_ref  : (F, M)          f32   RBF mixture weights (constants folded)
      wa_ref  : (kh*kw, C, F)   bf16  adjoint conv weights per tap (shared)
      o_ref   : (1, C, Lx)      f32   conv-transpose output on the padded grid
    """
    F = wf_ref.shape[1]
    T = H * Wp

    xv = x_ref[0]                                         # (C, Lx) bf16

    # ---- forward conv: kh*kw shifted (F,C)@(C,T) matmuls (no im2col in HBM)
    z = jnp.zeros((F, T), jnp.float32)
    for p in range(kh):
        for q in range(kw):
            off = p * Wp + q
            z = z + jnp.dot(wf_ref[p * kw + q], xv[:, off:off + T],
                            preferred_element_type=jnp.float32)

    # ---- RBF mixture, chunked over lanes to bound live vreg temporaries
    wc = wc_ref[...]
    mask = mask_ref[...]
    chunks = []
    for s in range(0, T, mix_chunk):
        e = min(s + mix_chunk, T)
        u_c = _rbf_mixture(z[:, s:e], wc, **mix_kwargs)
        chunks.append((u_c * mask[:, s:e]).astype(jnp.bfloat16))
    u = chunks[0] if len(chunks) == 1 else jnp.concatenate(chunks, axis=1)

    # ---- adjoint conv (weight sharing) with the col2im scatter-add fused:
    #      each tap is a lane-offset accumulate into the padded output block.
    o_ref[...] = jnp.zeros(o_ref.shape, o_ref.dtype)
    for p in range(kh):
        for q in range(kw):
            off = p * Wp + q
            ct = jnp.dot(wa_ref[p * kw + q], u,
                         preferred_element_type=jnp.float32)      # (C, T)
            o_ref[0, :, pl.ds(off, T)] += ct


def fused_stage_call(xflat, mask, w_fwd, wc, w_adj, *, H, W, Wp, kh, kw,
                     mix_kwargs, mix_chunk=512):
    N, C, Lx = xflat.shape
    kern = functools.partial(_stage_kernel, H=H, W=W, Wp=Wp, kh=kh, kw=kw,
                             mix_kwargs=mix_kwargs, mix_chunk=mix_chunk)
    return pl.pallas_call(
        kern,
        out_shape=jax.ShapeDtypeStruct((N, C, Lx), jnp.float32),
        grid=(N,),
        in_specs=[pl.BlockSpec((1, C, Lx), lambda n: (n, 0, 0)),
                  pl.BlockSpec(mask.shape, lambda n: (0, 0)),
                  pl.BlockSpec(w_fwd.shape, lambda n: (0, 0, 0)),
                  pl.BlockSpec(wc.shape, lambda n: (0, 0)),
                  pl.BlockSpec(w_adj.shape, lambda n: (0, 0, 0))],
        out_specs=pl.BlockSpec((1, C, Lx), lambda n: (n, 0, 0)),
        compiler_params=pltpu.CompilerParams(
            dimension_semantics=("parallel",)),
    )(xflat, mask, w_fwd, wc, w_adj)


# ----------------------------------------------------------------------------
# Chunked l2-ball projection (residual x - v fused in-kernel)
# ----------------------------------------------------------------------------

def _sumsq_kernel(x_ref, v_ref, y_ref, ss_ref):
    """Partial sum of squares of r = (x - v) - y, per image, chunked over D."""
    @pl.when(pl.program_id(1) == 0)
    def _():
        ss_ref[...] = jnp.zeros(ss_ref.shape, ss_ref.dtype)
    r = (x_ref[...] - v_ref[...]) - y_ref[...]            # (1, RC, 128)
    ss_ref[...] += jnp.sum(r * r, axis=1, keepdims=True)  # (1, 1, 128)


def _apply_kernel(fac_ref, x_ref, v_ref, y_ref, o_ref, *, clamp):
    """out = y + ((x - v) - y) * factor, optional fused Hardtanh (bbProj)."""
    f = fac_ref[pl.program_id(0)]                         # per-image scalar (SMEM)
    y = y_ref[...]
    out = y + ((x_ref[...] - v_ref[...]) - y) * f
    if clamp is not None:
        out = jnp.clip(out, clamp[0], clamp[1])
    o_ref[...] = out


def pallas_l2proj(x, v, y, eps, clamp, rows_per_chunk=256):
    """Project (x - v) onto the l2 ball of radius eps around y, chunked over D."""
    shape = x.shape
    N = shape[0]
    D = int(math.prod(shape[1:]))

    R = -(-D // 128)
    RC = min(int(rows_per_chunk), ((R + 7) // 8) * 8)     # multiple of 8 rows
    Rp = ((R + RC - 1) // RC) * RC
    Dp = Rp * 128
    nc = Rp // RC

    def to3(a):
        a2 = a.reshape(N, D).astype(jnp.float32)
        if Dp != D:                       # zero pad -> zero residual contribution
            a2 = jnp.pad(a2, ((0, 0), (0, Dp - D)))
        return a2.reshape(N, Rp, 128)

    x3, v3, y3 = to3(x), to3(v), to3(y)

    partials = pl.pallas_call(
        _sumsq_kernel,
        out_shape=jax.ShapeDtypeStruct((N, 1, 128), jnp.float32),
        grid=(N, nc),
        in_specs=[pl.BlockSpec((1, RC, 128), lambda n, c: (n, c, 0)),
                  pl.BlockSpec((1, RC, 128), lambda n, c: (n, c, 0)),
                  pl.BlockSpec((1, RC, 128), lambda n, c: (n, c, 0))],
        out_specs=pl.BlockSpec((1, 1, 128), lambda n, c: (n, 0, 0)),
        compiler_params=pltpu.CompilerParams(
            dimension_semantics=("parallel", "arbitrary")),
    )(x3, v3, y3)

    ss = jnp.sum(partials, axis=(1, 2))                    # (N,) squared norm
    eps = eps.astype(jnp.float32)
    fac = jnp.where(ss > eps * eps,
                    eps * lax.rsqrt(jnp.maximum(ss, 1e-24)),
                    jnp.float32(1.0)).astype(jnp.float32)

    out3 = pl.pallas_call(
        functools.partial(_apply_kernel, clamp=clamp),
        out_shape=jax.ShapeDtypeStruct((N, Rp, 128), jnp.float32),
        grid=(N, nc),
        in_specs=[pl.BlockSpec(memory_space=pltpu.MemorySpace.SMEM),
                  pl.BlockSpec((1, RC, 128), lambda n, c: (n, c, 0)),
                  pl.BlockSpec((1, RC, 128), lambda n, c: (n, c, 0)),
                  pl.BlockSpec((1, RC, 128), lambda n, c: (n, c, 0))],
        out_specs=pl.BlockSpec((1, RC, 128), lambda n, c: (n, c, 0)),
        compiler_params=pltpu.CompilerParams(
            dimension_semantics=("parallel", "parallel")),
    )(fac, x3, v3, y3)

    out = out3.reshape(N, Dp)
    if Dp != D:
        out = out[:, :D]
    return out.reshape(shape)


# ----------------------------------------------------------------------------
# XLA glue: weight normalization, symmetric-pad adjoint (border-only)
# ----------------------------------------------------------------------------

def normalize_weights(w, scale, zero_mean=True, normalized=True):
    """zero-mean + L2-normalize per output feature, then scale (pydl style)."""
    F_ = w.shape[0]
    wf = w.reshape(F_, -1)
    if zero_mean:
        wf = wf - wf.mean(axis=1, keepdims=True)
    if normalized:
        wf = wf / jnp.sqrt(jnp.sum(wf * wf, axis=1, keepdims=True))
        wf = wf * scale[:, None]
    return wf.reshape(w.shape)


def sympad_adjoint(x, pad):
    """Adjoint of symmetric padding: fold mirrored borders back inside."""
    pt, pb, pL, pR = pad
    N, C, Hp, Wp = x.shape
    core = x[:, :, pt:Hp - pb, :]
    if pt > 0:
        core = core.at[:, :, :pt, :].add(x[:, :, :pt, :][:, :, ::-1, :])
    if pb > 0:
        core = core.at[:, :, core.shape[2] - pb:, :].add(
            x[:, :, Hp - pb:, :][:, :, ::-1, :])
    Wc = core.shape[3]
    out = core[:, :, :, pL:Wc - pR]
    if pL > 0:
        out = out.at[:, :, :, :pL].add(core[:, :, :, :pL][:, :, :, ::-1])
    if pR > 0:
        out = out.at[:, :, :, out.shape[3] - pR:].add(
            core[:, :, :, Wc - pR:][:, :, :, ::-1])
    return out


# ----------------------------------------------------------------------------
# UDNet forward
# ----------------------------------------------------------------------------

def residual_rbf_stage(x, stdn, net_input, params, cfg, last):
    pad = cfg["pad"]
    kh = kw = cfg["kernel_size"]
    N, C, H, W = x.shape
    F_ = params["conv_w"].shape[0]
    M = params["rbf_w"].shape[1]

    Hp = H + pad[0] + pad[1]
    Wp = W + pad[2] + pad[3]
    T = H * Wp
    Lx = Hp * Wp + (kw - 1)

    # normalized, shared conv weights, split per tap (p, q)
    wnorm = normalize_weights(params["conv_w"], params["scale_f"],
                              zero_mean=True, normalized=True)   # (F, C, kh, kw)
    w_fwd = wnorm.transpose(2, 3, 0, 1).reshape(kh * kw, F_, C).astype(jnp.bfloat16)
    w_adj = wnorm.transpose(2, 3, 1, 0).reshape(kh * kw, C, F_).astype(jnp.bfloat16)

    # choose factorized (Horner) mixture if numerically safe at this config
    mid = M // 2
    max_abs_d = max(abs(cfg["data_min"] - cfg["c_mid"]),
                    abs(cfg["data_max"] - cfg["c_mid"]))
    max_k = max(mid, M - 1 - mid)
    use_horner = (cfg["precision"] ** 2) * cfg["dz"] * max_abs_d * max_k < 80.0
    if use_horner:
        # fold the per-centre constants exp(-0.5*(p*dz*k)^2) into the weights
        kidx = jnp.arange(M, dtype=jnp.float32) - float(mid)
        cfac = jnp.exp(-0.5 * (cfg["precision"] * cfg["dz"] * kidx) ** 2)
        wc = (params["rbf_w"] * cfac[None, :]).astype(jnp.float32)
    else:
        wc = params["rbf_w"].astype(jnp.float32)
    mix_kwargs = dict(c_mid=float(cfg["c_mid"]), dz=float(cfg["dz"]),
                      precision=float(cfg["precision"]),
                      data_min=float(cfg["data_min"]),
                      data_max=float(cfg["data_max"]), n_mix=int(M),
                      use_horner=bool(use_horner))

    # symmetric 'same' padding, then flatten each padded image row-major so
    # every conv tap is a constant lane shift (bf16 halves the HBM read)
    xp = jnp.pad(x, ((0, 0), (0, 0), (pad[0], pad[1]), (pad[2], pad[3])),
                 mode="symmetric")
    xflat = jnp.pad(xp.reshape(N, C, Hp * Wp),
                    ((0, 0), (0, 0), (0, kw - 1))).astype(jnp.bfloat16)

    # ghost-column mask: the flat layout also computes columns j in [W, Wp)
    mask = (jnp.arange(Wp) < W).astype(jnp.float32)
    mask = jnp.tile(mask, H).reshape(1, T)

    # fused conv -> RBF -> adjoint-conv (+col2im) in a single Pallas kernel
    v_flat = fused_stage_call(xflat, mask, w_fwd, wc, w_adj, H=H, W=W, Wp=Wp,
                              kh=kh, kw=kw, mix_kwargs=mix_kwargs)
    v_pad = v_flat[:, :, :Hp * Wp].reshape(N, C, Hp, Wp)
    v = sympad_adjoint(v_pad, pad)                               # (N, C, H, W)

    # l2 projection of (x - v) onto the noise ball around net_input
    D = C * H * W
    eps = jnp.exp(params["alpha"]) * stdn * jnp.float32(math.sqrt(D - 1))
    clamp = (cfg["clb"], cfg["cub"]) if last else None           # bbProj fused
    return pallas_l2proj(x, v, net_input, eps, clamp,
                         rows_per_chunk=cfg.get("l2_rows_per_chunk", 256))


def udnet_forward(x, stdn, params_list, cfg, net_input=None):
    if net_input is None:
        net_input = x
    for s, params in enumerate(params_list):
        x = residual_rbf_stage(x, stdn, net_input, params, cfg,
                               last=(s == len(params_list) - 1))
    return x


def init_params(key, stages, kernel_size, in_ch, out_feat, rbf_mix):
    params = []
    for _ in range(stages):
        key, k1, k2 = jax.random.split(key, 3)
        params.append(dict(
            conv_w=0.1 * jax.random.normal(
                k1, (out_feat, in_ch, kernel_size, kernel_size), jnp.float32),
            scale_f=jnp.full((out_feat,), 0.1, jnp.float32),
            rbf_w=1e-2 * jax.random.normal(k2, (out_feat, rbf_mix), jnp.float32),
            alpha=jnp.zeros((), jnp.float32),
        ))
    return params


if __name__ == "__main__":
    # Small UDNet configuration
    N, C, H, W = 2, 3, 16, 16
    kernel_size = 5
    output_features = 16
    rbf_mixtures = 17
    stages = 3
    rbf_start, rbf_end = -100.0, 100.0
    data_min, data_max = -100.0, 100.0
    clb, cub = 0.0, 255.0
    rbf_precision = 0.08

    Kc = (kernel_size + 1) // 2                      # getPad2RetainShape
    pad = (Kc - 1, kernel_size - Kc, Kc - 1, kernel_size - Kc)
    dz = (rbf_end - rbf_start) / (rbf_mixtures - 1)  # even centre spacing
    c_mid = rbf_start + (rbf_mixtures // 2) * dz
    cfg = dict(pad=pad, kernel_size=kernel_size, precision=rbf_precision,
               dz=dz, c_mid=c_mid, data_min=data_min, data_max=data_max,
               clb=clb, cub=cub)

    key = jax.random.PRNGKey(0)
    kx, kn, kp = jax.random.split(key, 3)
    clean = 255.0 * jax.random.uniform(kx, (N, C, H, W), jnp.float32)
    noisy = clean + 15.0 * jax.random.normal(kn, (N, C, H, W), jnp.float32)
    stdn = jnp.full((N,), 15.0, jnp.float32)

    params = init_params(kp, stages, kernel_size, C, output_features,
                         rbf_mixtures)

    fwd = jax.jit(lambda x, s: udnet_forward(x, s, params, cfg))
    out = fwd(noisy, stdn)
    jax.block_until_ready(out)

    assert out.shape == (N, C, H, W)
    assert bool(jnp.all(jnp.isfinite(out)))
    assert bool(jnp.all(out >= clb)) and bool(jnp.all(out <= cub))
    print("KERNEL_OK")
</pallas_src>

<mosaic_0001>
module attributes {stable_mosaic.version = 11 : i64} {
  func.func @_stage_kernel(%arg0: i32, %arg1: memref<1x3x404xbf16, #tpu.memory_space<vmem>>, %arg2: memref<1x320xf32, #tpu.memory_space<vmem>>, %arg3: memref<25x16x3xbf16, #tpu.memory_space<vmem>>, %arg4: memref<16x17xf32, #tpu.memory_space<vmem>>, %arg5: memref<25x3x16xbf16, #tpu.memory_space<vmem>>, %arg6: memref<1x3x404xf32, #tpu.memory_space<vmem>>) attributes {dimension_semantics = [#tpu.dimension_semantics<parallel>], iteration_bounds = array<i64: 2>, scalar_prefetch = 0 : i64, scratch_operands = 0 : i64, tpu.core_type = #tpu.core_type<tc>, window_params = [{transform_indices = @transform_0, window_bounds = array<i64: 1, 3, 404>}, {pipeline_mode = #tpu.pipeline_mode<synchronous>, transform_indices = @transform_1, window_bounds = array<i64: 1, 320>}, {pipeline_mode = #tpu.pipeline_mode<synchronous>, transform_indices = @transform_2, window_bounds = array<i64: 25, 16, 3>}, {pipeline_mode = #tpu.pipeline_mode<synchronous>, transform_indices = @transform_3, window_bounds = array<i64: 16, 17>}, {pipeline_mode = #tpu.pipeline_mode<synchronous>, transform_indices = @transform_4, window_bounds = array<i64: 25, 3, 16>}, {transform_indices = @transform_5, window_bounds = array<i64: 1, 3, 404>}]} {
    %c0 = arith.constant 0 : index
    %c0_0 = arith.constant 0 : index
    %c0_1 = arith.constant 0 : index
    %0 = vector.load %arg1[%c0, %c0_0, %c0_1] : memref<1x3x404xbf16, #tpu.memory_space<vmem>>, vector<1x3x404xbf16>
    %1 = vector.shape_cast %0 : vector<1x3x404xbf16> to vector<3x404xbf16>
    %cst = arith.constant 0.000000e+00 : f32
    %2 = vector.broadcast %cst : f32 to vector<16x320xf32>
    %c0_2 = arith.constant 0 : index
    %c0_3 = arith.constant 0 : index
    %c0_4 = arith.constant 0 : index
    %3 = vector.load %arg3[%c0_2, %c0_3, %c0_4] : memref<25x16x3xbf16, #tpu.memory_space<vmem>>, vector<1x16x3xbf16>
    %4 = vector.shape_cast %3 : vector<1x16x3xbf16> to vector<16x3xbf16>
    %5 = vector.extract_strided_slice %1 {offsets = [0, 0], sizes = [3, 320], strides = [1, 1]} : vector<3x404xbf16> to vector<3x320xbf16>
    %cst_5 = arith.constant dense<0.000000e+00> : vector<16x320xf32>
    %6 = tpu.matmul %4, %5, %cst_5 {dimension_numbers = #tpu.dot_dimension_numbers<[1], [0], [0], [1], [0, 0, 1, 1], [], []>} : vector<16x3xbf16>, vector<3x320xbf16>, vector<16x320xf32> -> vector<16x320xf32>
    %7 = arith.addf %2, %6 : vector<16x320xf32>
    %c1 = arith.constant 1 : index
    %c0_6 = arith.constant 0 : index
    %c0_7 = arith.constant 0 : index
    %8 = vector.load %arg3[%c1, %c0_6, %c0_7] : memref<25x16x3xbf16, #tpu.memory_space<vmem>>, vector<1x16x3xbf16>
    %9 = vector.shape_cast %8 : vector<1x16x3xbf16> to vector<16x3xbf16>
    %10 = vector.extract_strided_slice %1 {offsets = [0, 1], sizes = [3, 320], strides = [1, 1]} : vector<3x404xbf16> to vector<3x320xbf16>
    %cst_8 = arith.constant dense<0.000000e+00> : vector<16x320xf32>
    %11 = tpu.matmul %9, %10, %cst_8 {dimension_numbers = #tpu.dot_dimension_numbers<[1], [0], [0], [1], [0, 0, 1, 1], [], []>} : vector<16x3xbf16>, vector<3x320xbf16>, vector<16x320xf32> -> vector<16x320xf32>
    %12 = arith.addf %7, %11 : vector<16x320xf32>
    %c2 = arith.constant 2 : index
    %c0_9 = arith.constant 0 : index
    %c0_10 = arith.constant 0 : index
    %13 = vector.load %arg3[%c2, %c0_9, %c0_10] : memref<25x16x3xbf16, #tpu.memory_space<vmem>>, vector<1x16x3xbf16>
    %14 = vector.shape_cast %13 : vector<1x16x3xbf16> to vector<16x3xbf16>
    %15 = vector.extract_strided_slice %1 {offsets = [0, 2], sizes = [3, 320], strides = [1, 1]} : vector<3x404xbf16> to vector<3x320xbf16>
    %cst_11 = arith.constant dense<0.000000e+00> : vector<16x320xf32>
    %16 = tpu.matmul %14, %15, %cst_11 {dimension_numbers = #tpu.dot_dimension_numbers<[1], [0], [0], [1], [0, 0, 1, 1], [], []>} : vector<16x3xbf16>, vector<3x320xbf16>, vector<16x320xf32> -> vector<16x320xf32>
    %17 = arith.addf %12, %16 : vector<16x320xf32>
    %c3 = arith.constant 3 : index
    %c0_12 = arith.constant 0 : index
    %c0_13 = arith.constant 0 : index
    %18 = vector.load %arg3[%c3, %c0_12, %c0_13] : memref<25x16x3xbf16, #tpu.memory_space<vmem>>, vector<1x16x3xbf16>
    %19 = vector.shape_cast %18 : vector<1x16x3xbf16> to vector<16x3xbf16>
    %20 = vector.extract_strided_slice %1 {offsets = [0, 3], sizes = [3, 320], strides = [1, 1]} : vector<3x404xbf16> to vector<3x320xbf16>
    %cst_14 = arith.constant dense<0.000000e+00> : vector<16x320xf32>
    %21 = tpu.matmul %19, %20, %cst_14 {dimension_numbers = #tpu.dot_dimension_numbers<[1], [0], [0], [1], [0, 0, 1, 1], [], []>} : vector<16x3xbf16>, vector<3x320xbf16>, vector<16x320xf32> -> vector<16x320xf32>
    %22 = arith.addf %17, %21 : vector<16x320xf32>
    %c4 = arith.constant 4 : index
    %c0_15 = arith.constant 0 : index
    %c0_16 = arith.constant 0 : index
    %23 = vector.load %arg3[%c4, %c0_15, %c0_16] : memref<25x16x3xbf16, #tpu.memory_space<vmem>>, vector<1x16x3xbf16>
    %24 = vector.shape_cast %23 : vector<1x16x3xbf16> to vector<16x3xbf16>
    %25 = vector.extract_strided_slice %1 {offsets = [0, 4], sizes = [3, 320], strides = [1, 1]} : vector<3x404xbf16> to vector<3x320xbf16>
    %cst_17 = arith.constant dense<0.000000e+00> : vector<16x320xf32>
    %26 = tpu.matmul %24, %25, %cst_17 {dimension_numbers = #tpu.dot_dimension_numbers<[1], [0], [0], [1], [0, 0, 1, 1], [], []>} : vector<16x3xbf16>, vector<3x320xbf16>, vector<16x320xf32> -> vector<16x320xf32>
    %27 = arith.addf %22, %26 : vector<16x320xf32>
    %c5 = arith.constant 5 : index
    %c0_18 = arith.constant 0 : index
    %c0_19 = arith.constant 0 : index
    %28 = vector.load %arg3[%c5, %c0_18, %c0_19] : memref<25x16x3xbf16, #tpu.memory_space<vmem>>, vector<1x16x3xbf16>
    %29 = vector.shape_cast %28 : vector<1x16x3xbf16> to vector<16x3xbf16>
    %30 = vector.extract_strided_slice %1 {offsets = [0, 20], sizes = [3, 320], strides = [1, 1]} : vector<3x404xbf16> to vector<3x320xbf16>
    %cst_20 = arith.constant dense<0.000000e+00> : vector<16x320xf32>
    %31 = tpu.matmul %29, %30, %cst_20 {dimension_numbers = #tpu.dot_dimension_numbers<[1], [0], [0], [1], [0, 0, 1, 1], [], []>} : vector<16x3xbf16>, vector<3x320xbf16>, vector<16x320xf32> -> vector<16x320xf32>
    %32 = arith.addf %27, %31 : vector<16x320xf32>
    %c6 = arith.constant 6 : index
    %c0_21 = arith.constant 0 : index
    %c0_22 = arith.constant 0 : index
    %33 = vector.load %arg3[%c6, %c0_21, %c0_22] : memref<25x16x3xbf16, #tpu.memory_space<vmem>>, vector<1x16x3xbf16>
    %34 = vector.shape_cast %33 : vector<1x16x3xbf16> to vector<16x3xbf16>
    %35 = vector.extract_strided_slice %1 {offsets = [0, 21], sizes = [3, 320], strides = [1, 1]} : vector<3x404xbf16> to vector<3x320xbf16>
    %cst_23 = arith.constant dense<0.000000e+00> : vector<16x320xf32>
    %36 = tpu.matmul %34, %35, %cst_23 {dimension_numbers = #tpu.dot_dimension_numbers<[1], [0], [0], [1], [0, 0, 1, 1], [], []>} : vector<16x3xbf16>, vector<3x320xbf16>, vector<16x320xf32> -> vector<16x320xf32>
    %37 = arith.addf %32, %36 : vector<16x320xf32>
    %c7 = arith.constant 7 : index
    %c0_24 = arith.constant 0 : index
    %c0_25 = arith.constant 0 : index
    %38 = vector.load %arg3[%c7, %c0_24, %c0_25] : memref<25x16x3xbf16, #tpu.memory_space<vmem>>, vector<1x16x3xbf16>
    %39 = vector.shape_cast %38 : vector<1x16x3xbf16> to vector<16x3xbf16>
    %40 = vector.extract_strided_slice %1 {offsets = [0, 22], sizes = [3, 320], strides = [1, 1]} : vector<3x404xbf16> to vector<3x320xbf16>
    %cst_26 = arith.constant dense<0.000000e+00> : vector<16x320xf32>
    %41 = tpu.matmul %39, %40, %cst_26 {dimension_numbers = #tpu.dot_dimension_numbers<[1], [0], [0], [1], [0, 0, 1, 1], [], []>} : vector<16x3xbf16>, vector<3x320xbf16>, vector<16x320xf32> -> vector<16x320xf32>
    %42 = arith.addf %37, %41 : vector<16x320xf32>
    %c8 = arith.constant 8 : index
    %c0_27 = arith.constant 0 : index
    %c0_28 = arith.constant 0 : index
    %43 = vector.load %arg3[%c8, %c0_27, %c0_28] : memref<25x16x3xbf16, #tpu.memory_space<vmem>>, vector<1x16x3xbf16>
    %44 = vector.shape_cast %43 : vector<1x16x3xbf16> to vector<16x3xbf16>
    %45 = vector.extract_strided_slice %1 {offsets = [0, 23], sizes = [3, 320], strides = [1, 1]} : vector<3x404xbf16> to vector<3x320xbf16>
    %cst_29 = arith.constant dense<0.000000e+00> : vector<16x320xf32>
    %46 = tpu.matmul %44, %45, %cst_29 {dimension_numbers = #tpu.dot_dimension_numbers<[1], [0], [0], [1], [0, 0, 1, 1], [], []>} : vector<16x3xbf16>, vector<3x320xbf16>, vector<16x320xf32> -> vector<16x320xf32>
    %47 = arith.addf %42, %46 : vector<16x320xf32>
    %c9 = arith.constant 9 : index
    %c0_30 = arith.constant 0 : index
    %c0_31 = arith.constant 0 : index
    %48 = vector.load %arg3[%c9, %c0_30, %c0_31] : memref<25x16x3xbf16, #tpu.memory_space<vmem>>, vector<1x16x3xbf16>
    %49 = vector.shape_cast %48 : vector<1x16x3xbf16> to vector<16x3xbf16>
    %50 = vector.extract_strided_slice %1 {offsets = [0, 24], sizes = [3, 320], strides = [1, 1]} : vector<3x404xbf16> to vector<3x320xbf16>
    %cst_32 = arith.constant dense<0.000000e+00> : vector<16x320xf32>
    %51 = tpu.matmul %49, %50, %cst_32 {dimension_numbers = #tpu.dot_dimension_numbers<[1], [0], [0], [1], [0, 0, 1, 1], [], []>} : vector<16x3xbf16>, vector<3x320xbf16>, vector<16x320xf32> -> vector<16x320xf32>
    %52 = arith.addf %47, %51 : vector<16x320xf32>
    %c10 = arith.constant 10 : index
    %c0_33 = arith.constant 0 : index
    %c0_34 = arith.constant 0 : index
    %53 = vector.load %arg3[%c10, %c0_33, %c0_34] : memref<25x16x3xbf16, #tpu.memory_space<vmem>>, vector<1x16x3xbf16>
    %54 = vector.shape_cast %53 : vector<1x16x3xbf16> to vector<16x3xbf16>
    %55 = vector.extract_strided_slice %1 {offsets = [0, 40], sizes = [3, 320], strides = [1, 1]} : vector<3x404xbf16> to vector<3x320xbf16>
    %cst_35 = arith.constant dense<0.000000e+00> : vector<16x320xf32>
    %56 = tpu.matmul %54, %55, %cst_35 {dimension_numbers = #tpu.dot_dimension_numbers<[1], [0], [0], [1], [0, 0, 1, 1], [], []>} : vector<16x3xbf16>, vector<3x320xbf16>, vector<16x320xf32> -> vector<16x320xf32>
    %57 = arith.addf %52, %56 : vector<16x320xf32>
    %c11 = arith.constant 11 : index
    %c0_36 = arith.constant 0 : index
    %c0_37 = arith.constant 0 : index
    %58 = vector.load %arg3[%c11, %c0_36, %c0_37] : memref<25x16x3xbf16, #tpu.memory_space<vmem>>, vector<1x16x3xbf16>
    %59 = vector.shape_cast %58 : vector<1x16x3xbf16> to vector<16x3xbf16>
    %60 = vector.extract_strided_slice %1 {offsets = [0, 41], sizes = [3, 320], strides = [1, 1]} : vector<3x404xbf16> to vector<3x320xbf16>
    %cst_38 = arith.constant dense<0.000000e+00> : vector<16x320xf32>
    %61 = tpu.matmul %59, %60, %cst_38 {dimension_numbers = #tpu.dot_dimension_numbers<[1], [0], [0], [1], [0, 0, 1, 1], [], []>} : vector<16x3xbf16>, vector<3x320xbf16>, vector<16x320xf32> -> vector<16x320xf32>
    %62 = arith.addf %57, %61 : vector<16x320xf32>
    %c12 = arith.constant 12 : index
    %c0_39 = arith.constant 0 : index
    %c0_40 = arith.constant 0 : index
    %63 = vector.load %arg3[%c12, %c0_39, %c0_40] : memref<25x16x3xbf16, #tpu.memory_space<vmem>>, vector<1x16x3xbf16>
    %64 = vector.shape_cast %63 : vector<1x16x3xbf16> to vector<16x3xbf16>
    %65 = vector.extract_strided_slice %1 {offsets = [0, 42], sizes = [3, 320], strides = [1, 1]} : vector<3x404xbf16> to vector<3x320xbf16>
    %cst_41 = arith.constant dense<0.000000e+00> : vector<16x320xf32>
    %66 = tpu.matmul %64, %65, %cst_41 {dimension_numbers = #tpu.dot_dimension_numbers<[1], [0], [0], [1], [0, 0, 1, 1], [], []>} : vector<16x3xbf16>, vector<3x320xbf16>, vector<16x320xf32> -> vector<16x320xf32>
    %67 = arith.addf %62, %66 : vector<16x320xf32>
    %c13 = arith.constant 13 : index
    %c0_42 = arith.constant 0 : index
    %c0_43 = arith.constant 0 : index
    %68 = vector.load %arg3[%c13, %c0_42, %c0_43] : memref<25x16x3xbf16, #tpu.memory_space<vmem>>, vector<1x16x3xbf16>
    %69 = vector.shape_cast %68 : vector<1x16x3xbf16> to vector<16x3xbf16>
    %70 = vector.extract_strided_slice %1 {offsets = [0, 43], sizes = [3, 320], strides = [1, 1]} : vector<3x404xbf16> to vector<3x320xbf16>
    %cst_44 = arith.constant dense<0.000000e+00> : vector<16x320xf32>
    %71 = tpu.matmul %69, %70, %cst_44 {dimension_numbers = #tpu.dot_dimension_numbers<[1], [0], [0], [1], [0, 0, 1, 1], [], []>} : vector<16x3xbf16>, vector<3x320xbf16>, vector<16x320xf32> -> vector<16x320xf32>
    %72 = arith.addf %67, %71 : vector<16x320xf32>
    %c14 = arith.constant 14 : index
    %c0_45 = arith.constant 0 : index
    %c0_46 = arith.constant 0 : index
    %73 = vector.load %arg3[%c14, %c0_45, %c0_46] : memref<25x16x3xbf16, #tpu.memory_space<vmem>>, vector<1x16x3xbf16>
    %74 = vector.shape_cast %73 : vector<1x16x3xbf16> to vector<16x3xbf16>
    %75 = vector.extract_strided_slice %1 {offsets = [0, 44], sizes = [3, 320], strides = [1, 1]} : vector<3x404xbf16> to vector<3x320xbf16>
    %cst_47 = arith.constant dense<0.000000e+00> : vector<16x320xf32>
    %76 = tpu.matmul %74, %75, %cst_47 {dimension_numbers = #tpu.dot_dimension_numbers<[1], [0], [0], [1], [0, 0, 1, 1], [], []>} : vector<16x3xbf16>, vector<3x320xbf16>, vector<16x320xf32> -> vector<16x320xf32>
    %77 = arith.addf %72, %76 : vector<16x320xf32>
    %c15 = arith.constant 15 : index
    %c0_48 = arith.constant 0 : index
    %c0_49 = arith.constant 0 : index
    %78 = vector.load %arg3[%c15, %c0_48, %c0_49] : memref<25x16x3xbf16, #tpu.memory_space<vmem>>, vector<1x16x3xbf16>
    %79 = vector.shape_cast %78 : vector<1x16x3xbf16> to vector<16x3xbf16>
    %80 = vector.extract_strided_slice %1 {offsets = [0, 60], sizes = [3, 320], strides = [1, 1]} : vector<3x404xbf16> to vector<3x320xbf16>
    %cst_50 = arith.constant dense<0.000000e+00> : vector<16x320xf32>
    %81 = tpu.matmul %79, %80, %cst_50 {dimension_numbers = #tpu.dot_dimension_numbers<[1], [0], [0], [1], [0, 0, 1, 1], [], []>} : vector<16x3xbf16>, vector<3x320xbf16>, vector<16x320xf32> -> vector<16x320xf32>
    %82 = arith.addf %77, %81 : vector<16x320xf32>
    %c16 = arith.constant 16 : index
    %c0_51 = arith.constant 0 : index
    %c0_52 = arith.constant 0 : index
    %83 = vector.load %arg3[%c16, %c0_51, %c0_52] : memref<25x16x3xbf16, #tpu.memory_space<vmem>>, vector<1x16x3xbf16>
    %84 = vector.shape_cast %83 : vector<1x16x3xbf16> to vector<16x3xbf16>
    %85 = vector.extract_strided_slice %1 {offsets = [0, 61], sizes = [3, 320], strides = [1, 1]} : vector<3x404xbf16> to vector<3x320xbf16>
    %cst_53 = arith.constant dense<0.000000e+00> : vector<16x320xf32>
    %86 = tpu.matmul %84, %85, %cst_53 {dimension_numbers = #tpu.dot_dimension_numbers<[1], [0], [0], [1], [0, 0, 1, 1], [], []>} : vector<16x3xbf16>, vector<3x320xbf16>, vector<16x320xf32> -> vector<16x320xf32>
    %87 = arith.addf %82, %86 : vector<16x320xf32>
    %c17 = arith.constant 17 : index
    %c0_54 = arith.constant 0 : index
    %c0_55 = arith.constant 0 : index
    %88 = vector.load %arg3[%c17, %c0_54, %c0_55] : memref<25x16x3xbf16, #tpu.memory_space<vmem>>, vector<1x16x3xbf16>
    %89 = vector.shape_cast %88 : vector<1x16x3xbf16> to vector<16x3xbf16>
    %90 = vector.extract_strided_slice %1 {offsets = [0, 62], sizes = [3, 320], strides = [1, 1]} : vector<3x404xbf16> to vector<3x320xbf16>
    %cst_56 = arith.constant dense<0.000000e+00> : vector<16x320xf32>
    %91 = tpu.matmul %89, %90, %cst_56 {dimension_numbers = #tpu.dot_dimension_numbers<[1], [0], [0], [1], [0, 0, 1, 1], [], []>} : vector<16x3xbf16>, vector<3x320xbf16>, vector<16x320xf32> -> vector<16x320xf32>
    %92 = arith.addf %87, %91 : vector<16x320xf32>
    %c18 = arith.constant 18 : index
    %c0_57 = arith.constant 0 : index
    %c0_58 = arith.constant 0 : index
    %93 = vector.load %arg3[%c18, %c0_57, %c0_58] : memref<25x16x3xbf16, #tpu.memory_space<vmem>>, vector<1x16x3xbf16>
    %94 = vector.shape_cast %93 : vector<1x16x3xbf16> to vector<16x3xbf16>
    %95 = vector.extract_strided_slice %1 {offsets = [0, 63], sizes = [3, 320], strides = [1, 1]} : vector<3x404xbf16> to vector<3x320xbf16>
    %cst_59 = arith.constant dense<0.000000e+00> : vector<16x320xf32>
    %96 = tpu.matmul %94, %95, %cst_59 {dimension_numbers = #tpu.dot_dimension_numbers<[1], [0], [0], [1], [0, 0, 1, 1], [], []>} : vector<16x3xbf16>, vector<3x320xbf16>, vector<16x320xf32> -> vector<16x320xf32>
    %97 = arith.addf %92, %96 : vector<16x320xf32>
    %c19 = arith.constant 19 : index
    %c0_60 = arith.constant 0 : index
    %c0_61 = arith.constant 0 : index
    %98 = vector.load %arg3[%c19, %c0_60, %c0_61] : memref<25x16x3xbf16, #tpu.memory_space<vmem>>, vector<1x16x3xbf16>
    %99 = vector.shape_cast %98 : vector<1x16x3xbf16> to vector<16x3xbf16>
    %100 = vector.extract_strided_slice %1 {offsets = [0, 64], sizes = [3, 320], strides = [1, 1]} : vector<3x404xbf16> to vector<3x320xbf16>
    %cst_62 = arith.constant dense<0.000000e+00> : vector<16x320xf32>
    %101 = tpu.matmul %99, %100, %cst_62 {dimension_numbers = #tpu.dot_dimension_numbers<[1], [0], [0], [1], [0, 0, 1, 1], [], []>} : vector<16x3xbf16>, vector<3x320xbf16>, vector<16x320xf32> -> vector<16x320xf32>
    %102 = arith.addf %97, %101 : vector<16x320xf32>
    %c20 = arith.constant 20 : index
    %c0_63 = arith.constant 0 : index
    %c0_64 = arith.constant 0 : index
    %103 = vector.load %arg3[%c20, %c0_63, %c0_64] : memref<25x16x3xbf16, #tpu.memory_space<vmem>>, vector<1x16x3xbf16>
    %104 = vector.shape_cast %103 : vector<1x16x3xbf16> to vector<16x3xbf16>
    %105 = vector.extract_strided_slice %1 {offsets = [0, 80], sizes = [3, 320], strides = [1, 1]} : vector<3x404xbf16> to vector<3x320xbf16>
    %cst_65 = arith.constant dense<0.000000e+00> : vector<16x320xf32>
    %106 = tpu.matmul %104, %105, %cst_65 {dimension_numbers = #tpu.dot_dimension_numbers<[1], [0], [0], [1], [0, 0, 1, 1], [], []>} : vector<16x3xbf16>, vector<3x320xbf16>, vector<16x320xf32> -> vector<16x320xf32>
    %107 = arith.addf %102, %106 : vector<16x320xf32>
    %c21 = arith.constant 21 : index
    %c0_66 = arith.constant 0 : index
    %c0_67 = arith.constant 0 : index
    %108 = vector.load %arg3[%c21, %c0_66, %c0_67] : memref<25x16x3xbf16, #tpu.memory_space<vmem>>, vector<1x16x3xbf16>
    %109 = vector.shape_cast %108 : vector<1x16x3xbf16> to vector<16x3xbf16>
    %110 = vector.extract_strided_slice %1 {offsets = [0, 81], sizes = [3, 320], strides = [1, 1]} : vector<3x404xbf16> to vector<3x320xbf16>
    %cst_68 = arith.constant dense<0.000000e+00> : vector<16x320xf32>
    %111 = tpu.matmul %109, %110, %cst_68 {dimension_numbers = #tpu.dot_dimension_numbers<[1], [0], [0], [1], [0, 0, 1, 1], [], []>} : vector<16x3xbf16>, vector<3x320xbf16>, vector<16x320xf32> -> vector<16x320xf32>
    %112 = arith.addf %107, %111 : vector<16x320xf32>
    %c22 = arith.constant 22 : index
    %c0_69 = arith.constant 0 : index
    %c0_70 = arith.constant 0 : index
    %113 = vector.load %arg3[%c22, %c0_69, %c0_70] : memref<25x16x3xbf16, #tpu.memory_space<vmem>>, vector<1x16x3xbf16>
    %114 = vector.shape_cast %113 : vector<1x16x3xbf16> to vector<16x3xbf16>
    %115 = vector.extract_strided_slice %1 {offsets = [0, 82], sizes = [3, 320], strides = [1, 1]} : vector<3x404xbf16> to vector<3x320xbf16>
    %cst_71 = arith.constant dense<0.000000e+00> : vector<16x320xf32>
    %116 = tpu.matmul %114, %115, %cst_71 {dimension_numbers = #tpu.dot_dimension_numbers<[1], [0], [0], [1], [0, 0, 1, 1], [], []>} : vector<16x3xbf16>, vector<3x320xbf16>, vector<16x320xf32> -> vector<16x320xf32>
    %117 = arith.addf %112, %116 : vector<16x320xf32>
    %c23 = arith.constant 23 : index
    %c0_72 = arith.constant 0 : index
    %c0_73 = arith.constant 0 : index
    %118 = vector.load %arg3[%c23, %c0_72, %c0_73] : memref<25x16x3xbf16, #tpu.memory_space<vmem>>, vector<1x16x3xbf16>
    %119 = vector.shape_cast %118 : vector<1x16x3xbf16> to vector<16x3xbf16>
    %120 = vector.extract_strided_slice %1 {offsets = [0, 83], sizes = [3, 320], strides = [1, 1]} : vector<3x404xbf16> to vector<3x320xbf16>
    %cst_74 = arith.constant dense<0.000000e+00> : vector<16x320xf32>
    %121 = tpu.matmul %119, %120, %cst_74 {dimension_numbers = #tpu.dot_dimension_numbers<[1], [0], [0], [1], [0, 0, 1, 1], [], []>} : vector<16x3xbf16>, vector<3x320xbf16>, vector<16x320xf32> -> vector<16x320xf32>
    %122 = arith.addf %117, %121 : vector<16x320xf32>
    %c24 = arith.constant 24 : index
    %c0_75 = arith.constant 0 : index
    %c0_76 = arith.constant 0 : index
    %123 = vector.load %arg3[%c24, %c0_75, %c0_76] : memref<25x16x3xbf16, #tpu.memory_space<vmem>>, vector<1x16x3xbf16>
    %124 = vector.shape_cast %123 : vector<1x16x3xbf16> to vector<16x3xbf16>
    %125 = vector.extract_strided_slice %1 {offsets = [0, 84], sizes = [3, 320], strides = [1, 1]} : vector<3x404xbf16> to vector<3x320xbf16>
    %cst_77 = arith.constant dense<0.000000e+00> : vector<16x320xf32>
    %126 = tpu.matmul %124, %125, %cst_77 {dimension_numbers = #tpu.dot_dimension_numbers<[1], [0], [0], [1], [0, 0, 1, 1], [], []>} : vector<16x3xbf16>, vector<3x320xbf16>, vector<16x320xf32> -> vector<16x320xf32>
    %127 = arith.addf %122, %126 : vector<16x320xf32>
    %c0_78 = arith.constant 0 : index
    %c0_79 = arith.constant 0 : index
    %128 = vector.load %arg4[%c0_78, %c0_79] : memref<16x17xf32, #tpu.memory_space<vmem>>, vector<16x17xf32>
    %c0_80 = arith.constant 0 : index
    %c0_81 = arith.constant 0 : index
    %129 = vector.load %arg2[%c0_80, %c0_81] : memref<1x320xf32, #tpu.memory_space<vmem>>, vector<1x320xf32>
    %cst_82 = arith.constant -1.000000e+02 : f32
    %cst_83 = arith.constant 1.000000e+02 : f32
    %130 = vector.broadcast %cst_82 : f32 to vector<16x320xf32>
    %131 = arith.maximumf %130, %127 : vector<16x320xf32>
    %132 = vector.broadcast %cst_83 : f32 to vector<16x320xf32>
    %133 = arith.minimumf %132, %131 : vector<16x320xf32>
    %cst_84 = arith.constant 0.000000e+00 : f32
    %134 = vector.broadcast %cst_84 : f32 to vector<16x320xf32>
    %135 = arith.subf %133, %134 : vector<16x320xf32>
    %cst_85 = arith.constant -3.200000e-03 : f32
    %136 = vector.broadcast %cst_85 : f32 to vector<16x320xf32>
    %137 = arith.mulf %136, %135 : vector<16x320xf32>
    %138 = arith.mulf %137, %135 : vector<16x320xf32>
    %139 = math.exp %138 : vector<16x320xf32>
    %cst_86 = arith.constant 8.000000e-02 : f32
    %140 = vector.broadcast %cst_86 : f32 to vector<16x320xf32>
    %141 = arith.mulf %140, %135 : vector<16x320xf32>
    %142 = math.exp %141 : vector<16x320xf32>
    %143 = tpu.reciprocal %142 {approx = true} : vector<16x320xf32> -> vector<16x320xf32>
    %144 = vector.extract_strided_slice %128 {offsets = [0, 16], sizes = [16, 1], strides = [1, 1]} : vector<16x17xf32> to vector<16x1xf32>
    %145 = vector.broadcast %144 : vector<16x1xf32> to vector<16x320xf32>
    %146 = arith.mulf %145, %142 : vector<16x320xf32>
    %147 = vector.extract_strided_slice %128 {offsets = [0, 15], sizes = [16, 1], strides = [1, 1]} : vector<16x17xf32> to vector<16x1xf32>
    %148 = vector.broadcast %147 : vector<16x1xf32> to vector<16x320xf32>
    %149 = arith.addf %146, %148 : vector<16x320xf32>
    %150 = arith.mulf %149, %142 : vector<16x320xf32>
    %151 = vector.extract_strided_slice %128 {offsets = [0, 14], sizes = [16, 1], strides = [1, 1]} : vector<16x17xf32> to vector<16x1xf32>
    %152 = vector.broadcast %151 : vector<16x1xf32> to vector<16x320xf32>
    %153 = arith.addf %150, %152 : vector<16x320xf32>
    %154 = arith.mulf %153, %142 : vector<16x320xf32>
    %155 = vector.extract_strided_slice %128 {offsets = [0, 13], sizes = [16, 1], strides = [1, 1]} : vector<16x17xf32> to vector<16x1xf32>
    %156 = vector.broadcast %155 : vector<16x1xf32> to vector<16x320xf32>
    %157 = arith.addf %154, %156 : vector<16x320xf32>
    %158 = arith.mulf %157, %142 : vector<16x320xf32>
    %159 = vector.extract_strided_slice %128 {offsets = [0, 12], sizes = [16, 1], strides = [1, 1]} : vector<16x17xf32> to vector<16x1xf32>
    %160 = vector.broadcast %159 : vector<16x1xf32> to vector<16x320xf32>
    %161 = arith.addf %158, %160 : vector<16x320xf32>
    %162 = arith.mulf %161, %142 : vector<16x320xf32>
    %163 = vector.extract_strided_slice %128 {offsets = [0, 11], sizes = [16, 1], strides = [1, 1]} : vector<16x17xf32> to vector<16x1xf32>
    %164 = vector.broadcast %163 : vector<16x1xf32> to vector<16x320xf32>
    %165 = arith.addf %162, %164 : vector<16x320xf32>
    %166 = arith.mulf %165, %142 : vector<16x320xf32>
    %167 = vector.extract_strided_slice %128 {offsets = [0, 10], sizes = [16, 1], strides = [1, 1]} : vector<16x17xf32> to vector<16x1xf32>
    %168 = vector.broadcast %167 : vector<16x1xf32> to vector<16x320xf32>
    %169 = arith.addf %166, %168 : vector<16x320xf32>
    %170 = arith.mulf %169, %142 : vector<16x320xf32>
    %171 = vector.extract_strided_slice %128 {offsets = [0, 9], sizes = [16, 1], strides = [1, 1]} : vector<16x17xf32> to vector<16x1xf32>
    %172 = vector.broadcast %171 : vector<16x1xf32> to vector<16x320xf32>
    %173 = arith.addf %170, %172 : vector<16x320xf32>
    %174 = vector.extract_strided_slice %128 {offsets = [0, 0], sizes = [16, 1], strides = [1, 1]} : vector<16x17xf32> to vector<16x1xf32>
    %175 = vector.broadcast %174 : vector<16x1xf32> to vector<16x320xf32>
    %176 = arith.mulf %175, %143 : vector<16x320xf32>
    %177 = vector.extract_strided_slice %128 {offsets = [0, 1], sizes = [16, 1], strides = [1, 1]} : vector<16x17xf32> to vector<16x1xf32>
    %178 = vector.broadcast %177 : vector<16x1xf32> to vector<16x320xf32>
    %179 = arith.addf %176, %178 : vector<16x320xf32>
    %180 = arith.mulf %179, %143 : vector<16x320xf32>
    %181 = vector.extract_strided_slice %128 {offsets = [0, 2], sizes = [16, 1], strides = [1, 1]} : vector<16x17xf32> to vector<16x1xf32>
    %182 = vector.broadcast %181 : vector<16x1xf32> to vector<16x320xf32>
    %183 = arith.addf %180, %182 : vector<16x320xf32>
    %184 = arith.mulf %183, %143 : vector<16x320xf32>
    %185 = vector.extract_strided_slice %128 {offsets = [0, 3], sizes = [16, 1], strides = [1, 1]} : vector<16x17xf32> to vector<16x1xf32>
    %186 = vector.broadcast %185 : vector<16x1xf32> to vector<16x320xf32>
    %187 = arith.addf %184, %186 : vector<16x320xf32>
    %188 = arith.mulf %187, %143 : vector<16x320xf32>
    %189 = vector.extract_strided_slice %128 {offsets = [0, 4], sizes = [16, 1], strides = [1, 1]} : vector<16x17xf32> to vector<16x1xf32>
    %190 = vector.broadcast %189 : vector<16x1xf32> to vector<16x320xf32>
    %191 = arith.addf %188, %190 : vector<16x320xf32>
    %192 = arith.mulf %191, %143 : vector<16x320xf32>
    %193 = vector.extract_strided_slice %128 {offsets = [0, 5], sizes = [16, 1], strides = [1, 1]} : vector<16x17xf32> to vector<16x1xf32>
    %194 = vector.broadcast %193 : vector<16x1xf32> to vector<16x320xf32>
    %195 = arith.addf %192, %194 : vector<16x320xf32>
    %196 = arith.mulf %195, %143 : vector<16x320xf32>
    %197 = vector.extract_strided_slice %128 {offsets = [0, 6], sizes = [16, 1], strides = [1, 1]} : vector<16x17xf32> to vector<16x1xf32>
    %198 = vector.broadcast %197 : vector<16x1xf32> to vector<16x320xf32>
    %199 = arith.addf %196, %198 : vector<16x320xf32>
    %200 = arith.mulf %199, %143 : vector<16x320xf32>
    %201 = vector.extract_strided_slice %128 {offsets = [0, 7], sizes = [16, 1], strides = [1, 1]} : vector<16x17xf32> to vector<16x1xf32>
    %202 = vector.broadcast %201 : vector<16x1xf32> to vector<16x320xf32>
    %203 = arith.addf %200, %202 : vector<16x320xf32>
    %204 = vector.extract_strided_slice %128 {offsets = [0, 8], sizes = [16, 1], strides = [1, 1]} : vector<16x17xf32> to vector<16x1xf32>
    %205 = arith.mulf %173, %142 : vector<16x320xf32>
    %206 = vector.broadcast %204 : vector<16x1xf32> to vector<16x320xf32>
    %207 = arith.addf %206, %205 : vector<16x320xf32>
    %208 = arith.mulf %203, %143 : vector<16x320xf32>
    %209 = arith.addf %207, %208 : vector<16x320xf32>
    %210 = arith.mulf %139, %209 : vector<16x320xf32>
    %211 = vector.broadcast %129 : vector<1x320xf32> to vector<16x320xf32>
    %212 = arith.mulf %210, %211 : vector<16x320xf32>
    %213 = arith.truncf %212 : vector<16x320xf32> to vector<16x320xbf16>
    %cst_87 = arith.constant 0.000000e+00 : f32
    %214 = vector.broadcast %cst_87 : f32 to vector<1x3x404xf32>
    %c0_88 = arith.constant 0 : index
    %c0_89 = arith.constant 0 : index
    %c0_90 = arith.constant 0 : index
    %215 = vector.load %arg6[%c0_88, %c0_89, %c0_90] : memref<1x3x404xf32, #tpu.memory_space<vmem>>, vector<1x3x404xf32>
    tpu.vector_store %arg6[%c0_88, %c0_89, %c0_90], %214 {strides = array<i32>} : memref<1x3x404xf32, #tpu.memory_space<vmem>>, vector<1x3x404xf32>,
    %c0_91 = arith.constant 0 : index
    %c0_92 = arith.constant 0 : index
    %c0_93 = arith.constant 0 : index
    %216 = vector.load %arg5[%c0_91, %c0_92, %c0_93] : memref<25x3x16xbf16, #tpu.memory_space<vmem>>, vector<1x3x16xbf16>
    %217 = vector.shape_cast %216 : vector<1x3x16xbf16> to vector<3x16xbf16>
    %cst_94 = arith.constant dense<0.000000e+00> : vector<3x320xf32>
    %218 = tpu.matmul %217, %213, %cst_94 {dimension_numbers = #tpu.dot_dimension_numbers<[1], [0], [0], [1], [0, 0, 1, 1], [], []>} : vector<3x16xbf16>, vector<16x320xbf16>, vector<3x320xf32> -> vector<3x320xf32>
    %c0_95 = arith.constant 0 : index
    %c0_96 = arith.constant 0 : index
    %c0_97 = arith.constant 0 : index
    %219 = vector.load %arg6[%c0_95, %c0_96, %c0_97] : memref<1x3x404xf32, #tpu.memory_space<vmem>>, vector<1x3x320xf32>
    %220 = vector.shape_cast %219 : vector<1x3x320xf32> to vector<3x320xf32>
    %221 = arith.addf %220, %218 : vector<3x320xf32>
    %c0_98 = arith.constant 0 : index
    %c0_99 = arith.constant 0 : index
    %c0_100 = arith.constant 0 : index
    %222 = vector.load %arg6[%c0_98, %c0_99, %c0_100] : memref<1x3x404xf32, #tpu.memory_space<vmem>>, vector<1x3x320xf32>
    %223 = vector.shape_cast %222 : vector<1x3x320xf32> to vector<3x320xf32>
    %224 = vector.shape_cast %221 : vector<3x320xf32> to vector<1x3x320xf32>
    tpu.vector_store %arg6[%c0_98, %c0_99, %c0_100], %224 {strides = array<i32>} : memref<1x3x404xf32, #tpu.memory_space<vmem>>, vector<1x3x320xf32>,
    %c1_101 = arith.constant 1 : index
    %c0_102 = arith.constant 0 : index
    %c0_103 = arith.constant 0 : index
    %225 = vector.load %arg5[%c1_101, %c0_102, %c0_103] : memref<25x3x16xbf16, #tpu.memory_space<vmem>>, vector<1x3x16xbf16>
    %226 = vector.shape_cast %225 : vector<1x3x16xbf16> to vector<3x16xbf16>
    %cst_104 = arith.constant dense<0.000000e+00> : vector<3x320xf32>
    %227 = tpu.matmul %226, %213, %cst_104 {dimension_numbers = #tpu.dot_dimension_numbers<[1], [0], [0], [1], [0, 0, 1, 1], [], []>} : vector<3x16xbf16>, vector<16x320xbf16>, vector<3x320xf32> -> vector<3x320xf32>
    %c0_105 = arith.constant 0 : index
    %c0_106 = arith.constant 0 : index
    %c1_107 = arith.constant 1 : index
    %228 = vector.load %arg6[%c0_105, %c0_106, %c1_107] : memref<1x3x404xf32, #tpu.memory_space<vmem>>, vector<1x3x320xf32>
    %229 = vector.shape_cast %228 : vector<1x3x320xf32> to vector<3x320xf32>
    %230 = arith.addf %229, %227 : vector<3x320xf32>
    %c0_108 = arith.constant 0 : index
    %c0_109 = arith.constant 0 : index
    %c1_110 = arith.constant 1 : index
    %231 = vector.load %arg6[%c0_108, %c0_109, %c1_110] : memref<1x3x404xf32, #tpu.memory_space<vmem>>, vector<1x3x320xf32>
    %232 = vector.shape_cast %231 : vector<1x3x320xf32> to vector<3x320xf32>
    %233 = vector.shape_cast %230 : vector<3x320xf32> to vector<1x3x320xf32>
    tpu.vector_store %arg6[%c0_108, %c0_109, %c1_110], %233 {strides = array<i32>} : memref<1x3x404xf32, #tpu.memory_space<vmem>>, vector<1x3x320xf32>,
    %c2_111 = arith.constant 2 : index
    %c0_112 = arith.constant 0 : index
    %c0_113 = arith.constant 0 : index
    %234 = vector.load %arg5[%c2_111, %c0_112, %c0_113] : memref<25x3x16xbf16, #tpu.memory_space<vmem>>, vector<1x3x16xbf16>
    %235 = vector.shape_cast %234 : vector<1x3x16xbf16> to vector<3x16xbf16>
    %cst_114 = arith.constant dense<0.000000e+00> : vector<3x320xf32>
    %236 = tpu.matmul %235, %213, %cst_114 {dimension_numbers = #tpu.dot_dimension_numbers<[1], [0], [0], [1], [0, 0, 1, 1], [], []>} : vector<3x16xbf16>, vector<16x320xbf16>, vector<3x320xf32> -> vector<3x320xf32>
    %c0_115 = arith.constant 0 : index
    %c0_116 = arith.constant 0 : index
    %c2_117 = arith.constant 2 : index
    %237 = vector.load %arg6[%c0_115, %c0_116, %c2_117] : memref<1x3x404xf32, #tpu.memory_space<vmem>>, vector<1x3x320xf32>
    %238 = vector.shape_cast %237 : vector<1x3x320xf32> to vector<3x320xf32>
    %239 = arith.addf %238, %236 : vector<3x320xf32>
    %c0_118 = arith.constant 0 : index
    %c0_119 = arith.constant 0 : index
    %c2_120 = arith.constant 2 : index
    %240 = vector.load %arg6[%c0_118, %c0_119, %c2_120] : memref<1x3x404xf32, #tpu.memory_space<vmem>>, vector<1x3x320xf32>
    %241 = vector.shape_cast %240 : vector<1x3x320xf32> to vector<3x320xf32>
    %242 = vector.shape_cast %239 : vector<3x320xf32> to vector<1x3x320xf32>
    tpu.vector_store %arg6[%c0_118, %c0_119, %c2_120], %242 {strides = array<i32>} : memref<1x3x404xf32, #tpu.memory_space<vmem>>, vector<1x3x320xf32>,
    %c3_121 = arith.constant 3 : index
    %c0_122 = arith.constant 0 : index
    %c0_123 = arith.constant 0 : index
    %243 = vector.load %arg5[%c3_121, %c0_122, %c0_123] : memref<25x3x16xbf16, #tpu.memory_space<vmem>>, vector<1x3x16xbf16>
    %244 = vector.shape_cast %243 : vector<1x3x16xbf16> to vector<3x16xbf16>
    %cst_124 = arith.constant dense<0.000000e+00> : vector<3x320xf32>
    %245 = tpu.matmul %244, %213, %cst_124 {dimension_numbers = #tpu.dot_dimension_numbers<[1], [0], [0], [1], [0, 0, 1, 1], [], []>} : vector<3x16xbf16>, vector<16x320xbf16>, vector<3x320xf32> -> vector<3x320xf32>
    %c0_125 = arith.constant 0 : index
    %c0_126 = arith.constant 0 : index
    %c3_127 = arith.constant 3 : index
    %246 = vector.load %arg6[%c0_125, %c0_126, %c3_127] : memref<1x3x404xf32, #tpu.memory_space<vmem>>, vector<1x3x320xf32>
    %247 = vector.shape_cast %246 : vector<1x3x320xf32> to vector<3x320xf32>
    %248 = arith.addf %247, %245 : vector<3x320xf32>
    %c0_128 = arith.constant 0 : index
    %c0_129 = arith.constant 0 : index
    %c3_130 = arith.constant 3 : index
    %249 = vector.load %arg6[%c0_128, %c0_129, %c3_130] : memref<1x3x404xf32, #tpu.memory_space<vmem>>, vector<1x3x320xf32>
    %250 = vector.shape_cast %249 : vector<1x3x320xf32> to vector<3x320xf32>
    %251 = vector.shape_cast %248 : vector<3x320xf32> to vector<1x3x320xf32>
    tpu.vector_store %arg6[%c0_128, %c0_129, %c3_130], %251 {strides = array<i32>} : memref<1x3x404xf32, #tpu.memory_space<vmem>>, vector<1x3x320xf32>,
    %c4_131 = arith.constant 4 : index
    %c0_132 = arith.constant 0 : index
    %c0_133 = arith.constant 0 : index
    %252 = vector.load %arg5[%c4_131, %c0_132, %c0_133] : memref<25x3x16xbf16, #tpu.memory_space<vmem>>, vector<1x3x16xbf16>
    %253 = vector.shape_cast %252 : vector<1x3x16xbf16> to vector<3x16xbf16>
    %cst_134 = arith.constant dense<0.000000e+00> : vector<3x320xf32>
    %254 = tpu.matmul %253, %213, %cst_134 {dimension_numbers = #tpu.dot_dimension_numbers<[1], [0], [0], [1], [0, 0, 1, 1], [], []>} : vector<3x16xbf16>, vector<16x320xbf16>, vector<3x320xf32> -> vector<3x320xf32>
    %c0_135 = arith.constant 0 : index
    %c0_136 = arith.constant 0 : index
    %c4_137 = arith.constant 4 : index
    %255 = vector.load %arg6[%c0_135, %c0_136, %c4_137] : memref<1x3x404xf32, #tpu.memory_space<vmem>>, vector<1x3x320xf32>
    %256 = vector.shape_cast %255 : vector<1x3x320xf32> to vector<3x320xf32>
    %257 = arith.addf %256, %254 : vector<3x320xf32>
    %c0_138 = arith.constant 0 : index
    %c0_139 = arith.constant 0 : index
    %c4_140 = arith.constant 4 : index
    %258 = vector.load %arg6[%c0_138, %c0_139, %c4_140] : memref<1x3x404xf32, #tpu.memory_space<vmem>>, vector<1x3x320xf32>
    %259 = vector.shape_cast %258 : vector<1x3x320xf32> to vector<3x320xf32>
    %260 = vector.shape_cast %257 : vector<3x320xf32> to vector<1x3x320xf32>
    tpu.vector_store %arg6[%c0_138, %c0_139, %c4_140], %260 {strides = array<i32>} : memref<1x3x404xf32, #tpu.memory_space<vmem>>, vector<1x3x320xf32>,
    %c5_141 = arith.constant 5 : index
    %c0_142 = arith.constant 0 : index
    %c0_143 = arith.constant 0 : index
    %261 = vector.load %arg5[%c5_141, %c0_142, %c0_143] : memref<25x3x16xbf16, #tpu.memory_space<vmem>>, vector<1x3x16xbf16>
    %262 = vector.shape_cast %261 : vector<1x3x16xbf16> to vector<3x16xbf16>
    %cst_144 = arith.constant dense<0.000000e+00> : vector<3x320xf32>
    %263 = tpu.matmul %262, %213, %cst_144 {dimension_numbers = #tpu.dot_dimension_numbers<[1], [0], [0], [1], [0, 0, 1, 1], [], []>} : vector<3x16xbf16>, vector<16x320xbf16>, vector<3x320xf32> -> vector<3x320xf32>
    %c0_145 = arith.constant 0 : index
    %c0_146 = arith.constant 0 : index
    %c20_147 = arith.constant 20 : index
    %264 = vector.load %arg6[%c0_145, %c0_146, %c20_147] : memref<1x3x404xf32, #tpu.memory_space<vmem>>, vector<1x3x320xf32>
    %265 = vector.shape_cast %264 : vector<1x3x320xf32> to vector<3x320xf32>
    %266 = arith.addf %265, %263 : vector<3x320xf32>
    %c0_148 = arith.constant 0 : index
    %c0_149 = arith.constant 0 : index
    %c20_150 = arith.constant 20 : index
    %267 = vector.load %arg6[%c0_148, %c0_149, %c20_150] : memref<1x3x404xf32, #tpu.memory_space<vmem>>, vector<1x3x320xf32>
    %268 = vector.shape_cast %267 : vector<1x3x320xf32> to vector<3x320xf32>
    %269 = vector.shape_cast %266 : vector<3x320xf32> to vector<1x3x320xf32>
    tpu.vector_store %arg6[%c0_148, %c0_149, %c20_150], %269 {strides = array<i32>} : memref<1x3x404xf32, #tpu.memory_space<vmem>>, vector<1x3x320xf32>,
    %c6_151 = arith.constant 6 : index
    %c0_152 = arith.constant 0 : index
    %c0_153 = arith.constant 0 : index
    %270 = vector.load %arg5[%c6_151, %c0_152, %c0_153] : memref<25x3x16xbf16, #tpu.memory_space<vmem>>, vector<1x3x16xbf16>
    %271 = vector.shape_cast %270 : vector<1x3x16xbf16> to vector<3x16xbf16>
    %cst_154 = arith.constant dense<0.000000e+00> : vector<3x320xf32>
    %272 = tpu.matmul %271, %213, %cst_154 {dimension_numbers = #tpu.dot_dimension_numbers<[1], [0], [0], [1], [0, 0, 1, 1], [], []>} : vector<3x16xbf16>, vector<16x320xbf16>, vector<3x320xf32> -> vector<3x320xf32>
    %c0_155 = arith.constant 0 : index
    %c0_156 = arith.constant 0 : index
    %c21_157 = arith.constant 21 : index
    %273 = vector.load %arg6[%c0_155, %c0_156, %c21_157] : memref<1x3x404xf32, #tpu.memory_space<vmem>>, vector<1x3x320xf32>
    %274 = vector.shape_cast %273 : vector<1x3x320xf32> to vector<3x320xf32>
    %275 = arith.addf %274, %272 : vector<3x320xf32>
    %c0_158 = arith.constant 0 : index
    %c0_159 = arith.constant 0 : index
    %c21_160 = arith.constant 21 : index
    %276 = vector.load %arg6[%c0_158, %c0_159, %c21_160] : memref<1x3x404xf32, #tpu.memory_space<vmem>>, vector<1x3x320xf32>
    %277 = vector.shape_cast %276 : vector<1x3x320xf32> to vector<3x320xf32>
    %278 = vector.shape_cast %275 : vector<3x320xf32> to vector<1x3x320xf32>
    tpu.vector_store %arg6[%c0_158, %c0_159, %c21_160], %278 {strides = array<i32>} : memref<1x3x404xf32, #tpu.memory_space<vmem>>, vector<1x3x320xf32>,
    %c7_161 = arith.constant 7 : index
    %c0_162 = arith.constant 0 : index
    %c0_163 = arith.constant 0 : index
    %279 = vector.load %arg5[%c7_161, %c0_162, %c0_163] : memref<25x3x16xbf16, #tpu.memory_space<vmem>>, vector<1x3x16xbf16>
    %280 = vector.shape_cast %279 : vector<1x3x16xbf16> to vector<3x16xbf16>
    %cst_164 = arith.constant dense<0.000000e+00> : vector<3x320xf32>
    %281 = tpu.matmul %280, %213, %cst_164 {dimension_numbers = #tpu.dot_dimension_numbers<[1], [0], [0], [1], [0, 0, 1, 1], [], []>} : vector<3x16xbf16>, vector<16x320xbf16>, vector<3x320xf32> -> vector<3x320xf32>
    %c0_165 = arith.constant 0 : index
    %c0_166 = arith.constant 0 : index
    %c22_167 = arith.constant 22 : index
    %282 = vector.load %arg6[%c0_165, %c0_166, %c22_167] : memref<1x3x404xf32, #tpu.memory_space<vmem>>, vector<1x3x320xf32>
    %283 = vector.shape_cast %282 : vector<1x3x320xf32> to vector<3x320xf32>
    %284 = arith.addf %283, %281 : vector<3x320xf32>
    %c0_168 = arith.constant 0 : index
    %c0_169 = arith.constant 0 : index
    %c22_170 = arith.constant 22 : index
    %285 = vector.load %arg6[%c0_168, %c0_169, %c22_170] : memref<1x3x404xf32, #tpu.memory_space<vmem>>, vector<1x3x320xf32>
    %286 = vector.shape_cast %285 : vector<1x3x320xf32> to vector<3x320xf32>
    %287 = vector.shape_cast %284 : vector<3x320xf32> to vector<1x3x320xf32>
    tpu.vector_store %arg6[%c0_168, %c0_169, %c22_170], %287 {strides = array<i32>} : memref<1x3x404xf32, #tpu.memory_space<vmem>>, vector<1x3x320xf32>,
    %c8_171 = arith.constant 8 : index
    %c0_172 = arith.constant 0 : index
    %c0_173 = arith.constant 0 : index
    %288 = vector.load %arg5[%c8_171, %c0_172, %c0_173] : memref<25x3x16xbf16, #tpu.memory_space<vmem>>, vector<1x3x16xbf16>
    %289 = vector.shape_cast %288 : vector<1x3x16xbf16> to vector<3x16xbf16>
    %cst_174 = arith.constant dense<0.000000e+00> : vector<3x320xf32>
    %290 = tpu.matmul %289, %213, %cst_174 {dimension_numbers = #tpu.dot_dimension_numbers<[1], [0], [0], [1], [0, 0, 1, 1], [], []>} : vector<3x16xbf16>, vector<16x320xbf16>, vector<3x320xf32> -> vector<3x320xf32>
    %c0_175 = arith.constant 0 : index
    %c0_176 = arith.constant 0 : index
    %c23_177 = arith.constant 23 : index
    %291 = vector.load %arg6[%c0_175, %c0_176, %c23_177] : memref<1x3x404xf32, #tpu.memory_space<vmem>>, vector<1x3x320xf32>
    %292 = vector.shape_cast %291 : vector<1x3x320xf32> to vector<3x320xf32>
    %293 = arith.addf %292, %290 : vector<3x320xf32>
    %c0_178 = arith.constant 0 : index
    %c0_179 = arith.constant 0 : index
    %c23_180 = arith.constant 23 : index
    %294 = vector.load %arg6[%c0_178, %c0_179, %c23_180] : memref<1x3x404xf32, #tpu.memory_space<vmem>>, vector<1x3x320xf32>
    %295 = vector.shape_cast %294 : vector<1x3x320xf32> to vector<3x320xf32>
    %296 = vector.shape_cast %293 : vector<3x320xf32> to vector<1x3x320xf32>
    tpu.vector_store %arg6[%c0_178, %c0_179, %c23_180], %296 {strides = array<i32>} : memref<1x3x404xf32, #tpu.memory_space<vmem>>, vector<1x3x320xf32>,
    %c9_181 = arith.constant 9 : index
    %c0_182 = arith.constant 0 : index
    %c0_183 = arith.constant 0 : index
    %297 = vector.load %arg5[%c9_181, %c0_182, %c0_183] : memref<25x3x16xbf16, #tpu.memory_space<vmem>>, vector<1x3x16xbf16>
    %298 = vector.shape_cast %297 : vector<1x3x16xbf16> to vector<3x16xbf16>
    %cst_184 = arith.constant dense<0.000000e+00> : vector<3x320xf32>
    %299 = tpu.matmul %298, %213, %cst_184 {dimension_numbers = #tpu.dot_dimension_numbers<[1], [0], [0], [1], [0, 0, 1, 1], [], []>} : vector<3x16xbf16>, vector<16x320xbf16>, vector<3x320xf32> -> vector<3x320xf32>
    %c0_185 = arith.constant 0 : index
    %c0_186 = arith.constant 0 : index
    %c24_187 = arith.constant 24 : index
    %300 = vector.load %arg6[%c0_185, %c0_186, %c24_187] : memref<1x3x404xf32, #tpu.memory_space<vmem>>, vector<1x3x320xf32>
    %301 = vector.shape_cast %300 : vector<1x3x320xf32> to vector<3x320xf32>
    %302 = arith.addf %301, %299 : vector<3x320xf32>
    %c0_188 = arith.constant 0 : index
    %c0_189 = arith.constant 0 : index
    %c24_190 = arith.constant 24 : index
    %303 = vector.load %arg6[%c0_188, %c0_189, %c24_190] : memref<1x3x404xf32, #tpu.memory_space<vmem>>, vector<1x3x320xf32>
    %304 = vector.shape_cast %303 : vector<1x3x320xf32> to vector<3x320xf32>
    %305 = vector.shape_cast %302 : vector<3x320xf32> to vector<1x3x320xf32>
    tpu.vector_store %arg6[%c0_188, %c0_189, %c24_190], %305 {strides = array<i32>} : memref<1x3x404xf32, #tpu.memory_space<vmem>>, vector<1x3x320xf32>,
    %c10_191 = arith.constant 10 : index
    %c0_192 = arith.constant 0 : index
    %c0_193 = arith.constant 0 : index
    %306 = vector.load %arg5[%c10_191, %c0_192, %c0_193] : memref<25x3x16xbf16, #tpu.memory_space<vmem>>, vector<1x3x16xbf16>
    %307 = vector.shape_cast %306 : vector<1x3x16xbf16> to vector<3x16xbf16>
    %cst_194 = arith.constant dense<0.000000e+00> : vector<3x320xf32>
    %308 = tpu.matmul %307, %213, %cst_194 {dimension_numbers = #tpu.dot_dimension_numbers<[1], [0], [0], [1], [0, 0, 1, 1], [], []>} : vector<3x16xbf16>, vector<16x320xbf16>, vector<3x320xf32> -> vector<3x320xf32>
    %c0_195 = arith.constant 0 : index
    %c0_196 = arith.constant 0 : index
    %c40 = arith.constant 40 : index
    %309 = vector.load %arg6[%c0_195, %c0_196, %c40] : memref<1x3x404xf32, #tpu.memory_space<vmem>>, vector<1x3x320xf32>
    %310 = vector.shape_cast %309 : vector<1x3x320xf32> to vector<3x320xf32>
    %311 = arith.addf %310, %308 : vector<3x320xf32>
    %c0_197 = arith.constant 0 : index
    %c0_198 = arith.constant 0 : index
    %c40_199 = arith.constant 40 : index
    %312 = vector.load %arg6[%c0_197, %c0_198, %c40_199] : memref<1x3x404xf32, #tpu.memory_space<vmem>>, vector<1x3x320xf32>
    %313 = vector.shape_cast %312 : vector<1x3x320xf32> to vector<3x320xf32>
    %314 = vector.shape_cast %311 : vector<3x320xf32> to vector<1x3x320xf32>
    tpu.vector_store %arg6[%c0_197, %c0_198, %c40_199], %314 {strides = array<i32>} : memref<1x3x404xf32, #tpu.memory_space<vmem>>, vector<1x3x320xf32>,
    %c11_200 = arith.constant 11 : index
    %c0_201 = arith.constant 0 : index
    %c0_202 = arith.constant 0 : index
    %315 = vector.load %arg5[%c11_200, %c0_201, %c0_202] : memref<25x3x16xbf16, #tpu.memory_space<vmem>>, vector<1x3x16xbf16>
    %316 = vector.shape_cast %315 : vector<1x3x16xbf16> to vector<3x16xbf16>
    %cst_203 = arith.constant dense<0.000000e+00> : vector<3x320xf32>
    %317 = tpu.matmul %316, %213, %cst_203 {dimension_numbers = #tpu.dot_dimension_numbers<[1], [0], [0], [1], [0, 0, 1, 1], [], []>} : vector<3x16xbf16>, vector<16x320xbf16>, vector<3x320xf32> -> vector<3x320xf32>
    %c0_204 = arith.constant 0 : index
    %c0_205 = arith.constant 0 : index
    %c41 = arith.constant 41 : index
    %318 = vector.load %arg6[%c0_204, %c0_205, %c41] : memref<1x3x404xf32, #tpu.memory_space<vmem>>, vector<1x3x320xf32>
    %319 = vector.shape_cast %318 : vector<1x3x320xf32> to vector<3x320xf32>
    %320 = arith.addf %319, %317 : vector<3x320xf32>
    %c0_206 = arith.constant 0 : index
    %c0_207 = arith.constant 0 : index
    %c41_208 = arith.constant 41 : index
    %321 = vector.load %arg6[%c0_206, %c0_207, %c41_208] : memref<1x3x404xf32, #tpu.memory_space<vmem>>, vector<1x3x320xf32>
    %322 = vector.shape_cast %321 : vector<1x3x320xf32> to vector<3x320xf32>
    %323 = vector.shape_cast %320 : vector<3x320xf32> to vector<1x3x320xf32>
    tpu.vector_store %arg6[%c0_206, %c0_207, %c41_208], %323 {strides = array<i32>} : memref<1x3x404xf32, #tpu.memory_space<vmem>>, vector<1x3x320xf32>,
    %c12_209 = arith.constant 12 : index
    %c0_210 = arith.constant 0 : index
    %c0_211 = arith.constant 0 : index
    %324 = vector.load %arg5[%c12_209, %c0_210, %c0_211] : memref<25x3x16xbf16, #tpu.memory_space<vmem>>, vector<1x3x16xbf16>
    %325 = vector.shape_cast %324 : vector<1x3x16xbf16> to vector<3x16xbf16>
    %cst_212 = arith.constant dense<0.000000e+00> : vector<3x320xf32>
    %326 = tpu.matmul %325, %213, %cst_212 {dimension_numbers = #tpu.dot_dimension_numbers<[1], [0], [0], [1], [0, 0, 1, 1], [], []>} : vector<3x16xbf16>, vector<16x320xbf16>, vector<3x320xf32> -> vector<3x320xf32>
    %c0_213 = arith.constant 0 : index
    %c0_214 = arith.constant 0 : index
    %c42 = arith.constant 42 : index
    %327 = vector.load %arg6[%c0_213, %c0_214, %c42] : memref<1x3x404xf32, #tpu.memory_space<vmem>>, vector<1x3x320xf32>
    %328 = vector.shape_cast %327 : vector<1x3x320xf32> to vector<3x320xf32>
    %329 = arith.addf %328, %326 : vector<3x320xf32>
    %c0_215 = arith.constant 0 : index
    %c0_216 = arith.constant 0 : index
    %c42_217 = arith.constant 42 : index
    %330 = vector.load %arg6[%c0_215, %c0_216, %c42_217] : memref<1x3x404xf32, #tpu.memory_space<vmem>>, vector<1x3x320xf32>
    %331 = vector.shape_cast %330 : vector<1x3x320xf32> to vector<3x320xf32>
    %332 = vector.shape_cast %329 : vector<3x320xf32> to vector<1x3x320xf32>
    tpu.vector_store %arg6[%c0_215, %c0_216, %c42_217], %332 {strides = array<i32>} : memref<1x3x404xf32, #tpu.memory_space<vmem>>, vector<1x3x320xf32>,
    %c13_218 = arith.constant 13 : index
    %c0_219 = arith.constant 0 : index
    %c0_220 = arith.constant 0 : index
    %333 = vector.load %arg5[%c13_218, %c0_219, %c0_220] : memref<25x3x16xbf16, #tpu.memory_space<vmem>>, vector<1x3x16xbf16>
    %334 = vector.shape_cast %333 : vector<1x3x16xbf16> to vector<3x16xbf16>
    %cst_221 = arith.constant dense<0.000000e+00> : vector<3x320xf32>
    %335 = tpu.matmul %334, %213, %cst_221 {dimension_numbers = #tpu.dot_dimension_numbers<[1], [0], [0], [1], [0, 0, 1, 1], [], []>} : vector<3x16xbf16>, vector<16x320xbf16>, vector<3x320xf32> -> vector<3x320xf32>
    %c0_222 = arith.constant 0 : index
    %c0_223 = arith.constant 0 : index
    %c43 = arith.constant 43 : index
    %336 = vector.load %arg6[%c0_222, %c0_223, %c43] : memref<1x3x404xf32, #tpu.memory_space<vmem>>, vector<1x3x320xf32>
    %337 = vector.shape_cast %336 : vector<1x3x320xf32> to vector<3x320xf32>
    %338 = arith.addf %337, %335 : vector<3x320xf32>
    %c0_224 = arith.constant 0 : index
    %c0_225 = arith.constant 0 : index
    %c43_226 = arith.constant 43 : index
    %339 = vector.load %arg6[%c0_224, %c0_225, %c43_226] : memref<1x3x404xf32, #tpu.memory_space<vmem>>, vector<1x3x320xf32>
    %340 = vector.shape_cast %339 : vector<1x3x320xf32> to vector<3x320xf32>
    %341 = vector.shape_cast %338 : vector<3x320xf32> to vector<1x3x320xf32>
    tpu.vector_store %arg6[%c0_224, %c0_225, %c43_226], %341 {strides = array<i32>} : memref<1x3x404xf32, #tpu.memory_space<vmem>>, vector<1x3x320xf32>,
    %c14_227 = arith.constant 14 : index
    %c0_228 = arith.constant 0 : index
    %c0_229 = arith.constant 0 : index
    %342 = vector.load %arg5[%c14_227, %c0_228, %c0_229] : memref<25x3x16xbf16, #tpu.memory_space<vmem>>, vector<1x3x16xbf16>
    %343 = vector.shape_cast %342 : vector<1x3x16xbf16> to vector<3x16xbf16>
    %cst_230 = arith.constant dense<0.000000e+00> : vector<3x320xf32>
    %344 = tpu.matmul %343, %213, %cst_230 {dimension_numbers = #tpu.dot_dimension_numbers<[1], [0], [0], [1], [0, 0, 1, 1], [], []>} : vector<3x16xbf16>, vector<16x320xbf16>, vector<3x320xf32> -> vector<3x320xf32>
    %c0_231 = arith.constant 0 : index
    %c0_232 = arith.constant 0 : index
    %c44 = arith.constant 44 : index
    %345 = vector.load %arg6[%c0_231, %c0_232, %c44] : memref<1x3x404xf32, #tpu.memory_space<vmem>>, vector<1x3x320xf32>
    %346 = vector.shape_cast %345 : vector<1x3x320xf32> to vector<3x320xf32>
    %347 = arith.addf %346, %344 : vector<3x320xf32>
    %c0_233 = arith.constant 0 : index
    %c0_234 = arith.constant 0 : index
    %c44_235 = arith.constant 44 : index
    %348 = vector.load %arg6[%c0_233, %c0_234, %c44_235] : memref<1x3x404xf32, #tpu.memory_space<vmem>>, vector<1x3x320xf32>
    %349 = vector.shape_cast %348 : vector<1x3x320xf32> to vector<3x320xf32>
    %350 = vector.shape_cast %347 : vector<3x320xf32> to vector<1x3x320xf32>
    tpu.vector_store %arg6[%c0_233, %c0_234, %c44_235], %350 {strides = array<i32>} : memref<1x3x404xf32, #tpu.memory_space<vmem>>, vector<1x3x320xf32>,
    %c15_236 = arith.constant 15 : index
    %c0_237 = arith.constant 0 : index
    %c0_238 = arith.constant 0 : index
    %351 = vector.load %arg5[%c15_236, %c0_237, %c0_238] : memref<25x3x16xbf16, #tpu.memory_space<vmem>>, vector<1x3x16xbf16>
    %352 = vector.shape_cast %351 : vector<1x3x16xbf16> to vector<3x16xbf16>
    %cst_239 = arith.constant dense<0.000000e+00> : vector<3x320xf32>
    %353 = tpu.matmul %352, %213, %cst_239 {dimension_numbers = #tpu.dot_dimension_numbers<[1], [0], [0], [1], [0, 0, 1, 1], [], []>} : vector<3x16xbf16>, vector<16x320xbf16>, vector<3x320xf32> -> vector<3x320xf32>
    %c0_240 = arith.constant 0 : index
    %c0_241 = arith.constant 0 : index
    %c60 = arith.constant 60 : index
    %354 = vector.load %arg6[%c0_240, %c0_241, %c60] : memref<1x3x404xf32, #tpu.memory_space<vmem>>, vector<1x3x320xf32>
    %355 = vector.shape_cast %354 : vector<1x3x320xf32> to vector<3x320xf32>
    %356 = arith.addf %355, %353 : vector<3x320xf32>
    %c0_242 = arith.constant 0 : index
    %c0_243 = arith.constant 0 : index
    %c60_244 = arith.constant 60 : index
    %357 = vector.load %arg6[%c0_242, %c0_243, %c60_244] : memref<1x3x404xf32, #tpu.memory_space<vmem>>, vector<1x3x320xf32>
    %358 = vector.shape_cast %357 : vector<1x3x320xf32> to vector<3x320xf32>
    %359 = vector.shape_cast %356 : vector<3x320xf32> to vector<1x3x320xf32>
    tpu.vector_store %arg6[%c0_242, %c0_243, %c60_244], %359 {strides = array<i32>} : memref<1x3x404xf32, #tpu.memory_space<vmem>>, vector<1x3x320xf32>,
    %c16_245 = arith.constant 16 : index
    %c0_246 = arith.constant 0 : index
    %c0_247 = arith.constant 0 : index
    %360 = vector.load %arg5[%c16_245, %c0_246, %c0_247] : memref<25x3x16xbf16, #tpu.memory_space<vmem>>, vector<1x3x16xbf16>
    %361 = vector.shape_cast %360 : vector<1x3x16xbf16> to vector<3x16xbf16>
    %cst_248 = arith.constant dense<0.000000e+00> : vector<3x320xf32>
    %362 = tpu.matmul %361, %213, %cst_248 {dimension_numbers = #tpu.dot_dimension_numbers<[1], [0], [0], [1], [0, 0, 1, 1], [], []>} : vector<3x16xbf16>, vector<16x320xbf16>, vector<3x320xf32> -> vector<3x320xf32>
    %c0_249 = arith.constant 0 : index
    %c0_250 = arith.constant 0 : index
    %c61 = arith.constant 61 : index
    %363 = vector.load %arg6[%c0_249, %c0_250, %c61] : memref<1x3x404xf32, #tpu.memory_space<vmem>>, vector<1x3x320xf32>
    %364 = vector.shape_cast %363 : vector<1x3x320xf32> to vector<3x320xf32>
    %365 = arith.addf %364, %362 : vector<3x320xf32>
    %c0_251 = arith.constant 0 : index
    %c0_252 = arith.constant 0 : index
    %c61_253 = arith.constant 61 : index
    %366 = vector.load %arg6[%c0_251, %c0_252, %c61_253] : memref<1x3x404xf32, #tpu.memory_space<vmem>>, vector<1x3x320xf32>
    %367 = vector.shape_cast %366 : vector<1x3x320xf32> to vector<3x320xf32>
    %368 = vector.shape_cast %365 : vector<3x320xf32> to vector<1x3x320xf32>
    tpu.vector_store %arg6[%c0_251, %c0_252, %c61_253], %368 {strides = array<i32>} : memref<1x3x404xf32, #tpu.memory_space<vmem>>, vector<1x3x320xf32>,
    %c17_254 = arith.constant 17 : index
    %c0_255 = arith.constant 0 : index
    %c0_256 = arith.constant 0 : index
    %369 = vector.load %arg5[%c17_254, %c0_255, %c0_256] : memref<25x3x16xbf16, #tpu.memory_space<vmem>>, vector<1x3x16xbf16>
    %370 = vector.shape_cast %369 : vector<1x3x16xbf16> to vector<3x16xbf16>
    %cst_257 = arith.constant dense<0.000000e+00> : vector<3x320xf32>
    %371 = tpu.matmul %370, %213, %cst_257 {dimension_numbers = #tpu.dot_dimension_numbers<[1], [0], [0], [1], [0, 0, 1, 1], [], []>} : vector<3x16xbf16>, vector<16x320xbf16>, vector<3x320xf32> -> vector<3x320xf32>
    %c0_258 = arith.constant 0 : index
    %c0_259 = arith.constant 0 : index
    %c62 = arith.constant 62 : index
    %372 = vector.load %arg6[%c0_258, %c0_259, %c62] : memref<1x3x404xf32, #tpu.memory_space<vmem>>, vector<1x3x320xf32>
    %373 = vector.shape_cast %372 : vector<1x3x320xf32> to vector<3x320xf32>
    %374 = arith.addf %373, %371 : vector<3x320xf32>
    %c0_260 = arith.constant 0 : index
    %c0_261 = arith.constant 0 : index
    %c62_262 = arith.constant 62 : index
    %375 = vector.load %arg6[%c0_260, %c0_261, %c62_262] : memref<1x3x404xf32, #tpu.memory_space<vmem>>, vector<1x3x320xf32>
    %376 = vector.shape_cast %375 : vector<1x3x320xf32> to vector<3x320xf32>
    %377 = vector.shape_cast %374 : vector<3x320xf32> to vector<1x3x320xf32>
    tpu.vector_store %arg6[%c0_260, %c0_261, %c62_262], %377 {strides = array<i32>} : memref<1x3x404xf32, #tpu.memory_space<vmem>>, vector<1x3x320xf32>,
    %c18_263 = arith.constant 18 : index
    %c0_264 = arith.constant 0 : index
    %c0_265 = arith.constant 0 : index
    %378 = vector.load %arg5[%c18_263, %c0_264, %c0_265] : memref<25x3x16xbf16, #tpu.memory_space<vmem>>, vector<1x3x16xbf16>
    %379 = vector.shape_cast %378 : vector<1x3x16xbf16> to vector<3x16xbf16>
    %cst_266 = arith.constant dense<0.000000e+00> : vector<3x320xf32>
    %380 = tpu.matmul %379, %213, %cst_266 {dimension_numbers = #tpu.dot_dimension_numbers<[1], [0], [0], [1], [0, 0, 1, 1], [], []>} : vector<3x16xbf16>, vector<16x320xbf16>, vector<3x320xf32> -> vector<3x320xf32>
    %c0_267 = arith.constant 0 : index
    %c0_268 = arith.constant 0 : index
    %c63 = arith.constant 63 : index
    %381 = vector.load %arg6[%c0_267, %c0_268, %c63] : memref<1x3x404xf32, #tpu.memory_space<vmem>>, vector<1x3x320xf32>
    %382 = vector.shape_cast %381 : vector<1x3x320xf32> to vector<3x320xf32>
    %383 = arith.addf %382, %380 : vector<3x320xf32>
    %c0_269 = arith.constant 0 : index
    %c0_270 = arith.constant 0 : index
    %c63_271 = arith.constant 63 : index
    %384 = vector.load %arg6[%c0_269, %c0_270, %c63_271] : memref<1x3x404xf32, #tpu.memory_space<vmem>>, vector<1x3x320xf32>
    %385 = vector.shape_cast %384 : vector<1x3x320xf32> to vector<3x320xf32>
    %386 = vector.shape_cast %383 : vector<3x320xf32> to vector<1x3x320xf32>
    tpu.vector_store %arg6[%c0_269, %c0_270, %c63_271], %386 {strides = array<i32>} : memref<1x3x404xf32, #tpu.memory_space<vmem>>, vector<1x3x320xf32>,
    %c19_272 = arith.constant 19 : index
    %c0_273 = arith.constant 0 : index
    %c0_274 = arith.constant 0 : index
    %387 = vector.load %arg5[%c19_272, %c0_273, %c0_274] : memref<25x3x16xbf16, #tpu.memory_space<vmem>>, vector<1x3x16xbf16>
    %388 = vector.shape_cast %387 : vector<1x3x16xbf16> to vector<3x16xbf16>
    %cst_275 = arith.constant dense<0.000000e+00> : vector<3x320xf32>
    %389 = tpu.matmul %388, %213, %cst_275 {dimension_numbers = #tpu.dot_dimension_numbers<[1], [0], [0], [1], [0, 0, 1, 1], [], []>} : vector<3x16xbf16>, vector<16x320xbf16>, vector<3x320xf32> -> vector<3x320xf32>
    %c0_276 = arith.constant 0 : index
    %c0_277 = arith.constant 0 : index
    %c64 = arith.constant 64 : index
    %390 = vector.load %arg6[%c0_276, %c0_277, %c64] : memref<1x3x404xf32, #tpu.memory_space<vmem>>, vector<1x3x320xf32>
    %391 = vector.shape_cast %390 : vector<1x3x320xf32> to vector<3x320xf32>
    %392 = arith.addf %391, %389 : vector<3x320xf32>
    %c0_278 = arith.constant 0 : index
    %c0_279 = arith.constant 0 : index
    %c64_280 = arith.constant 64 : index
    %393 = vector.load %arg6[%c0_278, %c0_279, %c64_280] : memref<1x3x404xf32, #tpu.memory_space<vmem>>, vector<1x3x320xf32>
    %394 = vector.shape_cast %393 : vector<1x3x320xf32> to vector<3x320xf32>
    %395 = vector.shape_cast %392 : vector<3x320xf32> to vector<1x3x320xf32>
    tpu.vector_store %arg6[%c0_278, %c0_279, %c64_280], %395 {strides = array<i32>} : memref<1x3x404xf32, #tpu.memory_space<vmem>>, vector<1x3x320xf32>,
    %c20_281 = arith.constant 20 : index
    %c0_282 = arith.constant 0 : index
    %c0_283 = arith.constant 0 : index
    %396 = vector.load %arg5[%c20_281, %c0_282, %c0_283] : memref<25x3x16xbf16, #tpu.memory_space<vmem>>, vector<1x3x16xbf16>
    %397 = vector.shape_cast %396 : vector<1x3x16xbf16> to vector<3x16xbf16>
    %cst_284 = arith.constant dense<0.000000e+00> : vector<3x320xf32>
    %398 = tpu.matmul %397, %213, %cst_284 {dimension_numbers = #tpu.dot_dimension_numbers<[1], [0], [0], [1], [0, 0, 1, 1], [], []>} : vector<3x16xbf16>, vector<16x320xbf16>, vector<3x320xf32> -> vector<3x320xf32>
    %c0_285 = arith.constant 0 : index
    %c0_286 = arith.constant 0 : index
    %c80 = arith.constant 80 : index
    %399 = vector.load %arg6[%c0_285, %c0_286, %c80] : memref<1x3x404xf32, #tpu.memory_space<vmem>>, vector<1x3x320xf32>
    %400 = vector.shape_cast %399 : vector<1x3x320xf32> to vector<3x320xf32>
    %401 = arith.addf %400, %398 : vector<3x320xf32>
    %c0_287 = arith.constant 0 : index
    %c0_288 = arith.constant 0 : index
    %c80_289 = arith.constant 80 : index
    %402 = vector.load %arg6[%c0_287, %c0_288, %c80_289] : memref<1x3x404xf32, #tpu.memory_space<vmem>>, vector<1x3x320xf32>
    %403 = vector.shape_cast %402 : vector<1x3x320xf32> to vector<3x320xf32>
    %404 = vector.shape_cast %401 : vector<3x320xf32> to vector<1x3x320xf32>
    tpu.vector_store %arg6[%c0_287, %c0_288, %c80_289], %404 {strides = array<i32>} : memref<1x3x404xf32, #tpu.memory_space<vmem>>, vector<1x3x320xf32>,
    %c21_290 = arith.constant 21 : index
    %c0_291 = arith.constant 0 : index
    %c0_292 = arith.constant 0 : index
    %405 = vector.load %arg5[%c21_290, %c0_291, %c0_292] : memref<25x3x16xbf16, #tpu.memory_space<vmem>>, vector<1x3x16xbf16>
    %406 = vector.shape_cast %405 : vector<1x3x16xbf16> to vector<3x16xbf16>
    %cst_293 = arith.constant dense<0.000000e+00> : vector<3x320xf32>
    %407 = tpu.matmul %406, %213, %cst_293 {dimension_numbers = #tpu.dot_dimension_numbers<[1], [0], [0], [1], [0, 0, 1, 1], [], []>} : vector<3x16xbf16>, vector<16x320xbf16>, vector<3x320xf32> -> vector<3x320xf32>
    %c0_294 = arith.constant 0 : index
    %c0_295 = arith.constant 0 : index
    %c81 = arith.constant 81 : index
    %408 = vector.load %arg6[%c0_294, %c0_295, %c81] : memref<1x3x404xf32, #tpu.memory_space<vmem>>, vector<1x3x320xf32>
    %409 = vector.shape_cast %408 : vector<1x3x320xf32> to vector<3x320xf32>
    %410 = arith.addf %409, %407 : vector<3x320xf32>
    %c0_296 = arith.constant 0 : index
    %c0_297 = arith.constant 0 : index
    %c81_298 = arith.constant 81 : index
    %411 = vector.load %arg6[%c0_296, %c0_297, %c81_298] : memref<1x3x404xf32, #tpu.memory_space<vmem>>, vector<1x3x320xf32>
    %412 = vector.shape_cast %411 : vector<1x3x320xf32> to vector<3x320xf32>
    %413 = vector.shape_cast %410 : vector<3x320xf32> to vector<1x3x320xf32>
    tpu.vector_store %arg6[%c0_296, %c0_297, %c81_298], %413 {strides = array<i32>} : memref<1x3x404xf32, #tpu.memory_space<vmem>>, vector<1x3x320xf32>,
    %c22_299 = arith.constant 22 : index
    %c0_300 = arith.constant 0 : index
    %c0_301 = arith.constant 0 : index
    %414 = vector.load %arg5[%c22_299, %c0_300, %c0_301] : memref<25x3x16xbf16, #tpu.memory_space<vmem>>, vector<1x3x16xbf16>
    %415 = vector.shape_cast %414 : vector<1x3x16xbf16> to vector<3x16xbf16>
    %cst_302 = arith.constant dense<0.000000e+00> : vector<3x320xf32>
    %416 = tpu.matmul %415, %213, %cst_302 {dimension_numbers = #tpu.dot_dimension_numbers<[1], [0], [0], [1], [0, 0, 1, 1], [], []>} : vector<3x16xbf16>, vector<16x320xbf16>, vector<3x320xf32> -> vector<3x320xf32>
    %c0_303 = arith.constant 0 : index
    %c0_304 = arith.constant 0 : index
    %c82 = arith.constant 82 : index
    %417 = vector.load %arg6[%c0_303, %c0_304, %c82] : memref<1x3x404xf32, #tpu.memory_space<vmem>>, vector<1x3x320xf32>
    %418 = vector.shape_cast %417 : vector<1x3x320xf32> to vector<3x320xf32>
    %419 = arith.addf %418, %416 : vector<3x320xf32>
    %c0_305 = arith.constant 0 : index
    %c0_306 = arith.constant 0 : index
    %c82_307 = arith.constant 82 : index
    %420 = vector.load %arg6[%c0_305, %c0_306, %c82_307] : memref<1x3x404xf32, #tpu.memory_space<vmem>>, vector<1x3x320xf32>
    %421 = vector.shape_cast %420 : vector<1x3x320xf32> to vector<3x320xf32>
    %422 = vector.shape_cast %419 : vector<3x320xf32> to vector<1x3x320xf32>
    tpu.vector_store %arg6[%c0_305, %c0_306, %c82_307], %422 {strides = array<i32>} : memref<1x3x404xf32, #tpu.memory_space<vmem>>, vector<1x3x320xf32>,
    %c23_308 = arith.constant 23 : index
    %c0_309 = arith.constant 0 : index
    %c0_310 = arith.constant 0 : index
    %423 = vector.load %arg5[%c23_308, %c0_309, %c0_310] : memref<25x3x16xbf16, #tpu.memory_space<vmem>>, vector<1x3x16xbf16>
    %424 = vector.shape_cast %423 : vector<1x3x16xbf16> to vector<3x16xbf16>
    %cst_311 = arith.constant dense<0.000000e+00> : vector<3x320xf32>
    %425 = tpu.matmul %424, %213, %cst_311 {dimension_numbers = #tpu.dot_dimension_numbers<[1], [0], [0], [1], [0, 0, 1, 1], [], []>} : vector<3x16xbf16>, vector<16x320xbf16>, vector<3x320xf32> -> vector<3x320xf32>
    %c0_312 = arith.constant 0 : index
    %c0_313 = arith.constant 0 : index
    %c83 = arith.constant 83 : index
    %426 = vector.load %arg6[%c0_312, %c0_313, %c83] : memref<1x3x404xf32, #tpu.memory_space<vmem>>, vector<1x3x320xf32>
    %427 = vector.shape_cast %426 : vector<1x3x320xf32> to vector<3x320xf32>
    %428 = arith.addf %427, %425 : vector<3x320xf32>
    %c0_314 = arith.constant 0 : index
    %c0_315 = arith.constant 0 : index
    %c83_316 = arith.constant 83 : index
    %429 = vector.load %arg6[%c0_314, %c0_315, %c83_316] : memref<1x3x404xf32, #tpu.memory_space<vmem>>, vector<1x3x320xf32>
    %430 = vector.shape_cast %429 : vector<1x3x320xf32> to vector<3x320xf32>
    %431 = vector.shape_cast %428 : vector<3x320xf32> to vector<1x3x320xf32>
    tpu.vector_store %arg6[%c0_314, %c0_315, %c83_316], %431 {strides = array<i32>} : memref<1x3x404xf32, #tpu.memory_space<vmem>>, vector<1x3x320xf32>,
    %c24_317 = arith.constant 24 : index
    %c0_318 = arith.constant 0 : index
    %c0_319 = arith.constant 0 : index
    %432 = vector.load %arg5[%c24_317, %c0_318, %c0_319] : memref<25x3x16xbf16, #tpu.memory_space<vmem>>, vector<1x3x16xbf16>
    %433 = vector.shape_cast %432 : vector<1x3x16xbf16> to vector<3x16xbf16>
    %cst_320 = arith.constant dense<0.000000e+00> : vector<3x320xf32>
    %434 = tpu.matmul %433, %213, %cst_320 {dimension_numbers = #tpu.dot_dimension_numbers<[1], [0], [0], [1], [0, 0, 1, 1], [], []>} : vector<3x16xbf16>, vector<16x320xbf16>, vector<3x320xf32> -> vector<3x320xf32>
    %c0_321 = arith.constant 0 : index
    %c0_322 = arith.constant 0 : index
    %c84 = arith.constant 84 : index
    %435 = vector.load %arg6[%c0_321, %c0_322, %c84] : memref<1x3x404xf32, #tpu.memory_space<vmem>>, vector<1x3x320xf32>
    %436 = vector.shape_cast %435 : vector<1x3x320xf32> to vector<3x320xf32>
    %437 = arith.addf %436, %434 : vector<3x320xf32>
    %c0_323 = arith.constant 0 : index
    %c0_324 = arith.constant 0 : index
    %c84_325 = arith.constant 84 : index
    %438 = vector.load %arg6[%c0_323, %c0_324, %c84_325] : memref<1x3x404xf32, #tpu.memory_space<vmem>>, vector<1x3x320xf32>
    %439 = vector.shape_cast %438 : vector<1x3x320xf32> to vector<3x320xf32>
    %440 = vector.shape_cast %437 : vector<3x320xf32> to vector<1x3x320xf32>
    tpu.vector_store %arg6[%c0_323, %c0_324, %c84_325], %440 {strides = array<i32>} : memref<1x3x404xf32, #tpu.memory_space<vmem>>, vector<1x3x320xf32>,
    return
  }
  func.func @transform_0(%arg0: i32) -> (i32, i32, i32) {
    %c0_i32 = arith.constant 0 : i32
    %c0_i32_0 = arith.constant 0 : i32
    %c0_i32_1 = arith.constant 0 : i32
    return %arg0, %c0_i32, %c0_i32_0 : i32, i32, i32
  }
  func.func @transform_1(%arg0: i32) -> (i32, i32) {
    %c0_i32 = arith.constant 0 : i32
    %c0_i32_0 = arith.constant 0 : i32
    %c0_i32_1 = arith.constant 0 : i32
    return %c0_i32, %c0_i32_0 : i32, i32
  }
  func.func @transform_2(%arg0: i32) -> (i32, i32, i32) {
    %c0_i32 = arith.constant 0 : i32
    %c0_i32_0 = arith.constant 0 : i32
    %c0_i32_1 = arith.constant 0 : i32
    %c0_i32_2 = arith.constant 0 : i32
    return %c0_i32, %c0_i32_0, %c0_i32_1 : i32, i32, i32
  }
  func.func @transform_3(%arg0: i32) -> (i32, i32) {
    %c0_i32 = arith.constant 0 : i32
    %c0_i32_0 = arith.constant 0 : i32
    %c0_i32_1 = arith.constant 0 : i32
    return %c0_i32, %c0_i32_0 : i32, i32
  }
  func.func @transform_4(%arg0: i32) -> (i32, i32, i32) {
    %c0_i32 = arith.constant 0 : i32
    %c0_i32_0 = arith.constant 0 : i32
    %c0_i32_1 = arith.constant 0 : i32
    %c0_i32_2 = arith.constant 0 : i32
    return %c0_i32, %c0_i32_0, %c0_i32_1 : i32, i32, i32
  }
  func.func @transform_5(%arg0: i32) -> (i32, i32, i32) {
    %c0_i32 = arith.constant 0 : i32
    %c0_i32_0 = arith.constant 0 : i32
    %c0_i32_1 = arith.constant 0 : i32
    return %arg0, %c0_i32, %c0_i32_0 : i32, i32, i32
  }
}

module attributes {stable_mosaic.version = 11 : i64} {
  func.func @_sumsq_kernel(%arg0: i32, %arg1: i32, %arg2: memref<1x8x128xf32, #tpu.memory_space<vmem>>, %arg3: memref<1x8x128xf32, #tpu.memory_space<vmem>>, %arg4: memref<1x8x128xf32, #tpu.memory_space<vmem>>, %arg5: memref<1x1x128xf32, #tpu.memory_space<vmem>>) attributes {dimension_semantics = [#tpu.dimension_semantics<parallel>, #tpu.dimension_semantics<arbitrary>], iteration_bounds = array<i64: 2, 1>, scalar_prefetch = 0 : i64, scratch_operands = 0 : i64, tpu.core_type = #tpu.core_type<tc>, window_params = [{transform_indices = @transform_0, window_bounds = array<i64: 1, 8, 128>}, {transform_indices = @transform_1, window_bounds = array<i64: 1, 8, 128>}, {transform_indices = @transform_2, window_bounds = array<i64: 1, 8, 128>}, {transform_indices = @transform_3, window_bounds = array<i64: 1, 1, 128>}]} {
    %c0_i32 = arith.constant 0 : i32
    %0 = arith.cmpi eq, %arg1, %c0_i32 : i32
    %1 = arith.extui %0 : i1 to i32
    %c0_i32_0 = arith.constant 0 : i32
    %2 = arith.cmpi ne, %1, %c0_i32_0 : i32
    scf.if %2 {
      %cst_15 = arith.constant 0.000000e+00 : f32
      %14 = vector.broadcast %cst_15 : f32 to vector<1x1x128xf32>
      %c0_16 = arith.constant 0 : index
      %c0_17 = arith.constant 0 : index
      %c0_18 = arith.constant 0 : index
      %15 = vector.load %arg5[%c0_16, %c0_17, %c0_18] : memref<1x1x128xf32, #tpu.memory_space<vmem>>, vector<1x1x128xf32>
      tpu.vector_store %arg5[%c0_16, %c0_17, %c0_18], %14 {strides = array<i32>} : memref<1x1x128xf32, #tpu.memory_space<vmem>>, vector<1x1x128xf32>,
    } else {
    }
    %c0 = arith.constant 0 : index
    %c0_1 = arith.constant 0 : index
    %c0_2 = arith.constant 0 : index
    %3 = vector.load %arg2[%c0, %c0_1, %c0_2] : memref<1x8x128xf32, #tpu.memory_space<vmem>>, vector<1x8x128xf32>
    %c0_3 = arith.constant 0 : index
    %c0_4 = arith.constant 0 : index
    %c0_5 = arith.constant 0 : index
    %4 = vector.load %arg3[%c0_3, %c0_4, %c0_5] : memref<1x8x128xf32, #tpu.memory_space<vmem>>, vector<1x8x128xf32>
    %5 = arith.subf %3, %4 : vector<1x8x128xf32>
    %c0_6 = arith.constant 0 : index
    %c0_7 = arith.constant 0 : index
    %c0_8 = arith.constant 0 : index
    %6 = vector.load %arg4[%c0_6, %c0_7, %c0_8] : memref<1x8x128xf32, #tpu.memory_space<vmem>>, vector<1x8x128xf32>
    %7 = arith.subf %5, %6 : vector<1x8x128xf32>
    %c0_9 = arith.constant 0 : index
    %c0_10 = arith.constant 0 : index
    %c0_11 = arith.constant 0 : index
    %8 = vector.load %arg5[%c0_9, %c0_10, %c0_11] : memref<1x1x128xf32, #tpu.memory_space<vmem>>, vector<1x1x128xf32>
    %9 = arith.mulf %7, %7 : vector<1x8x128xf32>
    %cst = arith.constant dense<0.000000e+00> : vector<1x128xf32>
    %10 = vector.multi_reduction <add>, %9, %cst [1] : vector<1x8x128xf32> to vector<1x128xf32>
    %11 = vector.shape_cast %10 : vector<1x128xf32> to vector<1x1x128xf32>
    %12 = arith.addf %8, %11 : vector<1x1x128xf32>
    %c0_12 = arith.constant 0 : index
    %c0_13 = arith.constant 0 : index
    %c0_14 = arith.constant 0 : index
    %13 = vector.load %arg5[%c0_12, %c0_13, %c0_14] : memref<1x1x128xf32, #tpu.memory_space<vmem>>, vector<1x1x128xf32>
    tpu.vector_store %arg5[%c0_12, %c0_13, %c0_14], %12 {strides = array<i32>} : memref<1x1x128xf32, #tpu.memory_space<vmem>>, vector<1x1x128xf32>,
    return
  }
  func.func @transform_0(%arg0: i32, %arg1: i32) -> (i32, i32, i32) {
    %c0_i32 = arith.constant 0 : i32
    %c0_i32_0 = arith.constant 0 : i32
    return %arg0, %arg1, %c0_i32 : i32, i32, i32
  }
  func.func @transform_1(%arg0: i32, %arg1: i32) -> (i32, i32, i32) {
    %c0_i32 = arith.constant 0 : i32
    %c0_i32_0 = arith.constant 0 : i32
    return %arg0, %arg1, %c0_i32 : i32, i32, i32
  }
  func.func @transform_2(%arg0: i32, %arg1: i32) -> (i32, i32, i32) {
    %c0_i32 = arith.constant 0 : i32
    %c0_i32_0 = arith.constant 0 : i32
    return %arg0, %arg1, %c0_i32 : i32, i32, i32
  }
  func.func @transform_3(%arg0: i32, %arg1: i32) -> (i32, i32, i32) {
    %c0_i32 = arith.constant 0 : i32
    %c0_i32_0 = arith.constant 0 : i32
    %c0_i32_1 = arith.constant 0 : i32
    return %arg0, %c0_i32, %c0_i32_0 : i32, i32, i32
  }
}

module attributes {stable_mosaic.version = 11 : i64} {
  func.func @_apply_kernel(%arg0: i32, %arg1: i32, %arg2: memref<2xf32, #tpu.memory_space<smem>>, %arg3: memref<1x8x128xf32, #tpu.memory_space<vmem>>, %arg4: memref<1x8x128xf32, #tpu.memory_space<vmem>>, %arg5: memref<1x8x128xf32, #tpu.memory_space<vmem>>, %arg6: memref<1x8x128xf32, #tpu.memory_space<vmem>>) attributes {dimension_semantics = [#tpu.dimension_semantics<parallel>, #tpu.dimension_semantics<parallel>], iteration_bounds = array<i64: 2, 1>, scalar_prefetch = 0 : i64, scratch_operands = 0 : i64, tpu.core_type = #tpu.core_type<tc>, window_params = [{transform_indices = @transform_0, window_bounds = array<i64: 2>}, {transform_indices = @transform_1, window_bounds = array<i64: 1, 8, 128>}, {transform_indices = @transform_2, window_bounds = array<i64: 1, 8, 128>}, {transform_indices = @transform_3, window_bounds = array<i64: 1, 8, 128>}, {transform_indices = @transform_4, window_bounds = array<i64: 1, 8, 128>}]} {
    %0 = arith.index_cast %arg0 : i32 to index
    %1 = memref.load %arg2[%0] : memref<2xf32, #tpu.memory_space<smem>>
    %c0 = arith.constant 0 : index
    %c0_0 = arith.constant 0 : index
    %c0_1 = arith.constant 0 : index
    %2 = vector.load %arg5[%c0, %c0_0, %c0_1] : memref<1x8x128xf32, #tpu.memory_space<vmem>>, vector<1x8x128xf32>
    %c0_2 = arith.constant 0 : index
    %c0_3 = arith.constant 0 : index
    %c0_4 = arith.constant 0 : index
    %3 = vector.load %arg3[%c0_2, %c0_3, %c0_4] : memref<1x8x128xf32, #tpu.memory_space<vmem>>, vector<1x8x128xf32>
    %c0_5 = arith.constant 0 : index
    %c0_6 = arith.constant 0 : index
    %c0_7 = arith.constant 0 : index
    %4 = vector.load %arg4[%c0_5, %c0_6, %c0_7] : memref<1x8x128xf32, #tpu.memory_space<vmem>>, vector<1x8x128xf32>
    %5 = arith.subf %3, %4 : vector<1x8x128xf32>
    %6 = arith.subf %5, %2 : vector<1x8x128xf32>
    %7 = vector.broadcast %1 : f32 to vector<1x8x128xf32>
    %8 = arith.mulf %6, %7 : vector<1x8x128xf32>
    %9 = arith.addf %2, %8 : vector<1x8x128xf32>
    %c0_8 = arith.constant 0 : index
    %c0_9 = arith.constant 0 : index
    %c0_10 = arith.constant 0 : index
    %10 = vector.load %arg6[%c0_8, %c0_9, %c0_10] : memref<1x8x128xf32, #tpu.memory_space<vmem>>, vector<1x8x128xf32>
    tpu.vector_store %arg6[%c0_8, %c0_9, %c0_10], %9 {strides = array<i32>} : memref<1x8x128xf32, #tpu.memory_space<vmem>>, vector<1x8x128xf32>,
    return
  }
  func.func @transform_0(%arg0: i32, %arg1: i32) -> i32 {
    %c0_i32 = arith.constant 0 : i32
    %c0_i32_0 = arith.constant 0 : i32
    return %c0_i32 : i32
  }
  func.func @transform_1(%arg0: i32, %arg1: i32) -> (i32, i32, i32) {
    %c0_i32 = arith.constant 0 : i32
    %c0_i32_0 = arith.constant 0 : i32
    return %arg0, %arg1, %c0_i32 : i32, i32, i32
  }
  func.func @transform_2(%arg0: i32, %arg1: i32) -> (i32, i32, i32) {
    %c0_i32 = arith.constant 0 : i32
    %c0_i32_0 = arith.constant 0 : i32
    return %arg0, %arg1, %c0_i32 : i32, i32, i32
  }
  func.func @transform_3(%arg0: i32, %arg1: i32) -> (i32, i32, i32) {
    %c0_i32 = arith.constant 0 : i32
    %c0_i32_0 = arith.constant 0 : i32
    return %arg0, %arg1, %c0_i32 : i32, i32, i32
  }
  func.func @transform_4(%arg0: i32, %arg1: i32) -> (i32, i32, i32) {
    %c0_i32 = arith.constant 0 : i32
    %c0_i32_0 = arith.constant 0 : i32
    return %arg0, %arg1, %c0_i32 : i32, i32, i32
  }
}

module attributes {stable_mosaic.version = 11 : i64} {
  func.func @_apply_kernel(%arg0: i32, %arg1: i32, %arg2: memref<2xf32, #tpu.memory_space<smem>>, %arg3: memref<1x8x128xf32, #tpu.memory_space<vmem>>, %arg4: memref<1x8x128xf32, #tpu.memory_space<vmem>>, %arg5: memref<1x8x128xf32, #tpu.memory_space<vmem>>, %arg6: memref<1x8x128xf32, #tpu.memory_space<vmem>>) attributes {dimension_semantics = [#tpu.dimension_semantics<parallel>, #tpu.dimension_semantics<parallel>], iteration_bounds = array<i64: 2, 1>, scalar_prefetch = 0 : i64, scratch_operands = 0 : i64, tpu.core_type = #tpu.core_type<tc>, window_params = [{transform_indices = @transform_0, window_bounds = array<i64: 2>}, {transform_indices = @transform_1, window_bounds = array<i64: 1, 8, 128>}, {transform_indices = @transform_2, window_bounds = array<i64: 1, 8, 128>}, {transform_indices = @transform_3, window_bounds = array<i64: 1, 8, 128>}, {transform_indices = @transform_4, window_bounds = array<i64: 1, 8, 128>}]} {
    %0 = arith.index_cast %arg0 : i32 to index
    %1 = memref.load %arg2[%0] : memref<2xf32, #tpu.memory_space<smem>>
    %c0 = arith.constant 0 : index
    %c0_0 = arith.constant 0 : index
    %c0_1 = arith.constant 0 : index
    %2 = vector.load %arg5[%c0, %c0_0, %c0_1] : memref<1x8x128xf32, #tpu.memory_space<vmem>>, vector<1x8x128xf32>
    %c0_2 = arith.constant 0 : index
    %c0_3 = arith.constant 0 : index
    %c0_4 = arith.constant 0 : index
    %3 = vector.load %arg3[%c0_2, %c0_3, %c0_4] : memref<1x8x128xf32, #tpu.memory_space<vmem>>, vector<1x8x128xf32>
    %c0_5 = arith.constant 0 : index
    %c0_6 = arith.constant 0 : index
    %c0_7 = arith.constant 0 : index
    %4 = vector.load %arg4[%c0_5, %c0_6, %c0_7] : memref<1x8x128xf32, #tpu.memory_space<vmem>>, vector<1x8x128xf32>
    %5 = arith.subf %3, %4 : vector<1x8x128xf32>
    %6 = arith.subf %5, %2 : vector<1x8x128xf32>
    %7 = vector.broadcast %1 : f32 to vector<1x8x128xf32>
    %8 = arith.mulf %6, %7 : vector<1x8x128xf32>
    %9 = arith.addf %2, %8 : vector<1x8x128xf32>
    %cst = arith.constant 0.000000e+00 : f32
    %cst_8 = arith.constant 2.550000e+02 : f32
    %10 = vector.broadcast %cst : f32 to vector<1x8x128xf32>
    %11 = arith.maximumf %10, %9 : vector<1x8x128xf32>
    %12 = vector.broadcast %cst_8 : f32 to vector<1x8x128xf32>
    %13 = arith.minimumf %12, %11 : vector<1x8x128xf32>
    %c0_9 = arith.constant 0 : index
    %c0_10 = arith.constant 0 : index
    %c0_11 = arith.constant 0 : index
    %14 = vector.load %arg6[%c0_9, %c0_10, %c0_11] : memref<1x8x128xf32, #tpu.memory_space<vmem>>, vector<1x8x128xf32>
    tpu.vector_store %arg6[%c0_9, %c0_10, %c0_11], %13 {strides = array<i32>} : memref<1x8x128xf32, #tpu.memory_space<vmem>>, vector<1x8x128xf32>,
    return
  }
  func.func @transform_0(%arg0: i32, %arg1: i32) -> i32 {
    %c0_i32 = arith.constant 0 : i32
    %c0_i32_0 = arith.constant 0 : i32
    return %c0_i32 : i32
  }
  func.func @transform_1(%arg0: i32, %arg1: i32) -> (i32, i32, i32) {
    %c0_i32 = arith.constant 0 : i32
    %c0_i32_0 = arith.constant 0 : i32
    return %arg0, %arg1, %c0_i32 : i32, i32, i32
  }
  func.func @transform_2(%arg0: i32, %arg1: i32) -> (i32, i32, i32) {
    %c0_i32 = arith.constant 0 : i32
    %c0_i32_0 = arith.constant 0 : i32
    return %arg0, %arg1, %c0_i32 : i32, i32, i32
  }
  func.func @transform_3(%arg0: i32, %arg1: i32) -> (i32, i32, i32) {
    %c0_i32 = arith.constant 0 : i32
    %c0_i32_0 = arith.constant 0 : i32
    return %arg0, %arg1, %c0_i32 : i32, i32, i32
  }
  func.func @transform_4(%arg0: i32, %arg1: i32) -> (i32, i32, i32) {
    %c0_i32 = arith.constant 0 : i32
    %c0_i32_0 = arith.constant 0 : i32
    return %arg0, %arg1, %c0_i32 : i32, i32, i32
  }
}

</mosaic_0001>

<bundles_post_ra>
// kernel: tile.18
= control target key start
LH: loop header
LB: loop body
LE: loop exit
PB: predicated region body
PF: predicated region fallthrough
CT: control target
= control target key end

     0   :  { %s28_s0 = inlined_call_operand.vmem [shape: f32[20], index: 0, kind: input, shape index: {}]   ;;  %s29_s1 = inlined_call_operand.vmem [shape: f32[16,20], index: 1, kind: output, shape index: {}]  }
   0x1   :  { %v4_v0 = vld [vmem:[%s28_s0] ss:$0 sm:$0xff] }
   0x2   :  { %5 = vst [vmem:[%s29_s1] sm:$0xff] %v4_v0 }
   0x3   :  { %8 = vst [vmem:[%s29_s1 + $0x8] sm:$0xff] %v4_v0 }

// kernel: tile.19
= control target key start
LH: loop header
LB: loop body
LE: loop exit
PB: predicated region body
PF: predicated region fallthrough
CT: control target
= control target key end

     0   :  { %vm9_vm0 = vcmask 64512   ;;  %s170_s10 = smov 100   ;;  %s171_s13 = smov 120   ;;  %vm22_vm1 = vcmask 130048   ;;  %vm3_vm2 = vcmask 162816   ;;  %vm13_vm3 = vcmask 97280   ;;  %s258_s0 = inlined_call_operand.vmem [shape: f32[16,20], index: 0, kind: input, shape index: {}]   ;;  %s259_s1 = inlined_call_operand.vmem [shape: f32[1,320], index: 1, kind: output, shape index: {}]  }
   0x1   :  { %v140_v0 = vld [vmem:[%s258_s0 + $0x5] sm:$0x1]   ;;  %v136_v1 = vld [vmem:[%s258_s0 + $0x6] sm:$0x1]   ;;  %v142_v4 = vld [vmem:[%s258_s0 + $0x4] sm:$0x1]  }
   0x2   :  { %34 = vrot.lane.b32.xlu1 %v140_v0, %s170_s10  ;;  %v137_v2 = vld [vmem:[%s258_s0 + $0x6] sm:$0x1]   ;;  %v138_v5 = vld [vmem:[%s258_s0 + $0xc] sm:$0x1]   ;;  %s172_s20 = smov 80   ;;  %s173_s23 = smov 92  }
   0x3   :  { %v10_v3 = vsel %vm9_vm0, %v137_v2, %v136_v1  ;;  %v139_v6 = vld [vmem:[%s258_s0 + $0xc] sm:$0x1]   ;;  %47 = vrot.lane.b32.xlu2 %v142_v4, %s172_s20  ;;  %v141_v7 = vld [vmem:[%s258_s0 + $0xb] sm:$0x1]   ;;  %v143_v9 = vld [vmem:[%s258_s0 + $0xa] sm:$0x1]  }
   0x4   :  { %11 = vrot.lane.b32.xlu0 %v10_v3, %s171_s13  ;;  %v23_v8 = vsel %vm22_vm1, %v139_v6, %v138_v5  ;;  %s174_s26 = smov 112   ;;  %s175_s27 = smov 72   ;;  %v145_v10 = vld [vmem:[%s258_s0 + $0x9] sm:$0x1]   ;;  %v144_v11 = vld [vmem:[%s258_s0 + $0x3] sm:$0x1]  }
   0x5   :  { %s176_s3 = smov 52   ;;  %v146_v12 = vld [vmem:[%s258_s0 + $0xf] sm:$0x1]   ;;  %s177_s6 = smov 60   ;;  %v148_v13 = vld [vmem:[%s258_s0 + $0x8] sm:$0x1]  }
   0x6   :  { %s178_s7 = smov 44   ;;  %v147_v14 = vld [vmem:[%s258_s0 + $0x2] sm:$0x1]   ;;  %s179_s12 = smov 32   ;;  %v149_v15 = vld [vmem:[%s258_s0 + $0xe] sm:$0x1]  }
   0x7   :  { %s180_s15 = smov 40   ;;  %s181_s16 = smov 24   ;;  %v151_v16 = vld [vmem:[%s258_s0 + $0x7] sm:$0x1]   ;;  %v150_v17 = vld [vmem:[%s258_s0 + $0x1] sm:$0x1]  }
   0x8   :  { %s182_s21 = smov 12   ;;  %v152_v18 = vld [vmem:[%s258_s0 + $0xd] sm:$0x1]   ;;  %s183_s24 = smov 20   ;;  %v2_v19 = vld [vmem:[%s258_s0] sm:$0x1]  }
   0x9   :  { %s184_s25 = smov 4   ;;  %4 = vst.msk [vmem:[#allocation0] sm:$0x1] %vm3_vm2, %v2_v19   ;;  %vm16_vm4 = vcmask 1048512   ;;  %vm36_vm5 = vcmask 982816   ;;  %vm49_vm6 = vcmask 818816  }
   0xa   :  { %40 = vrot.lane.b32.xlu1 %v141_v7, %s173_s23  ;;  %vm26_vm7 = vcmask 31744   ;;  %vm29_vm8 = vcmask 1048448   ;;  %vm42_vm9 = vcmask 917216   ;;  %vm75_vm10 = vcmask 523616  }
   0xb   :  { %53 = vrot.lane.b32.xlu2 %v143_v9, %s175_s27  ;;  %vm55_vm11 = vcmask 753216   ;;  %vm95_vm12 = vcmask 359616   ;;  %vm68_vm13 = vcmask 589216   ;;  %vm115_vm14 = vcmask 195616  }
   0xc   :  { %24 = vrot.lane.b32.xlu0 %v23_v8, %s174_s26  ;;  %vm62_vm15 = vcmask 654816   ;;  %vm88_vm0 = vcmask 425216   ;;  %vm82_vm1 = vcmask 490816   ;;  %vm108_vm2 = vcmask 261216  }
  0x12   :  { %66 = vrot.lane.b32.xlu1 %v145_v10, %s176_s3 }
  0x13   :  { %73 = vrot.lane.b32.xlu2 %v146_v12, %s178_s7 }
  0x14   :  { %60 = vrot.lane.b32.xlu0 %v144_v11, %s177_s6 }
  0x1a   :  { %86 = vrot.lane.b32.xlu1 %v148_v13, %s179_s12 }
  0x1b   :  { %93 = vrot.lane.b32.xlu2 %v149_v15, %s181_s16 }
  0x1c   :  { %80 = vrot.lane.b32.xlu0 %v147_v14, %s180_s15 }
  0x22   :  { %106 = vrot.lane.b32.xlu1 %v151_v16, %s182_s21 }
  0x23   :  { %113 = vrot.lane.b32.xlu2 %v152_v18, %s184_s25 }
  0x24   :  { %100 = vrot.lane.b32.xlu0 %v150_v17, %s183_s24 }
  0x5d   :  { %v48_v20 = vpop.permute.xlu2 %47  }
  0x65   :  { %v54_v21 = vpop.permute.xlu2 %53  }
  0x6d   :  { %v74_v22 = vpop.permute.xlu2 %73  }
  0x74   :  { %v35_v23 = vpop.permute.xlu1 %34  }
  0x75   :  { %v94_v25 = vpop.permute.xlu2 %93  }
  0x76   :  { %v12_v24 = vpop.permute.xlu0 %11  }
  0x77   :  { %15 = vst.msk [vmem:[#allocation0 + $0x8] sm:$0x1] %vm13_vm3, %v12_v24   ;;  %vm102_vm3 = vcmask 326816  }
  0x78   :  { %17 = vst.msk [vmem:[#allocation0] sm:$0x1] %vm16_vm4, %v12_v24  }
  0x79   :  { %37 = vst.msk [vmem:[#allocation0] sm:$0x1] %vm36_vm5, %v35_v23  }
  0x7a   :  { %50 = vst.msk [vmem:[#allocation0] sm:$0x1] %vm49_vm6, %v48_v20  }
  0x7c   :  { %v41_v26 = vpop.permute.xlu1 %40  }
  0x7d   :  { %v114_v28 = vpop.permute.xlu2 %113  }
  0x7e   :  { %v25_v27 = vpop.permute.xlu0 %24  }
  0x7f   :  { %28 = vst.msk [vmem:[#allocation0 + $0x10] sm:$0x1] %vm26_vm7, %v25_v27  }
  0x80   :  { %31 = vst.msk [vmem:[#allocation0 + $0x8] sm:$0x1] %vm29_vm8, %v25_v27  }
  0x81   :  { %44 = vst.msk [vmem:[#allocation0 + $0x8] sm:$0x1] %vm42_vm9, %v41_v26  }
  0x82   :  { %77 = vst.msk [vmem:[#allocation0 + $0x10] sm:$0x1] %vm75_vm10, %v74_v22  }
  0x83   :  { %57 = vst.msk [vmem:[#allocation0 + $0x8] sm:$0x1] %vm55_vm11, %v54_v21  }
  0x84   :  { %v67_v29 = vpop.permute.xlu1 %66   ;;  %97 = vst.msk [vmem:[#allocation0 + $0x10] sm:$0x1] %vm95_vm12, %v94_v25  }
  0x85   :  { %70 = vst.msk [vmem:[#allocation0 + $0x8] sm:$0x1] %vm68_vm13, %v67_v29  }
  0x86   :  { %v61_v30 = vpop.permute.xlu0 %60   ;;  %117 = vst.msk [vmem:[#allocation0 + $0x10] sm:$0x1] %vm115_vm14, %v114_v28  }
  0x87   :  { %63 = vst.msk [vmem:[#allocation0] sm:$0x1] %vm62_vm15, %v61_v30  }
  0x8c   :  { %v87_v31 = vpop.permute.xlu1 %86  }
  0x8d   :  { %90 = vst.msk [vmem:[#allocation0 + $0x8] sm:$0x1] %vm88_vm0, %v87_v31   ;;  %v131_v32 = vld [vmem:[#allocation0 + $0x10] sm:$0x1] }
  0x8e   :  { %v81_v33 = vpop.permute.xlu0 %80   ;;  %154 = vst [vmem:[%s259_s1 + $0x2] sm:$0x1] %v131_v32 }
  0x8f   :  { %83 = vst.msk [vmem:[#allocation0] sm:$0x1] %vm82_vm1, %v81_v33  }
  0x94   :  { %v107_v34 = vpop.permute.xlu1 %106  }
  0x95   :  { %110 = vst.msk [vmem:[#allocation0 + $0x8] sm:$0x1] %vm108_vm2, %v107_v34  }
  0x96   :  { %v101_v35 = vpop.permute.xlu0 %100  }
  0x97   :  { %103 = vst.msk [vmem:[#allocation0] sm:$0x1] %vm102_vm3, %v101_v35  }
  0x9c   :  { %v125_v36 = vld [vmem:[#allocation0 + $0x8] sm:$0x1] }
  0x9d   :  { %153 = vst [vmem:[%s259_s1 + $0x1] sm:$0x1] %v125_v36 }
  0x9e   :  { %v120_v37 = vld [vmem:[#allocation0] sm:$0x1] }
  0x9f   :  { %123 = vst [vmem:[%s259_s1] sm:$0x1] %v120_v37 }

// kernel: _lambda_.10
= control target key start
LH: loop header
LB: loop body
LE: loop exit
PB: predicated region body
PF: predicated region fallthrough
CT: control target
= control target key end

     0   :  { %s431_s12 = smov 0   ;;  %s433_s13 = smov 0   ;;  %s470_s0 = inlined_call_operand.vmem [shape: f32[2,8,128], index: 0, kind: input, shape index: {}, may-alias: {0,2}]   ;;  %s471_s1 = inlined_call_operand.vmem [shape: f32[2,8,128], index: 1, kind: input, shape index: {}]   ;;  %s472_s2 = inlined_call_operand.vmem [shape: f32[2,8,128], index: 2, kind: input, shape index: {}, may-alias: {0,2}]   ;;  %s473_s3 = inlined_call_operand.vmem [shape: f32[2,1,128], index: 3, kind: output, shape index: {}]  }
   0x1   :  { %s435_s14 = smov 0  }
   0x2 LB: > { %s25_s15 = sadd.s32 1, %s404_s13  ;;  %p355_p0 = scmp.ge.s32.totalorder %s408_s14, 1  ;;  %s408_s14 = sphi %s435_s14, %s13_s14   ;;  %s404_s13 = sphi %s433_s13, %s475_s13   ;;  %s400_s12 = sphi %s431_s12, %s474_s12  }
   0x3   : > { %p27_p1 = scmp.ge.s32.totalorder %s25_s15, 2  ;;  %p181_p2 = scmp.lt.s32.totalorder %s408_s14, 3 }
   0x5   : > { %s477_s15 = smov (%p27_p1, %s25_s15), 0  ;;  %p182_p3 = pnand %p355_p0, %p181_p2 }
   0x6   : > { %p219_p4 = scmp.lt.s32.totalorder (!%p182_p3), %s400_s12, 1 }
   0x7   : > { %185 = sbr.rel (%p182_p3) target bundleno = 38 (0x26), region = 32 }
   0xc   : > { %s479_s12 = smov (!%p219_p4, %s400_s12), 1  ;;  %v410_v0 = vmov 0.0  }
   0xd   : > { %s356_s16 = sshll.u32 %s479_s12, 3  ;;  %s242_s19 = scalar_lea.vmem %s473_s3, %s479_s12 }
   0xe   : > { %s225_s22 = scalar_lea.vmem %s470_s0, %s356_s16  ;;  %s232_s25 = scalar_lea.vmem %s471_s1, %s356_s16  ;;  %247 = vst [vmem:[%s242_s19] sm:$0x1] %v410_v0 }
   0xf   : > { %s239_s28 = scalar_lea.vmem %s472_s2, %s356_s16  ;;  %v248_v1 = vld [vmem:[%s225_s22] sm:$0xff] }
  0x10   : > { %v249_v2 = vld [vmem:[%s232_s25] sm:$0xff] }
  0x11   : > { %v250_v3 = vsub.f32 %v248_v1, %v249_v2  ;;  %v251_v4 = vld [vmem:[%s239_s28] sm:$0xff] }
  0x13   : > { %v252_v5 = vsub.f32 %v250_v3, %v251_v4 }
  0x15   : > { %v254_v6 = vmul.f32 %v252_v5, %v252_v5  ;;  %v253_v12 = vld [vmem:[%s242_s19] sm:$0x1] }
  0x17   : > { %v255_v7 = vrot.slane %v254_v6, 4 }
  0x19   : > { %v256_v8 = vadd.f32 %v255_v7, %v254_v6 }
  0x1b   : > { %v257_v9 = vrot.slane %v256_v8, 2 }
  0x1d   : > { %v258_v10 = vadd.f32 %v257_v9, %v256_v8 }
  0x1f   : > { %v259_v11 = vrot.slane %v258_v10, 1 }
  0x21   : > { %v260_v13 = vadd.f32 %v259_v11, %v258_v10 }
  0x23   : > { %v261_v14 = vadd.f32 %v260_v13, %v253_v12 }
  0x25   : > { %262 = vst [vmem:[%s242_s19] sm:$0x1] %v261_v14 }
  0x26 PF: > { %s13_s14 = sadd.s32 1, %s408_s14   ;;  %s474_s12 = smov %s404_s13 }
  0x27   : > { %p10_p5 = scmp.ge.s32.totalorder %s13_s14, 4   ;;  %s475_s13 = smov %s477_s15 }
  0x29   :  { %12 = sbr.rel (!%p10_p5) target bundleno = 2 (0x2), region = 72 }

// kernel: _lambda_.11
= control target key start
LH: loop header
LB: loop body
LE: loop exit
PB: predicated region body
PF: predicated region fallthrough
CT: control target
= control target key end

     0   :  { %9 = vsyncpa [#allocation3], 0  ;;  %s538_s15 = smov 0   ;;  %s540_s16 = smov 0   ;;  %s581_s0 = inlined_call_operand.vmem [shape: f32[2], index: 0, kind: input, shape index: {}]   ;;  %s582_s1 = inlined_call_operand.vmem [shape: f32[2,8,128], index: 1, kind: input, shape index: {}, may-alias: {1,3}]   ;;  %s583_s2 = inlined_call_operand.vmem [shape: f32[2,8,128], index: 2, kind: input, shape index: {}]   ;;  %s584_s3 = inlined_call_operand.vmem [shape: f32[2,8,128], index: 3, kind: input, shape index: {}, may-alias: {1,3}]   ;;  %s585_s4 = inlined_call_operand.vmem [shape: f32[2,8,128], index: 4, kind: output, shape index: {}]  }
   0x1   :  { %s542_s17 = smov 0  }
   0x2 LB: > { %s421_s18 = sadd.s32 4294967295, %s510_s17   ;;  %s27_s19 = sadd.s32 1, %s506_s16  ;;  %s510_s17 = sphi %s542_s17, %s15_s17   ;;  %s506_s16 = sphi %s540_s16, %s587_s16   ;;  %s502_s15 = sphi %s538_s15, %s586_s15  }
   0x3   : > { %p29_p0 = scmp.ge.s32.totalorder %s27_s19, 2  ;;  %p423_p1 = scmp.ge.s32.totalorder %s510_s17, 1 }
   0x4   : > { %p165_p2 = scmp.lt.s32.totalorder %s510_s17, 3  ;;  %p442_p4 = scmp.eq.s32.totalorder %s421_s18, 0 }
   0x5   : > { %s589_s19 = smov (%p29_p0, %s27_s19), 0  ;;  %s177_s22 = sshll.u32 %s581_s0, 4  ;;  %s178_s22 = int_to_ptr.vmem [resolvable:$true] %s177_s22 }
   0x6   : > { %p166_p3 = pnand %p423_p1, %p165_p2  ;;  %s512_s23 = smov [#allocation2]  }
   0x8   : > { %p438_p5 = pneg %p166_p3  ;;  %220 = sbr.rel (%p166_p3) target bundleno = 32 (0x20), region = 36 }
   0xa   : > { %p439_p6 = pnand %p442_p4, %p438_p5 }
   0xc   : > { %441 = dma.vmem_to_smem (!%p439_p6), %s178_s22, 16, %s512_s23, [#allocation3]  }
   0xd   : > { %497 = dma.done.wait (%p442_p4), [#allocation3], 16  }
   0xe   : > { %499 = vsyncadd (%p442_p4), [#allocation3], 4294967280 }
   0xf   : > { %227 = sfence }
  0x10   : > { %p266_p7 = scmp.lt.s32.totalorder %s502_s15, 1  ;;  %s294_s24 = sld [smem:[#allocation2 + %s502_s15]] }
  0x12   : > { %s591_s15 = smov (!%p266_p7, %s502_s15), 1 }
  0x13   : > { %s428_s25 = sshll.u32 %s591_s15, 3 }
  0x14   : > { %s272_s28 = scalar_lea.vmem %s582_s1, %s428_s25  ;;  %s279_s5 = scalar_lea.vmem %s583_s2, %s428_s25 }
  0x15   : > { %s286_s8 = scalar_lea.vmem %s584_s3, %s428_s25  ;;  %v296_v0 = vld [vmem:[%s272_s28] sm:$0xff]  ;;  %s293_s11 = scalar_lea.vmem %s585_s4, %s428_s25 }
  0x16   : > { %v297_v1 = vld [vmem:[%s279_s5] sm:$0xff]  ;;  %v300_v4 = vstv %s294_s24 }
  0x17   : > { %v295_v2 = vld [vmem:[%s286_s8] sm:$0xff]  ;;  %v298_v3 = vsub.f32 %v296_v0, %v297_v1 }
  0x19   : > { %v299_v5 = vsub.f32 %v298_v3, %v295_v2 }
  0x1b   : > { %v301_v6 = vmul.f32 %v300_v4, %v299_v5 }
  0x1d   : > { %v302_v7 = vadd.f32 %v301_v6, %v295_v2 }
  0x1f   : > { %303 = vst [vmem:[%s293_s11] sm:$0xff] %v302_v7 }
  0x20 PF: > { %s15_s17 = sadd.s32 1, %s510_s17   ;;  %s586_s15 = smov %s506_s16 }
  0x21   : > { %p12_p8 = scmp.ge.s32.totalorder %s15_s17, 4   ;;  %s587_s16 = smov %s589_s19 }
  0x23   :  { %14 = sbr.rel (!%p12_p8) target bundleno = 2 (0x2), region = 77 }
  0x28   :  { %329 = vsyncpa [#allocation3], 1 }
  0x29   :  { %331 = vsyncpa [#allocation3 + $0x1], 1 }

// kernel: _lambda_.17
= control target key start
LH: loop header
LB: loop body
LE: loop exit
PB: predicated region body
PF: predicated region fallthrough
CT: control target
= control target key end

     0   :  { %9 = vsyncpa [#allocation3], 0  ;;  %s540_s15 = smov 0   ;;  %s542_s16 = smov 0   ;;  %s583_s0 = inlined_call_operand.vmem [shape: f32[2], index: 0, kind: input, shape index: {}]   ;;  %s584_s1 = inlined_call_operand.vmem [shape: f32[2,8,128], index: 1, kind: input, shape index: {}]   ;;  %s585_s2 = inlined_call_operand.vmem [shape: f32[2,8,128], index: 2, kind: input, shape index: {}]   ;;  %s586_s3 = inlined_call_operand.vmem [shape: f32[2,8,128], index: 3, kind: input, shape index: {}]   ;;  %s587_s4 = inlined_call_operand.vmem [shape: f32[2,8,128], index: 4, kind: output, shape index: {}]  }
   0x1   :  { %s544_s17 = smov 0  }
   0x2 LB: > { %s423_s18 = sadd.s32 4294967295, %s512_s17   ;;  %s27_s19 = sadd.s32 1, %s508_s16  ;;  %s512_s17 = sphi %s544_s17, %s15_s17   ;;  %s508_s16 = sphi %s542_s16, %s589_s16   ;;  %s504_s15 = sphi %s540_s15, %s588_s15  }
   0x3   : > { %p29_p0 = scmp.ge.s32.totalorder %s27_s19, 2  ;;  %p425_p1 = scmp.ge.s32.totalorder %s512_s17, 1 }
   0x4   : > { %p165_p2 = scmp.lt.s32.totalorder %s512_s17, 3  ;;  %p444_p4 = scmp.eq.s32.totalorder %s423_s18, 0 }
   0x5   : > { %s591_s19 = smov (%p29_p0, %s27_s19), 0  ;;  %s177_s22 = sshll.u32 %s583_s0, 4  ;;  %s178_s22 = int_to_ptr.vmem [resolvable:$true] %s177_s22 }
   0x6   : > { %p166_p3 = pnand %p425_p1, %p165_p2  ;;  %s514_s23 = smov [#allocation2]  }
   0x8   : > { %p440_p5 = pneg %p166_p3  ;;  %220 = sbr.rel (%p166_p3) target bundleno = 36 (0x24), region = 36 }
   0xa   : > { %p441_p6 = pnand %p444_p4, %p440_p5 }
   0xc   : > { %443 = dma.vmem_to_smem (!%p441_p6), %s178_s22, 16, %s514_s23, [#allocation3]  }
   0xd   : > { %499 = dma.done.wait (%p444_p4), [#allocation3], 16  }
   0xe   : > { %501 = vsyncadd (%p444_p4), [#allocation3], 4294967280 }
   0xf   : > { %227 = sfence }
  0x10   : > { %p266_p7 = scmp.lt.s32.totalorder %s504_s15, 1  ;;  %s294_s24 = sld [smem:[#allocation2 + %s504_s15]] }
  0x12   : > { %s593_s15 = smov (!%p266_p7, %s504_s15), 1 }
  0x13   : > { %s430_s25 = sshll.u32 %s593_s15, 3 }
  0x14   : > { %s272_s28 = scalar_lea.vmem %s584_s1, %s430_s25  ;;  %s279_s5 = scalar_lea.vmem %s585_s2, %s430_s25 }
  0x15   : > { %s286_s8 = scalar_lea.vmem %s586_s3, %s430_s25  ;;  %v296_v0 = vld [vmem:[%s272_s28] sm:$0xff]  ;;  %s293_s11 = scalar_lea.vmem %s587_s4, %s430_s25 }
  0x16   : > { %v297_v1 = vld [vmem:[%s279_s5] sm:$0xff]  ;;  %v300_v4 = vstv %s294_s24 }
  0x17   : > { %v295_v2 = vld [vmem:[%s286_s8] sm:$0xff]  ;;  %v298_v3 = vsub.f32 %v296_v0, %v297_v1 }
  0x19   : > { %v299_v5 = vsub.f32 %v298_v3, %v295_v2 }
  0x1b   : > { %v301_v6 = vmul.f32 %v300_v4, %v299_v5 }
  0x1d   : > { %v302_v7 = vadd.f32 %v301_v6, %v295_v2 }
  0x1f   : > { %v303_v8 = vmax.f32 %v302_v7, 0.0 }
  0x21   : > { %v304_v9 = vmin.f32 %v303_v8, 255.0 }
  0x23   : > { %305 = vst [vmem:[%s293_s11] sm:$0xff] %v304_v9 }
  0x24 PF: > { %s15_s17 = sadd.s32 1, %s512_s17   ;;  %s588_s15 = smov %s508_s16 }
  0x25   : > { %p12_p8 = scmp.ge.s32.totalorder %s15_s17, 4   ;;  %s589_s16 = smov %s591_s19 }
  0x27   :  { %14 = sbr.rel (!%p12_p8) target bundleno = 2 (0x2), region = 77 }
  0x2c   :  { %331 = vsyncpa [#allocation3], 1 }
  0x2d   :  { %333 = vsyncpa [#allocation3 + $0x1], 1 }

// kernel: _lambda_.9
= control target key start
LH: loop header
LB: loop body
LE: loop exit
PB: predicated region body
PF: predicated region fallthrough
CT: control target
= control target key end

     0   :  { %s5117_s18 = smov 0   ;;  %s6408_s0 = inlined_call_operand.vmem [shape: bf16[2,3,404], index: 0, kind: input, shape index: {}]   ;;  %s6409_s1 = inlined_call_operand.vmem [shape: f32[1,320], index: 1, kind: input, shape index: {}]   ;;  %s6410_s2 = inlined_call_operand.vmem [shape: bf16[25,16,3], index: 2, kind: input, shape index: {}]   ;;  %s6411_s3 = inlined_call_operand.vmem [shape: f32[16,17], index: 3, kind: input, shape index: {}]   ;;  %s6412_s4 = inlined_call_operand.vmem [shape: bf16[25,3,16], index: 4, kind: input, shape index: {}]   ;;  %s6413_s5 = inlined_call_operand.vmem [shape: f32[2,3,404], index: 5, kind: output, shape index: {}]  }
   0x1 LB: > { %s4506_s19 = sadd.s32 4294967295, %s5021_s18   ;;  %p4510_p0 = scmp.ge.s32.totalorder %s5021_s18, 1  ;;  %s5021_s18 = sphi %s5117_s18, %s15_s18  }
   0x2   : > { %p187_p1 = scmp.lt.s32.totalorder %s5021_s18, 3 }
   0x4   : > { %p188_p2 = pnand %p4510_p0, %p187_p1 }
   0x6   : > { %191 = sbr.rel (%p188_p2) target bundleno = 1188 (0x4a4), region = 40 }
   0xb   : > { %p215_p3 = scmp.lt.s32.totalorder %s4506_s19, 1  ;;  %s5023_s24 = smov 127   ;;  %vm258_vm0 = vcmask 1040384   ;;  %vm259_vm1 = vcmask 1041408   ;;  %v5032_v31 = vmov 65535   ;;  %v5157_v38 = vld [vmem:[%s6410_s2] sm:$0xff] }
   0xc   : > { %s5024_s25 = smov 126   ;;  %s5025_s26 = smov 125   ;;  %v260_v32 = vsel %vm258_vm0, 4294967295, %v5032_v31  ;;  %vm254_vm2 = vcmask 23552   ;;  %v4848_v49 = vld [vmem:[%s6410_s2 + $0x8] sm:$0xff]  ;;  %vm394_vm3 = vcmask 1031168  }
   0xd   : > { %s6440_s19 = smov (!%p215_p3, %s4506_s19), 1  ;;  %s5026_s27 = smov 124   ;;  %v5150_v33 = vsel %vm259_vm1, %v260_v32, 0  ;;  %vm251_vm4 = vcmask 1039360   ;;  %v5175_v56 = vld [vmem:[%s6410_s2 + $0x10] sm:$0xff]  ;;  %vm478_vm5 = vcmask 1022976  }
   0xe   : > { %s4845_s20 = sshll.u32 %s6440_s19, 3  ;;  %s5027_s28 = smov 108   ;;  %vm562_vm6 = vcmask 1014784   ;;  %vm646_vm7 = vcmask 883712   ;;  %vm730_vm8 = vcmask 875520   ;;  %vm814_vm9 = vcmask 867328  }
   0xf   : > { %s219_s23 = scalar_lea.vmem %s6408_s0, %s4845_s20  ;;  %s5028_s29 = smov 107   ;;  %vm898_vm10 = vcmask 859136   ;;  %vm982_vm11 = vcmask 850944   ;;  %vm1066_vm12 = vcmask 719872   ;;  %vm1150_vm13 = vcmask 711680  }
  0x10   : > { %v5131_v0 = vld [vmem:[%s219_s23] sm:$0xff]  ;;  %s5029_s30 = smov 106   ;;  %s5030_s6 = smov 105   ;;  %vm1318_vm14 = vcmask 695296   ;;  %vm1234_vm15 = vcmask 703488   ;;  %vm1402_vm0 = vcmask 687104  }
  0x11   : > { %238 = vst [vmem:[#allocation1] ss:$4 sm:$0xff] %v5131_v0  ;;  %s5031_s7 = smov 104   ;;  %s5033_s8 = smov 88   ;;  %vm1486_vm1 = vcmask 556032  }
  0x12   : > { %s5034_s11 = smov 87   ;;  %s5035_s12 = smov 86  }
  0x13   : > { %s5036_s15 = smov 85   ;;  %s5037_s20 = smov 84  }
  0x14   : > { %s5038_s21 = smov 68   ;;  %s5044_s14 = smov 47  }
  0x15   : > { %s5045_s17 = smov 46   ;;  %s5046_s23 = smov 45  }
  0x16   : > { %s5068_s10 = smov 3   ;;  %s5069_s13 = smov 4  }
  0x17   : > { %s5071_s22 = smov 21  }
  0x18   : > { %v243_v1 = vld.sshfl [vmem:[#allocation1 + $0x10] sm:$0xff pattern:$0x73625140]  ;;  %v239_v2 = vld.sshfl [vmem:[#allocation1] sm:$0xff pattern:$0x73625140] }
  0x19   : > { %249 = vrot.lane.b32.xlu1 %v243_v1, %s5023_s24  ;;  %245 = vrot.lane.b32.xlu0 %v239_v2, %s5023_s24  ;;  %v241_v3 = vld.sshfl [vmem:[#allocation1 + $0x8] sm:$0xff pattern:$0x73625140] }
  0x1a   : > { %318 = vst [vmem:[#allocation1] ss:$4 sm:$0xff] %v5131_v0 }
  0x21   : > { %247 = vrot.lane.b32.xlu0 %v241_v3, %s5023_s24  ;;  %v5135_v4 = vld.sshfl [vmem:[#allocation1] sm:$0xff pattern:$0x73625140]  ;;  %v5137_v5 = vld.sshfl [vmem:[#allocation1 + $0x8] sm:$0xff pattern:$0x73625140] }
  0x22   : > { %v5139_v6 = vld.sshfl [vmem:[#allocation1 + $0x10] sm:$0xff pattern:$0x73625140]  ;;  %v325_v34 = vand.u32 %v5135_v4, %v5150_v33  ;;  %v327_v60 = vand.u32 %v5137_v5, %v5150_v33  ;;  %s5039_s24 = smov 67  }
  0x23   : > { %381 = vst [vmem:[#allocation1] ss:$4 sm:$0xff] %v5131_v0  ;;  %v329_v61 = vand.u32 %v5139_v6, %v5150_v33 }
  0x24   : > { %338 = vmatpush.bf16.msra.mxu3 %v325_v34 }
  0x27   : > { %4528 = vmatmul.msk.bf16.vlgmr.msra.gmra.mxu3 %vm254_vm2, %v5157_v38 }
  0x2a   : > { %v382_v7 = vld.sshfl [vmem:[#allocation1] sm:$0xff pattern:$0x73625140]  ;;  %v384_v8 = vld.sshfl [vmem:[#allocation1 + $0x8] sm:$0xff pattern:$0x73625140] }
  0x2b   : > { %v386_v9 = vld.sshfl [vmem:[#allocation1 + $0x10] sm:$0xff pattern:$0x73625140]  ;;  %388 = vrot.lane.b32.xlu1 %v382_v7, %s5024_s25  ;;  %390 = vrot.lane.b32.xlu2 %v384_v8, %s5024_s25 }
  0x2c   : > { %465 = vst [vmem:[#allocation1] ss:$4 sm:$0xff] %v5131_v0 }
  0x33   : > { %v470_v10 = vld.sshfl [vmem:[#allocation1 + $0x10] sm:$0xff pattern:$0x73625140]  ;;  %v466_v11 = vld.sshfl [vmem:[#allocation1] sm:$0xff pattern:$0x73625140]  ;;  %392 = vrot.lane.b32.xlu2 %v386_v9, %s5024_s25 }
  0x34   : > { %476 = vrot.lane.b32.xlu1 %v470_v10, %s5025_s26  ;;  %v468_v12 = vld.sshfl [vmem:[#allocation1 + $0x8] sm:$0xff pattern:$0x73625140]  ;;  %s5072_s25 = smov 22  }
  0x35   : > { %474 = vrot.lane.b32.xlu0 %v468_v12, %s5025_s26  ;;  %549 = vst [vmem:[#allocation1] ss:$4 sm:$0xff] %v5131_v0 }
  0x3b   : > { %472 = vrot.lane.b32.xlu2 %v466_v11, %s5025_s26  ;;  %s5047_s26 = smov 44  }
  0x3c   : > { %v550_v13 = vld.sshfl [vmem:[#allocation1] sm:$0xff pattern:$0x73625140]  ;;  %v554_v14 = vld.sshfl [vmem:[#allocation1 + $0x10] sm:$0xff pattern:$0x73625140] }
  0x3d   : > { %556 = vrot.lane.b32.xlu0 %v550_v13, %s5026_s27  ;;  %v552_v15 = vld.sshfl [vmem:[#allocation1 + $0x8] sm:$0xff pattern:$0x73625140] }
  0x3e   : > { %558 = vrot.lane.b32.xlu1 %v552_v15, %s5026_s27  ;;  %633 = vst [vmem:[#allocation1] ss:$4 sm:$0xff] %v5131_v0 }
  0x43   : > { %560 = vrot.lane.b32.xlu2 %v554_v14, %s5026_s27  ;;  %s5040_s27 = smov 66  }
  0x45   : > { %v636_v16 = vld.sshfl [vmem:[#allocation1 + $0x8] sm:$0xff pattern:$0x73625140]  ;;  %v634_v17 = vld.sshfl [vmem:[#allocation1] sm:$0xff pattern:$0x73625140] }
  0x46   : > { %642 = vrot.lane.b32.xlu0 %v636_v16, %s5027_s28  ;;  %v638_v18 = vld.sshfl [vmem:[#allocation1 + $0x10] sm:$0xff pattern:$0x73625140] }
  0x47   : > { %644 = vrot.lane.b32.xlu1 %v638_v18, %s5027_s28  ;;  %717 = vst [vmem:[#allocation1] ss:$4 sm:$0xff] %v5131_v0 }
  0x4b   : > { %640 = vrot.lane.b32.xlu2 %v634_v17, %s5027_s28  ;;  %s5084_s28 = smov 81  }
  0x4e   : > { %v720_v19 = vld.sshfl [vmem:[#allocation1 + $0x8] sm:$0xff pattern:$0x73625140]  ;;  %v722_v20 = vld.sshfl [vmem:[#allocation1 + $0x10] sm:$0xff pattern:$0x73625140] }
  0x4f   : > { %726 = vrot.lane.b32.xlu1 %v720_v19, %s5028_s29  ;;  %v718_v21 = vld.sshfl [vmem:[#allocation1] sm:$0xff pattern:$0x73625140] }
  0x50   : > { %724 = vrot.lane.b32.xlu0 %v718_v21, %s5028_s29  ;;  %801 = vst [vmem:[#allocation1] ss:$4 sm:$0xff] %v5131_v0  ;;  %v4850_v21 = vld [vmem:[%s6410_s2 + $0x18] sm:$0xff] }
  0x53   : > { %728 = vrot.lane.b32.xlu2 %v722_v20, %s5028_s29  ;;  %s5073_s29 = smov 23  }
  0x57   : > { %v806_v22 = vld.sshfl [vmem:[#allocation1 + $0x10] sm:$0xff pattern:$0x73625140]  ;;  %v802_v23 = vld.sshfl [vmem:[#allocation1] sm:$0xff pattern:$0x73625140] }
  0x58   : > { %812 = vrot.lane.b32.xlu1 %v806_v22, %s5029_s30  ;;  %v804_v24 = vld.sshfl [vmem:[#allocation1 + $0x8] sm:$0xff pattern:$0x73625140] }
  0x59   : > { %810 = vrot.lane.b32.xlu0 %v804_v24, %s5029_s30  ;;  %885 = vst [vmem:[#allocation1] ss:$4 sm:$0xff] %v5131_v0 }
  0x5b   : > { %808 = vrot.lane.b32.xlu2 %v802_v23, %s5029_s30  ;;  %s5041_s30 = smov 65  }
  0x60   : > { %v886_v25 = vld.sshfl [vmem:[#allocation1] sm:$0xff pattern:$0x73625140]  ;;  %v890_v26 = vld.sshfl [vmem:[#allocation1 + $0x10] sm:$0xff pattern:$0x73625140] }
  0x61   : > { %892 = vrot.lane.b32.xlu0 %v886_v25, %s5030_s6  ;;  %v888_v27 = vld.sshfl [vmem:[#allocation1 + $0x8] sm:$0xff pattern:$0x73625140] }
  0x62   : > { %894 = vrot.lane.b32.xlu1 %v888_v27, %s5030_s6  ;;  %969 = vst [vmem:[#allocation1] ss:$4 sm:$0xff] %v5131_v0 }
  0x63   : > { %896 = vrot.lane.b32.xlu2 %v890_v26, %s5030_s6  ;;  %s5067_s6 = smov 2  }
  0x69   : > { %v972_v28 = vld.sshfl [vmem:[#allocation1 + $0x8] sm:$0xff pattern:$0x73625140]  ;;  %v970_v29 = vld.sshfl [vmem:[#allocation1] sm:$0xff pattern:$0x73625140] }
  0x6a   : > { %978 = vrot.lane.b32.xlu0 %v972_v28, %s5031_s7  ;;  %v974_v30 = vld.sshfl [vmem:[#allocation1 + $0x10] sm:$0xff pattern:$0x73625140] }
  0x6b   : > { %980 = vrot.lane.b32.xlu1 %v974_v30, %s5031_s7  ;;  %1053 = vst [vmem:[#allocation1] ss:$4 sm:$0xff] %v5131_v0  ;;  %976 = vrot.lane.b32.xlu2 %v970_v29, %s5031_s7  ;;  %s5074_s7 = smov 24  }
  0x72   : > { %v1056_v35 = vld.sshfl [vmem:[#allocation1 + $0x8] sm:$0xff pattern:$0x73625140]  ;;  %v1058_v36 = vld.sshfl [vmem:[#allocation1 + $0x10] sm:$0xff pattern:$0x73625140] }
  0x73   : > { %1062 = vrot.lane.b32.xlu1 %v1056_v35, %s5033_s8  ;;  %v1054_v37 = vld.sshfl [vmem:[#allocation1] sm:$0xff pattern:$0x73625140]  ;;  %1064 = vrot.lane.b32.xlu2 %v1058_v36, %s5033_s8 }
  0x74   : > { %1060 = vrot.lane.b32.xlu0 %v1054_v37, %s5033_s8  ;;  %1137 = vst [vmem:[#allocation1] ss:$4 sm:$0xff] %v5131_v0  ;;  %s5042_s8 = smov 64  }
  0x7b   : > { %v1142_v39 = vld.sshfl [vmem:[#allocation1 + $0x10] sm:$0xff pattern:$0x73625140]  ;;  %v1138_v40 = vld.sshfl [vmem:[#allocation1] sm:$0xff pattern:$0x73625140] }
  0x7c   : > { %1148 = vrot.lane.b32.xlu1 %v1142_v39, %s5034_s11  ;;  %v1140_v41 = vld.sshfl [vmem:[#allocation1 + $0x8] sm:$0xff pattern:$0x73625140]  ;;  %1144 = vrot.lane.b32.xlu2 %v1138_v40, %s5034_s11 }
  0x7d   : > { %1146 = vrot.lane.b32.xlu0 %v1140_v41, %s5034_s11  ;;  %1221 = vst [vmem:[#allocation1] ss:$4 sm:$0xff] %v5131_v0  ;;  %v5222_v40 = vld [vmem:[%s6410_s2 + $0x28] sm:$0xff]  ;;  %s5043_s11 = smov 48  }
  0x84   : > { %v1222_v42 = vld.sshfl [vmem:[#allocation1] sm:$0xff pattern:$0x73625140]  ;;  %v1226_v43 = vld.sshfl [vmem:[#allocation1 + $0x10] sm:$0xff pattern:$0x73625140] }
  0x85   : > { %v391_v44 = vpop.permute.xlu2 %390  ;;  %1228 = vrot.lane.b32.xlu0 %v1222_v42, %s5035_s12  ;;  %v1224_v45 = vld.sshfl [vmem:[#allocation1 + $0x8] sm:$0xff pattern:$0x73625140]  ;;  %1232 = vrot.lane.b32.xlu2 %v1226_v43, %s5035_s12 }
  0x86   : > { %1230 = vrot.lane.b32.xlu1 %v1224_v45, %s5035_s12  ;;  %1305 = vst [vmem:[#allocation1] ss:$4 sm:$0xff] %v5131_v0  ;;  %v4851_v45 = vld [vmem:[%s6410_s2 + $0x20] sm:$0xff] }
  0x8b   : > { %v250_v46 = vpop.permute.xlu1 %249  ;;  %v246_v47 = vpop.permute.xlu0 %245 }
  0x8c   : > { %v269_v48 = vand.u32 %v5150_v33, %v250_v46 }
  0x8d   : > { %v393_v50 = vpop.permute.xlu2 %392  ;;  %v1308_v51 = vld.sshfl [vmem:[#allocation1 + $0x8] sm:$0xff pattern:$0x73625140]  ;;  %v1306_v52 = vld.sshfl [vmem:[#allocation1] sm:$0xff pattern:$0x73625140] }
  0x8e   : > { %306 = vmatpush.bf16.msra.mxu2 %v269_v48  ;;  %v396_v53 = vsel %vm394_vm3, %v391_v44, %v393_v50  ;;  %1314 = vrot.lane.b32.xlu0 %v1308_v51, %s5036_s15  ;;  %v1310_v54 = vld.sshfl [vmem:[#allocation1 + $0x10] sm:$0xff pattern:$0x73625140]  ;;  %v407_v3 = vand.u32 %v393_v50, %v5150_v33 }
  0x8f   : > { %v404_v55 = vand.u32 %v396_v53, %v5150_v33  ;;  %1316 = vrot.lane.b32.xlu1 %v1310_v54, %s5036_s15  ;;  %1389 = vst [vmem:[#allocation1] ss:$4 sm:$0xff] %v5131_v0  ;;  %1312 = vrot.lane.b32.xlu2 %v1306_v52, %s5036_s15 }
  0x91   : > { %4523 = vmatmul.msk.bf16.vlgmr.msra.gmra.mxu2 %vm254_vm2, %v4848_v49  ;;  %430 = vmatpush.bf16.msrb.mxu3 %v404_v55 }
  0x93   : > { %v248_v57 = vpop.permute.xlu0 %247 }
  0x94   : > { %v252_v58 = vsel %vm251_vm4, %v246_v47, %v248_v57  ;;  %v253_v59 = vsel %vm251_vm4, %v248_v57, %v250_v46  ;;  %4538 = vmatmul.msk.bf16.vlgmr.msrb.gmra.mxu3 %vm254_vm2, %v5175_v56  ;;  %vm1654_vm4 = vcmask 539648  }
  0x95   : > { %v263_v62 = vand.u32 %v5150_v33, %v252_v58  ;;  %v266_v63 = vand.u32 %v5150_v33, %v253_v59  ;;  %v473_v8 = vpop.permute.xlu2 %472 }
  0x96   : > { %v1392_v1 = vld.sshfl [vmem:[#allocation1 + $0x8] sm:$0xff pattern:$0x73625140]  ;;  %v1394_v2 = vld.sshfl [vmem:[#allocation1 + $0x10] sm:$0xff pattern:$0x73625140] }
  0x97   : > { %278 = vmatpush.bf16.msra.mxu0 %v263_v62  ;;  %292 = vmatpush.bf16.msra.mxu1 %v266_v63  ;;  %v1390_v4 = vld.sshfl [vmem:[#allocation1] sm:$0xff pattern:$0x73625140]  ;;  %v4853_v62 = vld [vmem:[%s6410_s2 + $0x30] sm:$0xff] }
  0x98   : > { %1473 = vst [vmem:[#allocation1] ss:$4 sm:$0xff] %v5131_v0  ;;  %1398 = vrot.lane.b32.xlu1 %v1392_v1, %s5037_s20  ;;  %1396 = vrot.lane.b32.xlu0 %v1390_v4, %s5037_s20 }
  0x99   : > { %1400 = vrot.lane.b32.xlu2 %v1394_v2, %s5037_s20 }
  0x9a   : > { %4521 = vmatmul.msk.bf16.vlgmr.msra.gmra.mxu0 %vm254_vm2, %v4848_v49  ;;  %4522 = vmatmul.msk.bf16.vlgmr.msra.gmra.mxu1 %vm254_vm2, %v4848_v49 }
  0x9b   : > { %352 = vmatpush.bf16.msrb.mxu0 %v327_v60  ;;  %366 = vmatpush.bf16.msrb.mxu1 %v329_v61 }
  0x9d   : > { %v389_v5 = vpop.permute.xlu1 %388  ;;  %v561_v15 = vpop.permute.xlu2 %560 }
  0x9e   : > { %v395_v6 = vsel %vm394_vm3, %v389_v5, %v391_v44  ;;  %v575_v18 = vand.u32 %v561_v15, %v5150_v33  ;;  %vm1570_vm3 = vcmask 547840  }
  0x9f   : > { %444 = vmatpush.bf16.msra.mxu0 %v407_v3  ;;  %v401_v7 = vand.u32 %v395_v6, %v5150_v33  ;;  %v1478_v9 = vld.sshfl [vmem:[#allocation1 + $0x10] sm:$0xff pattern:$0x73625140]  ;;  %v1474_v10 = vld.sshfl [vmem:[#allocation1] sm:$0xff pattern:$0x73625140] }
  0xa0   : > { %1484 = vrot.lane.b32.xlu1 %v1478_v9, %s5038_s21  ;;  %v1476_v11 = vld.sshfl [vmem:[#allocation1 + $0x8] sm:$0xff pattern:$0x73625140] }
  0xa1   : > { %416 = vmatpush.bf16.msrb.mxu2 %v401_v7  ;;  %1482 = vrot.lane.b32.xlu0 %v1476_v11, %s5038_s21  ;;  %1557 = vst [vmem:[#allocation1] ss:$4 sm:$0xff] %v5131_v0 }
  0xa2   : > { %1480 = vrot.lane.b32.xlu2 %v1474_v10, %s5038_s21  ;;  %s5070_s21 = smov 20  }
  0xa4   : > { %4537 = vmatmul.msk.bf16.vlgmr.msrb.gmra.mxu2 %vm254_vm2, %v5175_v56 }
  0xa5   : > { %v641_v31 = vpop.permute.xlu2 %640 }
  0xa6   : > { %v477_v12 = vpop.permute.xlu1 %476 }
  0xa7   : > { %v491_v13 = vand.u32 %v477_v12, %v5150_v33  ;;  %v475_v14 = vpop.permute.xlu0 %474 }
  0xa8   : > { %v480_v16 = vsel %vm478_vm5, %v475_v14, %v477_v12  ;;  %v479_v17 = vsel %vm478_vm5, %v473_v8, %v475_v14  ;;  %v1558_v28 = vld.sshfl [vmem:[#allocation1] sm:$0xff pattern:$0x73625140]  ;;  %v1562_v29 = vld.sshfl [vmem:[#allocation1 + $0x10] sm:$0xff pattern:$0x73625140] }
  0xa9   : > { %v488_v19 = vand.u32 %v480_v16, %v5150_v33  ;;  %v485_v20 = vand.u32 %v479_v17, %v5150_v33  ;;  %528 = vmatpush.bf16.msra.mxu3 %v491_v13  ;;  %1564 = vrot.lane.b32.xlu0 %v1558_v28, %s5039_s24  ;;  %v1560_v30 = vld.sshfl [vmem:[#allocation1 + $0x8] sm:$0xff pattern:$0x73625140]  ;;  %v4854_v14 = vld [vmem:[%s6410_s2 + $0x38] sm:$0xff]  ;;  %vm1738_vm5 = vcmask 531456  }
  0xaa   : > { %4529 = vmatmul.msk.bf16.vlgmr.msrb.gmra.mxu0 %vm254_vm2, %v5157_v38  ;;  %4530 = vmatmul.msk.bf16.vlgmr.msrb.gmra.mxu1 %vm254_vm2, %v5157_v38  ;;  %1641 = vst [vmem:[#allocation1] ss:$4 sm:$0xff] %v5131_v0 }
  0xab   : > { %514 = vmatpush.bf16.msra.mxu2 %v488_v19  ;;  %500 = vmatpush.bf16.msra.mxu1 %v485_v20 }
  0xac   : > { %4548 = vmatmul.msk.bf16.vlgmr.msra.gmra.mxu3 %vm254_vm2, %v4850_v21  ;;  %1566 = vrot.lane.b32.xlu1 %v1560_v30, %s5039_s24 }
  0xad   : > { %1568 = vrot.lane.b32.xlu2 %v1562_v29, %s5039_s24  ;;  %v729_v44 = vpop.permute.xlu2 %728  ;;  %s5079_s24 = smov 60  }
  0xae   : > { %v743_v54 = vand.u32 %v729_v44, %v5150_v33 }
  0xaf   : > { %612 = vmatpush.bf16.msrb.mxu2 %v575_v18  ;;  %v557_v22 = vpop.permute.xlu0 %556 }
  0xb0   : > { %v559_v23 = vpop.permute.xlu1 %558 }
  0xb1   : > { %v563_v24 = vsel %vm562_vm6, %v557_v22, %v559_v23  ;;  %v564_v25 = vsel %vm562_vm6, %v559_v23, %v561_v15  ;;  %v1644_v41 = vld.sshfl [vmem:[#allocation1 + $0x8] sm:$0xff pattern:$0x73625140]  ;;  %v1642_v42 = vld.sshfl [vmem:[#allocation1] sm:$0xff pattern:$0x73625140] }
  0xb2   : > { %v569_v26 = vand.u32 %v563_v24, %v5150_v33  ;;  %v572_v27 = vand.u32 %v564_v25, %v5150_v33  ;;  %1650 = vrot.lane.b32.xlu0 %v1644_v41, %s5040_s27  ;;  %v1646_v43 = vld.sshfl [vmem:[#allocation1 + $0x10] sm:$0xff pattern:$0x73625140]  ;;  %vm1822_vm6 = vcmask 523264  }
  0xb3   : > { %1725 = vst [vmem:[#allocation1] ss:$4 sm:$0xff] %v5131_v0 }
  0xb4   : > { %4547 = vmatmul.msk.bf16.vlgmr.msra.gmra.mxu2 %vm254_vm2, %v4850_v21  ;;  %584 = vmatpush.bf16.msrb.mxu0 %v569_v26 }
  0xb5   : > { %598 = vmatpush.bf16.msrb.mxu1 %v572_v27  ;;  %1648 = vrot.lane.b32.xlu2 %v1642_v42, %s5040_s27 }
  0xb6   : > { %1652 = vrot.lane.b32.xlu1 %v1646_v43, %s5040_s27  ;;  %v4855_v43 = vld [vmem:[%s6410_s2 + $0x40] sm:$0xff]  ;;  %s5082_s27 = smov 63  }
  0xb8   : > { %v643_v32 = vpop.permute.xlu0 %642 }
  0xb9   : > { %v647_v34 = vsel %vm646_vm7, %v641_v31, %v643_v32  ;;  %v645_v35 = vpop.permute.xlu1 %644 }
  0xba   : > { %4539 = vmatmul.msk.bf16.vlgmr.msra.gmra.mxu0 %vm254_vm2, %v5175_v56  ;;  %4546 = vmatmul.msk.bf16.vlgmr.msra.gmra.mxu1 %vm254_vm2, %v4850_v21  ;;  %v653_v36 = vand.u32 %v647_v34, %v5150_v33  ;;  %v648_v37 = vsel %vm646_vm7, %v643_v32, %v645_v35  ;;  %v659_v38 = vand.u32 %v645_v35, %v5150_v33  ;;  %v1728_v52 = vld.sshfl [vmem:[#allocation1 + $0x8] sm:$0xff pattern:$0x73625140]  ;;  %v1730_v53 = vld.sshfl [vmem:[#allocation1 + $0x10] sm:$0xff pattern:$0x73625140]  ;;  %v809_v56 = vpop.permute.xlu2 %808 }
  0xbb   : > { %v656_v39 = vand.u32 %v648_v37, %v5150_v33  ;;  %v1726_v55 = vld.sshfl [vmem:[#allocation1] sm:$0xff pattern:$0x73625140]  ;;  %v5274_v34 = vld [vmem:[%s6410_s2 + $0x48] sm:$0xff]  ;;  %vm1910_vm7 = vcmask 392192  }
  0xbc   : > { %668 = vmatpush.bf16.msrb.mxu3 %v653_v36  ;;  %696 = vmatpush.bf16.msra.mxu1 %v659_v38  ;;  %1809 = vst [vmem:[#allocation1] ss:$4 sm:$0xff] %v5131_v0 }
  0xbd   : > { %682 = vmatpush.bf16.msra.mxu0 %v656_v39  ;;  %1736 = vrot.lane.b32.xlu2 %v1730_v53, %s5041_s30 }
  0xbe   : > { %1734 = vrot.lane.b32.xlu1 %v1728_v52, %s5041_s30  ;;  %1732 = vrot.lane.b32.xlu0 %v1726_v55, %s5041_s30  ;;  %s5066_s30 = smov 1  }
  0xbf   : > { %4564 = vmatmul.msk.bf16.vlgmr.msrb.gmra.mxu3 %vm254_vm2, %v5222_v40 }
  0xc1   : > { %v727_v46 = vpop.permute.xlu1 %726 }
  0xc2   : > { %v725_v47 = vpop.permute.xlu0 %724  ;;  %v732_v48 = vsel %vm730_vm8, %v727_v46, %v729_v44  ;;  %v897_v2 = vpop.permute.xlu2 %896 }
  0xc3   : > { %v731_v49 = vsel %vm730_vm8, %v725_v47, %v727_v46  ;;  %v740_v50 = vand.u32 %v732_v48, %v5150_v33  ;;  %v911_v3 = vand.u32 %v897_v2, %v5150_v33  ;;  %v1812_v6 = vld.sshfl [vmem:[#allocation1 + $0x8] sm:$0xff pattern:$0x73625140]  ;;  %v1810_v7 = vld.sshfl [vmem:[#allocation1] sm:$0xff pattern:$0x73625140] }
  0xc4   : > { %4557 = vmatmul.msk.bf16.vlgmr.msrb.gmra.mxu2 %vm254_vm2, %v4851_v45  ;;  %v737_v51 = vand.u32 %v731_v49, %v5150_v33  ;;  %v1814_v10 = vld.sshfl [vmem:[#allocation1 + $0x10] sm:$0xff pattern:$0x73625140]  ;;  %vm1999_vm8 = vcmask 384000  }
  0xc5   : > { %766 = vmatpush.bf16.msra.mxu3 %v740_v50  ;;  %1893 = vst [vmem:[#allocation1] ss:$4 sm:$0xff] %v5131_v0  ;;  %1816 = vrot.lane.b32.xlu2 %v1810_v7, %s5042_s8 }
  0xc6   : > { %752 = vmatpush.bf16.msra.mxu2 %v737_v51  ;;  %1818 = vrot.lane.b32.xlu0 %v1812_v6, %s5042_s8 }
  0xc7   : > { %1820 = vrot.lane.b32.xlu1 %v1814_v10, %s5042_s8 }
  0xca   : > { %4555 = vmatmul.msk.bf16.vlgmr.msrb.gmra.mxu0 %vm254_vm2, %v4851_v45  ;;  %4556 = vmatmul.msk.bf16.vlgmr.msrb.gmra.mxu1 %vm254_vm2, %v4851_v45  ;;  %v813_v57 = vpop.permute.xlu1 %812  ;;  %v977_v13 = vpop.permute.xlu2 %976 }
  0xcb   : > { %v827_v58 = vand.u32 %v813_v57, %v5150_v33  ;;  %v811_v59 = vpop.permute.xlu0 %810  ;;  %780 = vmatpush.bf16.msrb.mxu0 %v743_v54 }
  0xcc   : > { %v816_v60 = vsel %vm814_vm9, %v811_v59, %v813_v57  ;;  %v815_v61 = vsel %vm814_vm9, %v809_v56, %v811_v59  ;;  %v1894_v18 = vld.sshfl [vmem:[#allocation1] sm:$0xff pattern:$0x73625140]  ;;  %v1898_v19 = vld.sshfl [vmem:[#allocation1 + $0x10] sm:$0xff pattern:$0x73625140] }
  0xcd   : > { %v824_v63 = vand.u32 %v816_v60, %v5150_v33  ;;  %v821_v1 = vand.u32 %v815_v61, %v5150_v33  ;;  %864 = vmatpush.bf16.msrb.mxu3 %v827_v58  ;;  %1906 = vrot.lane.b32.xlu2 %v1898_v19, %s5043_s11  ;;  %v1896_v23 = vld.sshfl [vmem:[#allocation1 + $0x8] sm:$0xff pattern:$0x73625140]  ;;  %v1900_v24 = vld.sshfl [vmem:[#allocation1 + $0x18] sm:$0xff pattern:$0x73625140] }
  0xce   : > { %1902 = vrot.lane.b32.xlu0 %v1894_v18, %s5043_s11  ;;  %1982 = vst [vmem:[#allocation1] ss:$4 sm:$0xff] %v5131_v0  ;;  %v5295_v56 = vld [vmem:[%s6410_s2 + $0x50] sm:$0xff]  ;;  %vm2088_vm9 = vcmask 375808  }
  0xcf   : > { %4574 = vmatmul.msk.bf16.vlgmr.msra.gmra.mxu3 %vm254_vm2, %v4853_v62  ;;  %850 = vmatpush.bf16.msrb.mxu2 %v824_v63 }
  0xd0   : > { %836 = vmatpush.bf16.msrb.mxu1 %v821_v1  ;;  %1904 = vrot.lane.b32.xlu1 %v1896_v23, %s5043_s11 }
  0xd2   : > { %v1065_v21 = vpop.permute.xlu2 %1064 }
  0xd3   : > { %v893_v4 = vpop.permute.xlu0 %892  ;;  %v1079_v49 = vand.u32 %v1065_v21, %v5150_v33 }
  0xd4   : > { %4573 = vmatmul.msk.bf16.vlgmr.msra.gmra.mxu2 %vm254_vm2, %v4853_v62  ;;  %v895_v5 = vpop.permute.xlu1 %894 }
  0xd5   : > { %v899_v8 = vsel %vm898_vm10, %v893_v4, %v895_v5  ;;  %v900_v9 = vsel %vm898_vm10, %v895_v5, %v897_v2  ;;  %948 = vmatpush.bf16.msra.mxu2 %v911_v3  ;;  %v1985_v35 = vld.sshfl [vmem:[#allocation1 + $0x8] sm:$0xff pattern:$0x73625140]  ;;  %v1987_v36 = vld.sshfl [vmem:[#allocation1 + $0x10] sm:$0xff pattern:$0x73625140] }
  0xd6   : > { %v905_v11 = vand.u32 %v899_v8, %v5150_v33  ;;  %v908_v12 = vand.u32 %v900_v9, %v5150_v33  ;;  %1908 = vrot.lane.b32.xlu0 %v1900_v24, %s5043_s11  ;;  %v1983_v37 = vld.sshfl [vmem:[#allocation1] sm:$0xff pattern:$0x73625140]  ;;  %v1989_v38 = vld.sshfl [vmem:[#allocation1 + $0x18] sm:$0xff pattern:$0x73625140]  ;;  %1995 = vrot.lane.b32.xlu2 %v1987_v36, %s5044_s14  ;;  %v340_v8 = vpop.f32.mrf.mxu3 }
  0xd7   : > { %2071 = vst [vmem:[#allocation1] ss:$4 sm:$0xff] %v5131_v0  ;;  %vm2177_vm10 = vcmask 367616   ;;  %s4846_s11 = sshll.u32 %s6440_s19, 4  ;;  %s5076_s19 = smov 41  }
  0xd8   : > { %1993 = vrot.lane.b32.xlu1 %v1985_v35, %s5044_s14 }
  0xda   : > { %4565 = vmatmul.msk.bf16.vlgmr.msra.gmra.mxu0 %vm254_vm2, %v5222_v40  ;;  %4566 = vmatmul.msk.bf16.vlgmr.msra.gmra.mxu1 %vm254_vm2, %v5222_v40  ;;  %v1145_v42 = vpop.permute.xlu2 %1144 }
  0xdb   : > { %920 = vmatpush.bf16.msra.mxu0 %v905_v11  ;;  %934 = vmatpush.bf16.msra.mxu1 %v908_v12 }
  0xdc   : > { %v979_v15 = vpop.permute.xlu0 %978 }
  0xdd   : > { %v983_v16 = vsel %vm982_vm11, %v977_v13, %v979_v15  ;;  %v981_v17 = vpop.permute.xlu1 %980 }
  0xde   : > { %v989_v20 = vand.u32 %v983_v16, %v5150_v33  ;;  %v984_v22 = vsel %vm982_vm11, %v979_v15, %v981_v17  ;;  %v995_v29 = vand.u32 %v981_v17, %v5150_v33  ;;  %1991 = vrot.lane.b32.xlu0 %v1983_v37, %s5044_s14  ;;  %v2074_v47 = vld.sshfl [vmem:[#allocation1 + $0x8] sm:$0xff pattern:$0x73625140]  ;;  %v2072_v48 = vld.sshfl [vmem:[#allocation1] sm:$0xff pattern:$0x73625140]  ;;  %v342_v19 = vpop.f32.mrf.mxu3 }
  0xdf   : > { %4584 = vmatmul.msk.bf16.vlgmr.msrb.gmra.mxu3 %vm254_vm2, %v4854_v14  ;;  %v992_v28 = vand.u32 %v984_v22, %v5150_v33  ;;  %2082 = vrot.lane.b32.xlu2 %v2074_v47, %s5045_s17  ;;  %v2078_v53 = vld.sshfl [vmem:[#allocation1 + $0x18] sm:$0xff pattern:$0x73625140]  ;;  %v2076_v55 = vld.sshfl [vmem:[#allocation1 + $0x10] sm:$0xff pattern:$0x73625140] }
  0xe0   : > { %1004 = vmatpush.bf16.msra.mxu3 %v989_v20  ;;  %2080 = vrot.lane.b32.xlu1 %v2072_v48, %s5045_s17  ;;  %2160 = vst [vmem:[#allocation1] ss:$4 sm:$0xff] %v5131_v0  ;;  %vm2266_vm11 = vcmask 359424  }
  0xe2   : > { %v1233_v51 = vpop.permute.xlu2 %1232 }
  0xe3   : > { %v1247_v59 = vand.u32 %v1233_v51, %v5150_v33 }
  0xe4   : > { %4583 = vmatmul.msk.bf16.vlgmr.msrb.gmra.mxu2 %vm254_vm2, %v4854_v14 }
  0xe5   : > { %v1063_v25 = vpop.permute.xlu1 %1062 }
  0xe6   : > { %v1061_v26 = vpop.permute.xlu0 %1060  ;;  %v1068_v27 = vsel %vm1066_vm12, %v1063_v25, %v1065_v21  ;;  %1997 = vrot.lane.b32.xlu0 %v1989_v38, %s5044_s14  ;;  %s6071_s14 = scalar_lea.vmem %s6413_s5, %s4846_s11  ;;  %s5075_s11 = smov 40  }
  0xe7   : > { %v1067_v30 = vsel %vm1066_vm12, %v1061_v26, %v1063_v25  ;;  %v1076_v31 = vand.u32 %v1068_v27, %v5150_v33  ;;  %2086 = vrot.lane.b32.xlu2 %v2078_v53, %s5045_s17  ;;  %v2161_v61 = vld.sshfl [vmem:[#allocation1] sm:$0xff pattern:$0x73625140]  ;;  %v2163_v4 = vld.sshfl [vmem:[#allocation1 + $0x8] sm:$0xff pattern:$0x73625140] }
  0xe8   : > { %v1073_v32 = vand.u32 %v1067_v30, %v5150_v33  ;;  %2084 = vrot.lane.b32.xlu1 %v2076_v55, %s5045_s17  ;;  %v2165_v5 = vld.sshfl [vmem:[#allocation1 + $0x10] sm:$0xff pattern:$0x73625140]  ;;  %vm2751_vm12 = vcmask 130048   ;;  %s5077_s17 = smov 42  }
  0xe9   : > { %1102 = vmatpush.bf16.msrb.mxu3 %v1076_v31 }
  0xea   : > { %4575 = vmatmul.msk.bf16.vlgmr.msrb.gmra.mxu0 %vm254_vm2, %v4853_v62  ;;  %4582 = vmatmul.msk.bf16.vlgmr.msrb.gmra.mxu1 %vm254_vm2, %v4854_v14  ;;  %v1313_v57 = vpop.permute.xlu2 %1312  ;;  %v2167_v62 = vld.sshfl [vmem:[#allocation1 + $0x18] sm:$0xff pattern:$0x73625140] }
  0xeb   : > { %1032 = vmatpush.bf16.msrb.mxu1 %v995_v29  ;;  %1018 = vmatpush.bf16.msrb.mxu0 %v992_v28  ;;  %2249 = vst [vmem:[#allocation1] ss:$4 sm:$0xff] %v5131_v0  ;;  %v4858_v0 = vld [vmem:[%s6410_s2 + $0x58] sm:$0xff]  ;;  %v5332_v28 = vld [vmem:[%s6410_s2 + $0x68] sm:$0xff] }
  0xec   : > { %1088 = vmatpush.bf16.msrb.mxu2 %v1073_v32 }
  0xee   : > { %v1149_v39 = vpop.permute.xlu1 %1148  ;;  %2171 = vrot.lane.b32.xlu0 %v2163_v4, %s5046_s23 }
  0xef   : > { %4600 = vmatmul.msk.bf16.vlgmr.msra.gmra.mxu3 %vm254_vm2, %v5274_v34  ;;  %v1163_v40 = vand.u32 %v1149_v39, %v5150_v33  ;;  %v1147_v41 = vpop.permute.xlu0 %1146  ;;  %2169 = vrot.lane.b32.xlu2 %v2161_v61, %s5046_s23 }
  0xf0   : > { %v1152_v44 = vsel %vm1150_vm13, %v1147_v41, %v1149_v39  ;;  %v1151_v46 = vsel %vm1150_vm13, %v1145_v42, %v1147_v41  ;;  %2173 = vrot.lane.b32.xlu1 %v2165_v5, %s5046_s23  ;;  %v4859_v39 = vld [vmem:[%s6410_s2 + $0x60] sm:$0xff]  ;;  %vm2746_vm13 = vcmask 1042432  }
  0xf1   : > { %v1160_v45 = vand.u32 %v1152_v44, %v5150_v33  ;;  %1200 = vmatpush.bf16.msra.mxu3 %v1163_v40  ;;  %v1157_v50 = vand.u32 %v1151_v46, %v5150_v33 }
  0xf2   : > { %v2250_v11 = vld.sshfl [vmem:[#allocation1] sm:$0xff pattern:$0x73625140]  ;;  %v2252_v17 = vld.sshfl [vmem:[#allocation1 + $0x8] sm:$0xff pattern:$0x73625140] }
  0xf3   : > { %v1401_v13 = vpop.permute.xlu2 %1400  ;;  %v2254_v21 = vld.sshfl [vmem:[#allocation1 + $0x10] sm:$0xff pattern:$0x73625140]  ;;  %v2256_v27 = vld.sshfl [vmem:[#allocation1 + $0x18] sm:$0xff pattern:$0x73625140] }
  0xf4   : > { %4593 = vmatmul.msk.bf16.vlgmr.msra.gmra.mxu2 %vm254_vm2, %v4855_v43  ;;  %v1415_v46 = vand.u32 %v1401_v13, %v5150_v33 }
  0xf5   : > { %1186 = vmatpush.bf16.msra.mxu2 %v1160_v45 }
  0xf6   : > { %2258 = vrot.lane.b32.xlu0 %v2250_v11, %s5047_s26 }
  0xf7   : > { %v1229_v52 = vpop.permute.xlu0 %1228  ;;  %2175 = vrot.lane.b32.xlu2 %v2167_v62, %s5046_s23  ;;  %s5078_s23 = smov 43  }
  0xf8   : > { %v1231_v54 = vpop.permute.xlu1 %1230  ;;  %2260 = vrot.lane.b32.xlu1 %v2252_v17, %s5047_s26 }
  0xf9   : > { %v1235_v1 = vsel %vm1234_vm15, %v1229_v52, %v1231_v54  ;;  %v1236_v2 = vsel %vm1234_vm15, %v1231_v54, %v1233_v51 }
  0xfa   : > { %4591 = vmatmul.msk.bf16.vlgmr.msra.gmra.mxu0 %vm254_vm2, %v4855_v43  ;;  %4592 = vmatmul.msk.bf16.vlgmr.msra.gmra.mxu1 %vm254_vm2, %v4855_v43  ;;  %v1241_v6 = vand.u32 %v1235_v1, %v5150_v33  ;;  %v1244_v7 = vand.u32 %v1236_v2, %v5150_v33 }
  0xfb   : > { %1116 = vmatpush.bf16.msra.mxu0 %v1079_v49  ;;  %1172 = vmatpush.bf16.msra.mxu1 %v1157_v50 }
  0xfc   : > { %v1481_v41 = vpop.permute.xlu2 %1480 }
  0xfe   : > { %2262 = vrot.lane.b32.xlu0 %v2254_v21, %s5047_s26  ;;  %v4862_v21 = vld [vmem:[%s6410_s2 + $0x78] sm:$0xff] }
  0xff   : > { %4610 = vmatmul.msk.bf16.vlgmr.msrb.gmra.mxu3 %vm254_vm2, %v5295_v56 }
 0x100   : > { %v1315_v58 = vpop.permute.xlu0 %1314  ;;  %2264 = vrot.lane.b32.xlu1 %v2256_v27, %s5047_s26 }
 0x101   : > { %v1319_v60 = vsel %vm1318_vm14, %v1313_v57, %v1315_v58  ;;  %v1317_v3 = vpop.permute.xlu1 %1316 }
 0x102   : > { %v1325_v63 = vand.u32 %v1319_v60, %v5150_v33  ;;  %v1320_v20 = vsel %vm1318_vm14, %v1315_v58, %v1317_v3  ;;  %v1331_v25 = vand.u32 %v1317_v3, %v5150_v33  ;;  %vm2747_vm14 = vcmask 161796  }
 0x103   : > { %v1328_v24 = vand.u32 %v1320_v20, %v5150_v33  ;;  %vm6078_vm15 = vmor %vm2747_vm14, %vm2746_vm13  ;;  %vm2939_vm14 = vcmask 1042448  }
 0x104   : > { %4609 = vmatmul.msk.bf16.vlgmr.msrb.gmra.mxu2 %vm254_vm2, %v5295_v56  ;;  %1340 = vmatpush.bf16.msrb.mxu3 %v1325_v63 }
 0x105   : > { %1284 = vmatpush.bf16.msrb.mxu2 %v1247_v59 }
 0x107   : > { %v1569_v52 = vpop.permute.xlu2 %1568 }
 0x108   : > { %v1583_v1 = vand.u32 %v1569_v52, %v5150_v33 }
 0x10a   : > { %4601 = vmatmul.msk.bf16.vlgmr.msrb.gmra.mxu0 %vm254_vm2, %v5274_v34  ;;  %4602 = vmatmul.msk.bf16.vlgmr.msrb.gmra.mxu1 %vm254_vm2, %v5274_v34  ;;  %v1397_v9 = vpop.permute.xlu0 %1396  ;;  %v1399_v10 = vpop.permute.xlu1 %1398 }
 0x10b   : > { %1256 = vmatpush.bf16.msrb.mxu0 %v1241_v6  ;;  %1270 = vmatpush.bf16.msrb.mxu1 %v1244_v7  ;;  %v1403_v12 = vsel %vm1402_vm0, %v1397_v9, %v1399_v10  ;;  %v1404_v14 = vsel %vm1402_vm0, %v1399_v10, %v1401_v13 }
 0x10c   : > { %v1409_v15 = vand.u32 %v1403_v12, %v5150_v33  ;;  %v1412_v16 = vand.u32 %v1404_v14, %v5150_v33 }
 0x10f   : > { %4620 = vmatmul.msk.bf16.vlgmr.msra.gmra.mxu3 %vm254_vm2, %v4858_v0  ;;  %v1649_v3 = vpop.permute.xlu2 %1648 }
 0x110   : > { %1438 = vmatpush.bf16.msra.mxu3 %v1412_v16 }
 0x112   : > { %v1485_v29 = vpop.permute.xlu1 %1484 }
 0x113   : > { %v1483_v30 = vpop.permute.xlu0 %1482  ;;  %v1499_v32 = vand.u32 %v1485_v29, %v5150_v33 }
 0x114   : > { %4619 = vmatmul.msk.bf16.vlgmr.msra.gmra.mxu2 %vm254_vm2, %v4858_v0  ;;  %v308_v18 = vpop.f32.mrf.mxu2  ;;  %v1488_v35 = vsel %vm1486_vm1, %v1483_v30, %v1485_v29  ;;  %v1487_v42 = vsel %vm1486_vm1, %v1481_v41, %v1483_v30  ;;  %vm2805_vm1 = vcmask 518144  }
 0x115   : > { %1424 = vmatpush.bf16.msra.mxu2 %v1409_v15  ;;  %v1496_v40 = vand.u32 %v1488_v35, %v5150_v33  ;;  %v1493_v47 = vand.u32 %v1487_v42, %v5150_v33 }
 0x117   : > { %v280_v22 = vpop.f32.mrf.mxu0  ;;  %v294_v23 = vpop.f32.mrf.mxu1 }
 0x118   : > { %v341_v26 = vadd.f32 %v340_v8, %v280_v22  ;;  %v432_v31 = vpop.f32.mrf.mxu3  ;;  %v5371_v29 = vpop.permute.xlu2 %1736 }
 0x11a   : > { %4611 = vmatmul.msk.bf16.vlgmr.msra.gmra.mxu0 %vm254_vm2, %v5295_v56  ;;  %4618 = vmatmul.msk.bf16.vlgmr.msra.gmra.mxu1 %vm254_vm2, %v4858_v0  ;;  %v5352_v56 = vld [vmem:[%s6410_s2 + $0x70] sm:$0xff] }
 0x11b   : > { %1368 = vmatpush.bf16.msra.mxu1 %v1331_v25  ;;  %1354 = vmatpush.bf16.msra.mxu0 %v1328_v24  ;;  %v1565_v53 = vpop.permute.xlu0 %1564 }
 0x11c   : > { %v310_v34 = vpop.f32.mrf.mxu2 }
 0x11e   : > { %v1567_v55 = vpop.permute.xlu1 %1566 }
 0x11f   : > { %v282_v36 = vpop.f32.mrf.mxu0  ;;  %v296_v37 = vpop.f32.mrf.mxu1  ;;  %4636 = vmatmul.msk.bf16.vlgmr.msrb.gmra.mxu3 %vm254_vm2, %v5332_v28  ;;  %v1571_v7 = vsel %vm1570_vm3, %v1565_v53, %v1567_v55  ;;  %v1572_v8 = vsel %vm1570_vm3, %v1567_v55, %v1569_v52  ;;  %vm2799_vm3 = vcmask 1043456  }
 0x120   : > { %v343_v38 = vadd.f32 %v342_v19, %v282_v36  ;;  %1536 = vmatpush.bf16.msrb.mxu3 %v1499_v32  ;;  %v434_v43 = vpop.f32.mrf.mxu3  ;;  %v1577_v0 = vand.u32 %v1571_v7, %v5150_v33  ;;  %v1580_v12 = vand.u32 %v1572_v8, %v5150_v33 }
 0x124   : > { %4629 = vmatmul.msk.bf16.vlgmr.msrb.gmra.mxu2 %vm254_vm2, %v4859_v39  ;;  %v1651_v2 = vpop.permute.xlu0 %1650 }
 0x125   : > { %1522 = vmatpush.bf16.msrb.mxu2 %v1496_v40  ;;  %v1655_v5 = vsel %vm1654_vm4, %v1649_v3, %v1651_v2 }
 0x126   : > { %v1661_v6 = vand.u32 %v1655_v5, %v5150_v33 }
 0x127   : > { %v418_v44 = vpop.f32.mrf.mxu2  ;;  %v354_v45 = vpop.f32.mrf.mxu0 }
 0x128   : > { %v451_v48 = vadd.f32 %v418_v44, %v341_v26  ;;  %v355_v49 = vadd.f32 %v354_v45, %v294_v23  ;;  %v368_v50 = vpop.f32.mrf.mxu1  ;;  %v1653_v9 = vpop.permute.xlu1 %1652 }
 0x129   : > { %v369_v51 = vadd.f32 %v368_v50, %v308_v18  ;;  %v1656_v36 = vsel %vm1654_vm4, %v1651_v2, %v1653_v9  ;;  %v1667_v40 = vand.u32 %v1653_v9, %v5150_v33  ;;  %vm2863_vm4 = vcmask 7168  }
 0x12a   : > { %v452_v54 = vadd.f32 %v432_v31, %v355_v49  ;;  %4627 = vmatmul.msk.bf16.vlgmr.msrb.gmra.mxu0 %vm254_vm2, %v4859_v39  ;;  %4628 = vmatmul.msk.bf16.vlgmr.msrb.gmra.mxu1 %vm254_vm2, %v4859_v39  ;;  %v1664_v39 = vand.u32 %v1656_v36, %v5150_v33 }
 0x12b   : > { %1452 = vmatpush.bf16.msrb.mxu0 %v1415_v46  ;;  %1508 = vmatpush.bf16.msrb.mxu1 %v1493_v47 }
 0x12f   : > { %v420_v57 = vpop.f32.mrf.mxu2  ;;  %v356_v58 = vpop.f32.mrf.mxu0  ;;  %4646 = vmatmul.msk.bf16.vlgmr.msra.gmra.mxu3 %vm254_vm2, %v5352_v56 }
 0x130   : > { %v454_v59 = vadd.f32 %v420_v57, %v343_v38  ;;  %v357_v60 = vadd.f32 %v356_v58, %v296_v37  ;;  %v370_v61 = vpop.f32.mrf.mxu1  ;;  %v530_v62 = vpop.f32.mrf.mxu3  ;;  %1676 = vmatpush.bf16.msra.mxu3 %v1661_v6  ;;  %v4863_v57 = vld [vmem:[%s6410_s2 + $0x80] sm:$0xff] }
 0x131   : > { %v371_v63 = vadd.f32 %v370_v61, %v310_v34  ;;  %v1733_v19 = vpop.permute.xlu0 %1732  ;;  %v1735_v20 = vpop.permute.xlu1 %1734 }
 0x132   : > { %v455_v4 = vadd.f32 %v434_v43, %v357_v60  ;;  %v1739_v22 = vsel %vm1738_vm5, %v1733_v19, %v1735_v20  ;;  %v1740_v31 = vsel %vm1738_vm5, %v1735_v20, %v5371_v29  ;;  %v1817_v58 = vpop.permute.xlu2 %1816  ;;  %vm2870_vm5 = vcmask 1042440  }
 0x133   : > { %v1745_v30 = vand.u32 %v1739_v22, %v5150_v33  ;;  %v1748_v35 = vand.u32 %v1740_v31, %v5150_v33 }
 0x134   : > { %4645 = vmatmul.msk.bf16.vlgmr.msra.gmra.mxu2 %vm254_vm2, %v5352_v56 }
 0x135   : > { %1620 = vmatpush.bf16.msra.mxu2 %v1583_v1 }
 0x137   : > { %v516_v10 = vpop.f32.mrf.mxu2  ;;  %v446_v11 = vpop.f32.mrf.mxu0 }
 0x138   : > { %v536_v13 = vadd.f32 %v516_v10, %v452_v54  ;;  %v453_v14 = vadd.f32 %v446_v11, %v369_v51  ;;  %v502_v15 = vpop.f32.mrf.mxu1  ;;  %v532_v16 = vpop.f32.mrf.mxu3 }
 0x139   : > { %v535_v17 = vadd.f32 %v502_v15, %v451_v48  ;;  %v1819_v44 = vpop.permute.xlu0 %1818  ;;  %v5386_v48 = vld [vmem:[%s6410_s2 + $0x88] sm:$0xff]  ;;  %v1821_v49 = vpop.permute.xlu1 %1820 }
 0x13a   : > { %v537_v18 = vadd.f32 %v530_v62, %v453_v14  ;;  %4637 = vmatmul.msk.bf16.vlgmr.msra.gmra.mxu0 %vm254_vm2, %v5332_v28  ;;  %4638 = vmatmul.msk.bf16.vlgmr.msra.gmra.mxu1 %vm254_vm2, %v5332_v28  ;;  %v1835_v50 = vand.u32 %v1821_v49, %v5150_v33  ;;  %v1824_v51 = vsel %vm1822_vm6, %v1819_v44, %v1821_v49  ;;  %v1907_v9 = vpop.permute.xlu2 %1906  ;;  %v5406_v14 = vld [vmem:[%s6410_s2 + $0x90] sm:$0xff] }
 0x13b   : > { %1592 = vmatpush.bf16.msra.mxu0 %v1577_v0  ;;  %1606 = vmatpush.bf16.msra.mxu1 %v1580_v12  ;;  %v1832_v60 = vand.u32 %v1824_v51, %v5150_v33  ;;  %v1823_v1 = vsel %vm1822_vm6, %v1817_v58, %v1819_v44 }
 0x13c   : > { %v1829_v5 = vand.u32 %v1823_v1, %v5150_v33 }
 0x13f   : > { %v518_v23 = vpop.f32.mrf.mxu2  ;;  %v448_v24 = vpop.f32.mrf.mxu0  ;;  %4656 = vmatmul.msk.bf16.vlgmr.msrb.gmra.mxu3 %vm254_vm2, %v4862_v21 }
 0x140   : > { %v539_v25 = vadd.f32 %v518_v23, %v455_v4  ;;  %v456_v26 = vadd.f32 %v448_v24, %v371_v63  ;;  %v504_v27 = vpop.f32.mrf.mxu1  ;;  %1774 = vmatpush.bf16.msrb.mxu3 %v1748_v35  ;;  %v1751_v4 = vand.u32 %v5371_v29, %v5150_v33 }
 0x141   : > { %v538_v28 = vadd.f32 %v504_v27, %v454_v59  ;;  %v1903_v61 = vpop.permute.xlu0 %1902 }
 0x142   : > { %v540_v32 = vadd.f32 %v532_v16, %v456_v26  ;;  %v670_v34 = vpop.f32.mrf.mxu3  ;;  %v1905_v11 = vpop.permute.xlu1 %1904 }
 0x143   : > { %v1912_v31 = vsel %vm1910_vm7, %v1905_v11, %v1907_v9 }
 0x144   : > { %4655 = vmatmul.msk.bf16.vlgmr.msrb.gmra.mxu2 %vm254_vm2, %v4862_v21 }
 0x145   : > { %1760 = vmatpush.bf16.msrb.mxu2 %v1745_v30  ;;  %v1911_v30 = vsel %vm1910_vm7, %v1903_v61, %v1905_v11 }
 0x147   : > { %v614_v37 = vpop.f32.mrf.mxu2  ;;  %v586_v38 = vpop.f32.mrf.mxu0 }
 0x148   : > { %v621_v41 = vadd.f32 %v614_v37, %v537_v18  ;;  %v619_v42 = vadd.f32 %v586_v38, %v535_v17  ;;  %v600_v43 = vpop.f32.mrf.mxu1  ;;  %v1918_v37 = vand.u32 %v1911_v30, %v5150_v33  ;;  %v1921_v38 = vand.u32 %v1912_v31, %v5150_v33 }
 0x149   : > { %v620_v45 = vadd.f32 %v600_v43, %v536_v13  ;;  %v1909_v0 = vpop.permute.xlu0 %1908 }
 0x14a   : > { %v703_v46 = vadd.f32 %v670_v34, %v619_v42  ;;  %4647 = vmatmul.msk.bf16.vlgmr.msrb.gmra.mxu0 %vm254_vm2, %v5352_v56  ;;  %4654 = vmatmul.msk.bf16.vlgmr.msrb.gmra.mxu1 %vm254_vm2, %v4862_v21  ;;  %v672_v47 = vpop.f32.mrf.mxu3  ;;  %v1913_v15 = vsel %vm1910_vm7, %v1907_v9, %v1909_v0  ;;  %v1996_v21 = vpop.permute.xlu2 %1995  ;;  %v5048_v34 = vmov 15   ;;  %vm2871_vm7 = vcmask 1046532  }
 0x14b   : > { %1704 = vmatpush.bf16.msrb.mxu1 %v1667_v40  ;;  %1690 = vmatpush.bf16.msrb.mxu0 %v1664_v39  ;;  %v1924_v23 = vand.u32 %v1913_v15, %v5150_v33  ;;  %v1994_v24 = vpop.permute.xlu1 %1993 }
 0x14c   : > { %4946 = vset.pattern.permute.xlu1 %v5048_v34  ;;  %v2001_v1 = vsel %vm1999_vm8, %v1994_v24, %v1996_v21 }
 0x14f   : > { %v616_v52 = vpop.f32.mrf.mxu2  ;;  %v588_v53 = vpop.f32.mrf.mxu0  ;;  %4672 = vmatmul.msk.bf16.vlgmr.msra.gmra.mxu3 %vm254_vm2, %v5386_v48 }
 0x150   : > { %v624_v54 = vadd.f32 %v616_v52, %v540_v32  ;;  %v622_v55 = vadd.f32 %v588_v53, %v538_v28  ;;  %v602_v56 = vpop.f32.mrf.mxu1  ;;  %1872 = vmatpush.bf16.msra.mxu3 %v1835_v50  ;;  %v5421_v32 = vld [vmem:[%s6411_s3] sm:$0xff]  ;;  %v5049_v50 = vmov 0  }
 0x151   : > { %v623_v59 = vadd.f32 %v602_v56, %v539_v25  ;;  %v1992_v25 = vpop.permute.xlu0 %1991  ;;  %2410 = vperm.xlu1 %4946, %v5421_v32  }
 0x152   : > { %v706_v62 = vadd.f32 %v672_v47, %v622_v55  ;;  %v768_v63 = vpop.f32.mrf.mxu3  ;;  %v2000_v29 = vsel %vm1999_vm8, %v1992_v25, %v1994_v24  ;;  %v2083_v42 = vpop.permute.xlu2 %2082  ;;  %v4866_v47 = vld [vmem:[%s6410_s2 + $0x98] sm:$0xff]  ;;  %v4867_v25 = vld [vmem:[%s6410_s2 + $0xa0] sm:$0xff] }
 0x153   : > { %v2007_v28 = vand.u32 %v2000_v29, %v5150_v33  ;;  %v2081_v44 = vpop.permute.xlu1 %2080 }
 0x154   : > { %4665 = vmatmul.msk.bf16.vlgmr.msra.gmra.mxu2 %vm254_vm2, %v4863_v57  ;;  %v2089_v49 = vsel %vm2088_vm9, %v2081_v44, %v2083_v42 }
 0x155   : > { %1858 = vmatpush.bf16.msra.mxu2 %v1832_v60  ;;  %v2096_v58 = vand.u32 %v2089_v49, %v5150_v33  ;;  %v5053_v49 = vmov 13  }
 0x157   : > { %v754_v2 = vpop.f32.mrf.mxu2  ;;  %v684_v3 = vpop.f32.mrf.mxu0 }
 0x158   : > { %v787_v6 = vadd.f32 %v754_v2, %v703_v46  ;;  %v704_v7 = vadd.f32 %v684_v3, %v620_v45  ;;  %v698_v8 = vpop.f32.mrf.mxu1 }
 0x159   : > { %v705_v10 = vadd.f32 %v698_v8, %v621_v41  ;;  %4948 = vset.pattern.permute.xlu1 %v5049_v50  ;;  %v5449_v8 = vld [vmem:[%s6411_s3 + $0x8] sm:$0xff] }
 0x15a   : > { %v788_v12 = vadd.f32 %v768_v63, %v704_v7  ;;  %4663 = vmatmul.msk.bf16.vlgmr.msra.gmra.mxu0 %vm254_vm2, %v4863_v57  ;;  %4664 = vmatmul.msk.bf16.vlgmr.msra.gmra.mxu1 %vm254_vm2, %v4863_v57  ;;  %v770_v13 = vpop.f32.mrf.mxu3  ;;  %v2087_v55 = vpop.permute.xlu2 %2086  ;;  %v5050_v7 = vmov 1  }
 0x15b   : > { %1788 = vmatpush.bf16.msra.mxu0 %v1751_v4  ;;  %1844 = vmatpush.bf16.msra.mxu1 %v1829_v5  ;;  %v1998_v57 = vpop.permute.xlu0 %1997  ;;  %v2010_v5 = vand.u32 %v2001_v1, %v5150_v33 }
 0x15c   : > { %2544 = vperm.xlu1 %4948, %v5421_v32   ;;  %v2002_v2 = vsel %vm1999_vm8, %v1996_v21, %v1998_v57  ;;  %vm2872_vm8 = vmor %vm2871_vm7, %vm2870_vm5  ;;  %vm3006_vm5 = vcmask 1042456  }
 0x15f   : > { %v756_v16 = vpop.f32.mrf.mxu2  ;;  %v686_v17 = vpop.f32.mrf.mxu0  ;;  %4682 = vmatmul.msk.bf16.vlgmr.msrb.gmra.mxu3 %vm254_vm2, %v5406_v14 }
 0x160   : > { %v790_v18 = vadd.f32 %v756_v16, %v706_v62  ;;  %v707_v19 = vadd.f32 %v686_v17, %v623_v59  ;;  %v700_v20 = vpop.f32.mrf.mxu1  ;;  %2022 = vmatpush.bf16.msrb.mxu3 %v2007_v28  ;;  %v2085_v59 = vpop.permute.xlu1 %2084 }
 0x161   : > { %v708_v22 = vadd.f32 %v700_v20, %v624_v54  ;;  %v2090_v62 = vsel %vm2088_vm9, %v2083_v42, %v2085_v59 }
 0x162   : > { %v791_v26 = vadd.f32 %v770_v13, %v707_v19  ;;  %v866_v27 = vpop.f32.mrf.mxu3  ;;  %v2099_v63 = vand.u32 %v2090_v62, %v5150_v33  ;;  %v2170_v13 = vpop.permute.xlu2 %2169  ;;  %v5051_v19 = vmov 16   ;;  %v5054_v62 = vmov 3  }
 0x163   : > { %4944 = vset.pattern.permute.xlu2 %v5051_v19  ;;  %4945 = vset.pattern.permute.xlu0 %v5051_v19 }
 0x164   : > { %4681 = vmatmul.msk.bf16.vlgmr.msrb.gmra.mxu2 %vm254_vm2, %v5406_v14  ;;  %4951 = vset.pattern.permute.xlu1 %v5050_v7 }
 0x165   : > { %1961 = vmatpush.bf16.msrb.mxu2 %v1924_v23  ;;  %2562 = vperm.xlu1 %4951, %v5449_v8  }
 0x166   : > { %2395 = vperm.xlu2 %4944, %v5421_v32   ;;  %2400 = vperm.xlu0 %4945, %v5449_v8  }
 0x167   : > { %v852_v35 = vpop.f32.mrf.mxu2  ;;  %v782_v36 = vpop.f32.mrf.mxu0 }
 0x168   : > { %v872_v39 = vadd.f32 %v852_v35, %v788_v12  ;;  %v789_v40 = vadd.f32 %v782_v36, %v705_v10  ;;  %v838_v41 = vpop.f32.mrf.mxu1  ;;  %v2172_v12 = vpop.permute.xlu0 %2171  ;;  %v2091_v36 = vsel %vm2088_vm9, %v2085_v59, %v2087_v55  ;;  %vm2874_vm9 = vcmask 526336  }
 0x169   : > { %v871_v43 = vadd.f32 %v838_v41, %v787_v6  ;;  %v2013_v6 = vand.u32 %v2002_v2, %v5150_v33  ;;  %v2174_v17 = vpop.permute.xlu1 %2173  ;;  %v2102_v42 = vand.u32 %v2091_v36, %v5150_v33 }
 0x16a   : > { %v873_v45 = vadd.f32 %v866_v27, %v789_v40  ;;  %4673 = vmatmul.msk.bf16.vlgmr.msrb.gmra.mxu0 %vm254_vm2, %v5386_v48  ;;  %4674 = vmatmul.msk.bf16.vlgmr.msrb.gmra.mxu1 %vm254_vm2, %v5386_v48  ;;  %v868_v46 = vpop.f32.mrf.mxu3  ;;  %v2176_v28 = vpop.permute.xlu2 %2175 }
 0x16b   : > { %1933 = vmatpush.bf16.msrb.mxu0 %v1918_v37  ;;  %1947 = vmatpush.bf16.msrb.mxu1 %v1921_v38  ;;  %v2180_v31 = vsel %vm2177_vm10, %v2174_v17, %v2176_v28  ;;  %v2178_v37 = vsel %vm2177_vm10, %v2170_v13, %v2172_v12  ;;  %v5056_v13 = vmov 2  }
 0x16c   : > { %v2191_v35 = vand.u32 %v2180_v31, %v5150_v33 }
 0x16e   : > { %4947 = vset.pattern.permute.xlu2 %v5048_v34  ;;  %4950 = vset.pattern.permute.xlu0 %v5050_v7 }
 0x16f   : > { %v854_v51 = vpop.f32.mrf.mxu2  ;;  %v784_v52 = vpop.f32.mrf.mxu0  ;;  %4692 = vmatmul.msk.bf16.vlgmr.msra.gmra.mxu3 %vm254_vm2, %v4866_v47  ;;  %2414 = vperm.xlu2 %4947, %v5449_v8  }
 0x170   : > { %v875_v48 = vadd.f32 %v854_v51, %v791_v26  ;;  %v792_v53 = vadd.f32 %v784_v52, %v708_v22  ;;  %v840_v54 = vpop.f32.mrf.mxu1  ;;  %2125 = vmatpush.bf16.msra.mxu3 %v2099_v63  ;;  %v5052_v26 = vmov 14   ;;  %v2259_v38 = vpop.permute.xlu0 %2258  ;;  %2558 = vperm.xlu0 %4950, %v5421_v32   ;;  %v4869_v52 = vld [vmem:[%s6410_s2 + $0xb0] sm:$0xff] }
 0x171   : > { %v874_v56 = vadd.f32 %v840_v54, %v790_v18  ;;  %v5460_v18 = vld [vmem:[%s6410_s2 + $0xa8] sm:$0xff]  ;;  %4953 = vset.pattern.permute.xlu1 %v5052_v26 }
 0x172   : > { %v876_v60 = vadd.f32 %v868_v46, %v792_v53  ;;  %v1006_v61 = vpop.f32.mrf.mxu3  ;;  %2434 = vperm.xlu1 %4953, %v5449_v8  }
 0x174   : > { %4691 = vmatmul.msk.bf16.vlgmr.msra.gmra.mxu2 %vm254_vm2, %v4866_v47 }
 0x175   : > { %2111 = vmatpush.bf16.msra.mxu2 %v2096_v58 }
 0x177   : > { %v950_v3 = vpop.f32.mrf.mxu2  ;;  %v922_v4 = vpop.f32.mrf.mxu0  ;;  %4949 = vset.pattern.permute.xlu2 %v5049_v50 }
 0x178   : > { %v957_v9 = vadd.f32 %v950_v3, %v873_v45  ;;  %v955_v10 = vadd.f32 %v922_v4, %v871_v43  ;;  %v936_v11 = vpop.f32.mrf.mxu1  ;;  %v2185_v43 = vand.u32 %v2178_v37, %v5150_v33  ;;  %2548 = vperm.xlu2 %4949, %v5449_v8   ;;  %4955 = vset.pattern.permute.xlu0 %v5056_v13 }
 0x179   : > { %v956_v0 = vadd.f32 %v936_v11, %v872_v39  ;;  %v2261_v39 = vpop.permute.xlu1 %2260  ;;  %2582 = vperm.xlu0 %4955, %v5449_v8  }
 0x17a   : > { %v1039_v15 = vadd.f32 %v1006_v61, %v955_v10  ;;  %4683 = vmatmul.msk.bf16.vlgmr.msra.gmra.mxu0 %vm254_vm2, %v5406_v14  ;;  %4690 = vmatmul.msk.bf16.vlgmr.msra.gmra.mxu1 %vm254_vm2, %v4866_v47  ;;  %v5455_v16 = vpop.f32.mrf.mxu3  ;;  %v2179_v14 = vsel %vm2177_vm10, %v2172_v12, %v2174_v17  ;;  %v5055_v10 = vmov 12   ;;  %v5057_v17 = vmov 4  }
 0x17b   : > { %2036 = vmatpush.bf16.msra.mxu0 %v2010_v5  ;;  %2050 = vmatpush.bf16.msra.mxu1 %v2013_v6  ;;  %v2188_v29 = vand.u32 %v2179_v14, %v5150_v33  ;;  %vm2932_vm10 = vcmask 15360  }
 0x17c   : > { %4956 = vset.pattern.permute.xlu1 %v5053_v49 }
 0x17d   : > { %2450 = vperm.xlu1 %4956, %v5421_v32  }
 0x17f   : > { %v952_v20 = vpop.f32.mrf.mxu2  ;;  %v924_v21 = vpop.f32.mrf.mxu0  ;;  %4708 = vmatmul.msk.bf16.vlgmr.msrb.gmra.mxu3 %vm254_vm2, %v5460_v18 }
 0x180   : > { %v5467_v22 = vadd.f32 %v952_v20, %v876_v60  ;;  %v5469_v23 = vadd.f32 %v924_v21, %v874_v56  ;;  %v938_v24 = vpop.f32.mrf.mxu1  ;;  %2228 = vmatpush.bf16.msrb.mxu3 %v2191_v35  ;;  %v2267_v60 = vsel %vm2266_vm11, %v2259_v38, %v2261_v39  ;;  %4952 = vset.pattern.permute.xlu2 %v5052_v26  ;;  %v4871_v35 = vld [vmem:[%s6410_s2 + $0xc0] sm:$0xff] }
 0x181   : > { %v5475_v27 = vadd.f32 %v938_v24, %v875_v48  ;;  %v2263_v48 = vpop.permute.xlu0 %2262  ;;  %v2265_v53 = vpop.permute.xlu1 %2264  ;;  %v2274_v1 = vand.u32 %v2267_v60, %v5150_v33  ;;  %2430 = vperm.xlu2 %4952, %v5421_v32   ;;  %4960 = vset.pattern.permute.xlu0 %v5055_v10 }
 0x182   : > { %v1104_v30 = vpop.f32.mrf.mxu3  ;;  %v2269_v56 = vsel %vm2266_vm11, %v2263_v48, %v2265_v53  ;;  %v2268_v61 = vsel %vm2266_vm11, %v2261_v39, %v2263_v48  ;;  %2470 = vperm.xlu0 %4960, %v5421_v32   ;;  %v5061_v48 = vmov 11  }
 0x183   : > { %v2280_v58 = vand.u32 %v2269_v56, %v5150_v33  ;;  %v2277_v2 = vand.u32 %v2268_v61, %v5150_v33  ;;  %v4870_v33 = vld [vmem:[%s6410_s2 + $0xb8] sm:$0xff] }
 0x184   : > { %4701 = vmatmul.msk.bf16.vlgmr.msrb.gmra.mxu2 %vm254_vm2, %v4867_v25 }
 0x185   : > { %2214 = vmatpush.bf16.msrb.mxu2 %v2188_v29  ;;  %4958 = vset.pattern.permute.xlu1 %v5054_v62 }
 0x186   : > { %2598 = vperm.xlu1 %4958, %v5421_v32  }
 0x187   : > { %v1090_v40 = vpop.f32.mrf.mxu2  ;;  %v1020_v41 = vpop.f32.mrf.mxu0 }
 0x188   : > { %v1123_v44 = vadd.f32 %v1090_v40, %v1039_v15  ;;  %v1040_v45 = vadd.f32 %v1020_v41, %v956_v0  ;;  %v1034_v46 = vpop.f32.mrf.mxu1 }
 0x189   : > { %v1041_v47 = vadd.f32 %v1034_v46, %v957_v9  ;;  %4954 = vset.pattern.permute.xlu2 %v5056_v13 }
 0x18a   : > { %v1124_v51 = vadd.f32 %v1104_v30, %v1040_v45  ;;  %4699 = vmatmul.msk.bf16.vlgmr.msrb.gmra.mxu0 %vm254_vm2, %v4867_v25  ;;  %4700 = vmatmul.msk.bf16.vlgmr.msrb.gmra.mxu1 %vm254_vm2, %v4867_v25  ;;  %v5492_v34 = vpop.f32.mrf.mxu3  ;;  %v5058_v30 = vmov 5  }
 0x18b   : > { %2139 = vmatpush.bf16.msrb.mxu0 %v2102_v42  ;;  %2200 = vmatpush.bf16.msrb.mxu1 %v2185_v43  ;;  %v5059_v42 = vmov 10  }
 0x18c   : > { %2578 = vperm.xlu2 %4954, %v5421_v32   ;;  %4965 = vset.pattern.permute.xlu0 %v5061_v48 }
 0x18d   : > { %2494 = vperm.xlu0 %4965, %v5449_v8  }
 0x18e   : > { %4961 = vset.pattern.permute.xlu1 %v5055_v10 }
 0x18f   : > { %v5498_v54 = vpop.f32.mrf.mxu2  ;;  %v5500_v55 = vpop.f32.mrf.mxu0  ;;  %4718 = vmatmul.msk.bf16.vlgmr.msra.gmra.mxu3 %vm254_vm2, %v4869_v52  ;;  %2474 = vperm.xlu1 %4961, %v5449_v8  }
 0x190   : > { %v5505_v57 = vpop.f32.mrf.mxu1 }
 0x192   : > { %v1202_v59 = vpop.f32.mrf.mxu3 }
 0x194   : > { %4717 = vmatmul.msk.bf16.vlgmr.msra.gmra.mxu2 %vm254_vm2, %v4869_v52  ;;  %4957 = vset.pattern.permute.xlu2 %v5053_v49 }
 0x195   : > { %2317 = vmatpush.bf16.msra.mxu2 %v2280_v58  ;;  %2454 = vperm.xlu2 %4957, %v5449_v8  }
 0x197   : > { %v1188_v63 = vpop.f32.mrf.mxu2  ;;  %v1118_v50 = vpop.f32.mrf.mxu0  ;;  %4963 = vset.pattern.permute.xlu1 %v5057_v17 }
 0x198   : > { %v1208_v3 = vadd.f32 %v1188_v63, %v1124_v51  ;;  %v1125_v4 = vadd.f32 %v1118_v50, %v1041_v47  ;;  %v1174_v5 = vpop.f32.mrf.mxu1  ;;  %2622 = vperm.xlu1 %4963, %v5449_v8   ;;  %v5060_v51 = vmov 6   ;;  %v5062_v50 = vmov 9  }
 0x199   : > { %v1207_v6 = vadd.f32 %v1174_v5, %v1123_v44  ;;  %4970 = vset.pattern.permute.xlu0 %v5060_v51  ;;  %v5063_v5 = vmov 8  }
 0x19a   : > { %v1209_v7 = vadd.f32 %v1202_v59, %v1125_v4  ;;  %4709 = vmatmul.msk.bf16.vlgmr.msra.gmra.mxu0 %vm254_vm2, %v5460_v18  ;;  %4710 = vmatmul.msk.bf16.vlgmr.msra.gmra.mxu1 %vm254_vm2, %v5460_v18  ;;  %v5521_v9 = vpop.f32.mrf.mxu3 }
 0x19b   : > { %2289 = vmatpush.bf16.msra.mxu0 %v2274_v1  ;;  %2303 = vmatpush.bf16.msra.mxu1 %v2277_v2 }
 0x19c   : > { %2658 = vperm.xlu0 %4970, %v5421_v32  }
 0x19d   : > { %4959 = vset.pattern.permute.xlu2 %v5054_v62 }
 0x19e   : > { %2602 = vperm.xlu2 %4959, %v5449_v8  }
 0x19f   : > { %v5527_v11 = vpop.f32.mrf.mxu2  ;;  %v5529_v0 = vpop.f32.mrf.mxu0  ;;  %4728 = vmatmul.msk.bf16.vlgmr.msrb.gmra.mxu3 %vm254_vm2, %v4870_v33 }
 0x1a0   : > { %v5532_v12 = vpop.f32.mrf.mxu1  ;;  %4966 = vset.pattern.permute.xlu1 %v5058_v30 }
 0x1a1   : > { %2638 = vperm.xlu1 %4966, %v5421_v32  }
 0x1a2   : > { %v1342_v15 = vpop.f32.mrf.mxu3 }
 0x1a4   : > { %4727 = vmatmul.msk.bf16.vlgmr.msrb.gmra.mxu2 %vm254_vm2, %v4870_v33 }
 0x1a6   : > { %4962 = vset.pattern.permute.xlu2 %v5057_v17 }
 0x1a7   : > { %v1286_v18 = vpop.f32.mrf.mxu2  ;;  %v1258_v19 = vpop.f32.mrf.mxu0  ;;  %2618 = vperm.xlu2 %4962, %v5421_v32  }
 0x1a8   : > { %v1293_v14 = vadd.f32 %v1286_v18, %v1209_v7  ;;  %v1291_v20 = vadd.f32 %v1258_v19, %v1207_v6  ;;  %v1272_v21 = vpop.f32.mrf.mxu1  ;;  %v5064_v19 = vmov 7  }
 0x1a9   : > { %v1292_v24 = vadd.f32 %v1272_v21, %v1208_v3  ;;  %4968 = vset.pattern.permute.xlu1 %v5059_v42  ;;  %4975 = vset.pattern.permute.xlu0 %v5064_v19 }
 0x1aa   : > { %v1375_v25 = vadd.f32 %v1342_v15, %v1291_v20  ;;  %4719 = vmatmul.msk.bf16.vlgmr.msrb.gmra.mxu0 %vm254_vm2, %v4869_v52  ;;  %4726 = vmatmul.msk.bf16.vlgmr.msrb.gmra.mxu1 %vm254_vm2, %v4870_v33  ;;  %v5540_v26 = vpop.f32.mrf.mxu3 }
 0x1ab   : > { %2510 = vperm.xlu1 %4968, %v5421_v32   ;;  %2682 = vperm.xlu0 %4975, %v5449_v8  }
 0x1af   : > { %v5545_v29 = vpop.f32.mrf.mxu2  ;;  %v5547_v28 = vpop.f32.mrf.mxu0  ;;  %4964 = vset.pattern.permute.xlu2 %v5061_v48 }
 0x1b0   : > { %v5549_v31 = vpop.f32.mrf.mxu1  ;;  %2490 = vperm.xlu2 %4964, %v5421_v32  }
 0x1b2   : > { %v1440_v36 = vpop.f32.mrf.mxu3 }
 0x1b3   : > { %4971 = vset.pattern.permute.xlu1 %v5060_v51  ;;  %4978 = vset.pattern.permute.xlu0 %v5063_v5 }
 0x1b4   : > { %4737 = vmatmul.msk.bf16.vlgmr.msra.gmra.mxu2 %vm254_vm2, %v4871_v35  ;;  %2662 = vperm.xlu1 %4971, %v5449_v8  }
 0x1b7   : > { %v1426_v37 = vpop.f32.mrf.mxu2  ;;  %v1356_v38 = vpop.f32.mrf.mxu0 }
 0x1b8   : > { %v1459_v39 = vadd.f32 %v1426_v37, %v1375_v25  ;;  %v1376_v40 = vadd.f32 %v1356_v38, %v1292_v24  ;;  %v1370_v41 = vpop.f32.mrf.mxu1  ;;  %4967 = vset.pattern.permute.xlu2 %v5058_v30 }
 0x1b9   : > { %v1377_v43 = vadd.f32 %v1370_v41, %v1293_v14  ;;  %2642 = vperm.xlu2 %4967, %v5449_v8  }
 0x1ba   : > { %v1460_v44 = vadd.f32 %v1440_v36, %v1376_v40  ;;  %4735 = vmatmul.msk.bf16.vlgmr.msra.gmra.mxu0 %vm254_vm2, %v4871_v35  ;;  %4736 = vmatmul.msk.bf16.vlgmr.msra.gmra.mxu1 %vm254_vm2, %v4871_v35  ;;  %v5560_v45 = vpop.f32.mrf.mxu3 }
 0x1bc   : > { %4973 = vset.pattern.permute.xlu1 %v5062_v50 }
 0x1bd   : > { %2534 = vperm.xlu1 %4973, %v5449_v8  }
 0x1bf   : > { %v5563_v46 = vpop.f32.mrf.mxu2  ;;  %v5565_v47 = vpop.f32.mrf.mxu0 }
 0x1c0   : > { %v5567_v49 = vpop.f32.mrf.mxu1  ;;  %v5615_v48 = vpop.permute.xlu2 %2395 }
 0x1c1   : > { %4969 = vset.pattern.permute.xlu2 %v5059_v42  ;;  %6421 = vst [vmem:[#allocation2_spill] sm:$0xff] %v5615_v48 }
 0x1c2   : > { %v1538_v52 = vpop.f32.mrf.mxu3  ;;  %2514 = vperm.xlu2 %4969, %v5449_v8  }
 0x1c5   : > { %4976 = vset.pattern.permute.xlu1 %v5063_v5 }
 0x1c6   : > { %2698 = vperm.xlu1 %4976, %v5421_v32  }
 0x1c7   : > { %v1524_v53 = vpop.f32.mrf.mxu2  ;;  %v1454_v56 = vpop.f32.mrf.mxu0 }
 0x1c8   : > { %v1544_v58 = vadd.f32 %v1524_v53, %v1460_v44  ;;  %v1461_v59 = vadd.f32 %v1454_v56, %v1377_v43  ;;  %v1510_v60 = vpop.f32.mrf.mxu1 }
 0x1c9   : > { %v1543_v61 = vadd.f32 %v1510_v60, %v1459_v39  ;;  %v5627_v60 = vpop.permute.xlu2 %2414 }
 0x1ca   : > { %v1545_v62 = vadd.f32 %v1538_v52, %v1461_v59  ;;  %v5572_v63 = vpop.f32.mrf.mxu3  ;;  %4972 = vset.pattern.permute.xlu2 %v5062_v50  ;;  %v5625_v59 = vpop.permute.xlu1 %2410  ;;  %6423 = vst [vmem:[#allocation4_spill] sm:$0xff] %v5627_v60 }
 0x1cb   : > { %2530 = vperm.xlu2 %4972, %v5421_v32   ;;  %6422 = vst [vmem:[#allocation3_spill] sm:$0xff] %v5625_v59 }
 0x1cf   : > { %v5576_v1 = vpop.f32.mrf.mxu2  ;;  %v5578_v2 = vpop.f32.mrf.mxu0 }
 0x1d0   : > { %v5580_v3 = vpop.f32.mrf.mxu1 }
 0x1d2   : > { %v1678_v4 = vpop.f32.mrf.mxu3 }
 0x1d3   : > { %4974 = vset.pattern.permute.xlu2 %v5064_v19 }
 0x1d4   : > { %2678 = vperm.xlu2 %4974, %v5421_v32  }
 0x1d7   : > { %v1622_v6 = vpop.f32.mrf.mxu2  ;;  %v1594_v7 = vpop.f32.mrf.mxu0 }
 0x1d8   : > { %v1629_v33 = vadd.f32 %v1622_v6, %v1545_v62  ;;  %v1627_v10 = vadd.f32 %v1594_v7, %v1543_v61  ;;  %v1608_v13 = vpop.f32.mrf.mxu1 }
 0x1d9   : > { %v1628_v15 = vadd.f32 %v1608_v13, %v1544_v58 }
 0x1da   : > { %v1711_v17 = vadd.f32 %v1678_v4, %v1627_v10  ;;  %v5585_v18 = vpop.f32.mrf.mxu3  ;;  %v5631_v4 = vpop.permute.xlu1 %2544 }
 0x1db   : > { %6424 = vst [vmem:[#allocation5_spill] sm:$0xff] %v5631_v4  ;;  %v1042_v4 = vadd.f32 %v5455_v16, %v5469_v23 }
 0x1dc   : > { %4977 = vset.pattern.permute.xlu2 %v5063_v5  ;;  %v5633_v5 = vpop.permute.xlu2 %2548 }
 0x1dd   : > { %2702 = vperm.xlu2 %4977, %v5449_v8   ;;  %6425 = vst [vmem:[#allocation6_spill] sm:$0xff] %v5633_v5 }
 0x1df   : > { %v5588_v14 = vpop.f32.mrf.mxu2  ;;  %v5590_v20 = vpop.f32.mrf.mxu0 }
 0x1e0   : > { %v5592_v21 = vpop.f32.mrf.mxu1 }
 0x1e2   : > { %v5594_v24 = vpop.f32.mrf.mxu3  ;;  %v5643_v13 = vpop.permute.xlu1 %2562 }
 0x1e3   : > { %6427 = vst [vmem:[#allocation8_spill] sm:$0xff] %v5643_v13  ;;  %v1126_v13 = vadd.f32 %v5498_v54, %v1042_v4 }
 0x1e7   : > { %v1762_v25 = vpop.f32.mrf.mxu2  ;;  %v1692_v30 = vpop.f32.mrf.mxu0 }
 0x1e8   : > { %v5597_v35 = vadd.f32 %v1762_v25, %v1711_v17  ;;  %v5599_v36 = vadd.f32 %v1692_v30, %v1628_v15  ;;  %v1706_v37 = vpop.f32.mrf.mxu1  ;;  %v5647_v25 = vpop.permute.xlu2 %2430  ;;  %v1044_v30 = vadd.f32 %v5505_v57, %v5467_v22 }
 0x1e9   : > { %v1713_v38 = vadd.f32 %v1706_v37, %v1629_v33  ;;  %6428 = vst [vmem:[#allocation9_spill] sm:$0xff] %v5647_v25  ;;  %v1043_v37 = vadd.f32 %v5500_v55, %v5475_v27  ;;  %v1210_v55 = vadd.f32 %v5532_v12, %v1126_v13 }
 0x1ea   : > { %v5601_v39 = vpop.f32.mrf.mxu3  ;;  %v1128_v5 = vadd.f32 %v5529_v0, %v1044_v30  ;;  %v5656_v59 = vpop.permute.xlu1 %2434 }
 0x1eb   : > { %v1127_v48 = vadd.f32 %v5492_v34, %v1043_v37  ;;  %v1294_v54 = vadd.f32 %v5547_v28, %v1210_v55  ;;  %v1796_v37 = vadd.f32 %v5594_v24, %v5599_v36 }
 0x1ec   : > { %v1212_v22 = vadd.f32 %v5521_v9, %v1128_v5 }
 0x1ed   : > { %v1211_v27 = vadd.f32 %v5527_v11, %v1127_v48  ;;  %v1378_v11 = vadd.f32 %v5540_v26, %v1294_v54 }
 0x1ee   : > { %v1296_v16 = vadd.f32 %v5545_v29, %v1212_v22 }
 0x1ef   : > { %v5604_v40 = vpop.f32.mrf.mxu2  ;;  %v5606_v41 = vpop.f32.mrf.mxu0  ;;  %v1295_v34 = vadd.f32 %v5549_v31, %v1211_v27  ;;  %v1462_v28 = vadd.f32 %v5563_v46, %v1378_v11 }
 0x1f0   : > { %v5608_v42 = vpop.f32.mrf.mxu1  ;;  %v5670_v23 = vpop.permute.xlu2 %2578  ;;  %v1380_v0 = vadd.f32 %v5567_v49, %v1296_v16 }
 0x1f1   : > { %v1379_v4 = vadd.f32 %v5565_v47, %v1295_v34 }
 0x1f2   : > { %v5610_v43 = vpop.f32.mrf.mxu3  ;;  %v1464_v9 = vadd.f32 %v5578_v2, %v1380_v0  ;;  %v5680_v29 = vpop.permute.xlu1 %2450  ;;  %v1546_v2 = vadd.f32 %v5580_v3, %v1462_v28 }
 0x1f3   : > { %v1463_v31 = vadd.f32 %v5560_v45, %v1379_v4  ;;  %v5713_v4 = vpop.permute.xlu0 %2400 }
 0x1f4   : > { %v1548_v49 = vadd.f32 %v5572_v63, %v1464_v9  ;;  %v1630_v46 = vadd.f32 %v5590_v20, %v1546_v2 }
 0x1f5   : > { %v1547_v47 = vadd.f32 %v5576_v1, %v1463_v31 }
 0x1f6   : > { %v1632_v26 = vadd.f32 %v5588_v14, %v1548_v49  ;;  %v1714_v16 = vadd.f32 %v5585_v18, %v1630_v46 }
 0x1f7   : > { %v5613_v44 = vpop.f32.mrf.mxu2  ;;  %v1790_v51 = vpop.f32.mrf.mxu0  ;;  %v1631_v45 = vadd.f32 %v5592_v21, %v1547_v47 }
 0x1f8   : > { %v1846_v52 = vpop.f32.mrf.mxu1  ;;  %v1797_v13 = vadd.f32 %v1790_v51, %v1713_v38  ;;  %v5692_v22 = vpop.permute.xlu2 %2454  ;;  %v1880_v63 = vadd.f32 %v5613_v44, %v1796_v37  ;;  %v1716_v1 = vadd.f32 %v5608_v42, %v1632_v26  ;;  %v1798_v42 = vadd.f32 %v5604_v40, %v1714_v16 }
 0x1f9   : > { %v1879_v38 = vadd.f32 %v1846_v52, %v5597_v35  ;;  %v1715_v24 = vadd.f32 %v5606_v41, %v1631_v45 }
 0x1fa   : > { %v5617_v53 = vpop.f32.mrf.mxu3  ;;  %v1881_v51 = vadd.f32 %v5610_v43, %v1797_v13  ;;  %v5702_v34 = vpop.permute.xlu1 %2598 }
 0x1fb   : > { %v1799_v41 = vadd.f32 %v5601_v39, %v1715_v24 }
 0x1ff   : > { %v5619_v32 = vpop.f32.mrf.mxu2  ;;  %v5621_v56 = vpop.f32.mrf.mxu0 }
 0x200   : > { %v5623_v58 = vpop.f32.mrf.mxu1  ;;  %v1800_v35 = vadd.f32 %v5621_v56, %v1716_v1  ;;  %v1883_v56 = vadd.f32 %v5619_v32, %v1799_v41  ;;  %v5711_v0 = vpop.permute.xlu2 %2602 }
 0x202   : > { %v5629_v50 = vpop.f32.mrf.mxu3  ;;  %v5720_v2 = vpop.permute.xlu1 %2474 }
 0x207   : > { %v1963_v61 = vpop.f32.mrf.mxu2  ;;  %v1935_v8 = vpop.f32.mrf.mxu0 }
 0x208   : > { %v1949_v62 = vpop.f32.mrf.mxu1  ;;  %v1970_v3 = vadd.f32 %v1963_v61, %v1881_v51  ;;  %v1968_v27 = vadd.f32 %v1935_v8, %v1879_v38  ;;  %v1884_v61 = vadd.f32 %v5617_v53, %v1800_v35  ;;  %v5726_v35 = vpop.permute.xlu2 %2618 }
 0x209   : > { %v1969_v36 = vadd.f32 %v1949_v62, %v1880_v63  ;;  %v1882_v62 = vadd.f32 %v5623_v58, %v1798_v42 }
 0x20a   : > { %v5641_v10 = vpop.f32.mrf.mxu3  ;;  %v2057_v21 = vadd.f32 %v5629_v50, %v1968_v27 }
 0x20b   : > { %6426 = vst [vmem:[#allocation7_spill] sm:$0xff] %v5641_v10 }
 0x20f   : > { %v5635_v6 = vpop.f32.mrf.mxu2  ;;  %v5637_v7 = vpop.f32.mrf.mxu0 }
 0x210   : > { %v5639_v33 = vpop.f32.mrf.mxu1  ;;  %v1971_v40 = vadd.f32 %v5637_v7, %v1882_v62 }
 0x211   : > { %v1972_v39 = vadd.f32 %v5639_v33, %v1883_v56 }
 0x212   : > { %v2127_v60 = vpop.f32.mrf.mxu3  ;;  %v6429_v31 = vld [vmem:[#allocation7_spill] sm:$0xff] }
 0x213   : > { %v2060_v49 = vadd.f32 %v6429_v31, %v1971_v40  ;;  %v6430_v40 = vld [vmem:[#allocation2_spill] sm:$0xff] }
 0x217   : > { %v5645_v15 = vpop.f32.mrf.mxu2  ;;  %v2038_v17 = vpop.f32.mrf.mxu0 }
 0x218   : > { %v2052_v19 = vpop.f32.mrf.mxu1  ;;  %v2058_v20 = vadd.f32 %v2038_v17, %v1969_v36  ;;  %v2146_v8 = vadd.f32 %v5645_v15, %v2057_v21  ;;  %v1973_v17 = vadd.f32 %v5635_v6, %v1884_v61  ;;  %v5735_v61 = vpop.permute.xlu1 %2622 }
 0x219   : > { %v2059_v43 = vadd.f32 %v2052_v19, %v1970_v3 }
 0x21a   : > { %v5677_v5 = vpop.f32.mrf.mxu3  ;;  %v2147_v18 = vadd.f32 %v2127_v60, %v2058_v20 }
 0x21f   : > { %v5660_v10 = vpop.f32.mrf.mxu2  ;;  %v5662_v25 = vpop.f32.mrf.mxu0 }
 0x220   : > { %v5665_v57 = vpop.f32.mrf.mxu1  ;;  %v2061_v6 = vadd.f32 %v5662_v25, %v1972_v39 }
 0x221   : > { %v2062_v32 = vadd.f32 %v5665_v57, %v1973_v17 }
 0x222   : > { %v2230_v54 = vpop.f32.mrf.mxu3  ;;  %v2150_v57 = vadd.f32 %v5677_v5, %v2061_v6 }
 0x227   : > { %v2216_v48 = vpop.f32.mrf.mxu2  ;;  %v2141_v12 = vpop.f32.mrf.mxu0 }
 0x228   : > { %v2202_v30 = vpop.f32.mrf.mxu1  ;;  %v2148_v44 = vadd.f32 %v2141_v12, %v2059_v43  ;;  %v2236_v53 = vadd.f32 %v2216_v48, %v2147_v18  ;;  %v2149_v48 = vadd.f32 %v5660_v10, %v2060_v49 }
 0x229   : > { %v2235_v19 = vadd.f32 %v2202_v30, %v2146_v8 }
 0x22a   : > { %v2237_v50 = vadd.f32 %v2230_v54, %v2148_v44  ;;  %v2232_v47 = vpop.f32.mrf.mxu3 }
 0x22f   : > { %v2218_v14 = vpop.f32.mrf.mxu2  ;;  %v2143_v55 = vpop.f32.mrf.mxu0 }
 0x230   : > { %v2204_v52 = vpop.f32.mrf.mxu1  ;;  %v2151_v13 = vadd.f32 %v2143_v55, %v2062_v32  ;;  %v2239_v25 = vadd.f32 %v2218_v14, %v2150_v57  ;;  %v5724_v55 = vpop.permute.xlu0 %2558  ;;  %v6431_v32 = vld [vmem:[#allocation3_spill] sm:$0xff] }
 0x231   : > { %v2238_v46 = vadd.f32 %v2204_v52, %v2149_v48 }
 0x232   : > { %v2240_v38 = vadd.f32 %v2232_v47, %v2151_v13 }
 0x237   : > { %v2319_v9 = vpop.f32.mrf.mxu2  ;;  %v2291_v15 = vpop.f32.mrf.mxu0 }
 0x238   : > { %v2326_v11 = vadd.f32 %v2319_v9, %v2237_v50  ;;  %v2324_v58 = vadd.f32 %v2291_v15, %v2235_v19  ;;  %v2305_v60 = vpop.f32.mrf.mxu1  ;;  %v5745_v15 = vpop.permute.xlu0 %2582 }
 0x239   : > { %v2325_v12 = vadd.f32 %v2305_v60, %v2236_v53  ;;  %v5750_v60 = vpop.permute.xlu2 %2490 }
 0x23a   : > { %v4740_v30 = vclamps-f32 %v2326_v11, 100.0  ;;  %v4738_v28 = vclamps-f32 %v2324_v58, 100.0 }
 0x23b   : > { %v4739_v7 = vclamps-f32 %v2325_v12, 100.0 }
 0x23c   : > { %v2371_v33 = vmul.f32 0.08, %v4740_v30  ;;  %v2369_v37 = vmul.f32 0.08, %v4738_v28  ;;  %v2347_v45 = vmul.f32 -0.0032, %v4740_v30 }
 0x23d   : > { %v2370_v26 = vmul.f32 0.08, %v4739_v7  ;;  %v2345_v27 = vmul.f32 -0.0032, %v4738_v28  ;;  %v2346_v21 = vmul.f32 -0.0032, %v4739_v7 }
 0x23e   : > { %v2379_v51 = vmul.f32 1.442695, %v2371_v33  ;;  %v2375_v63 = vmul.f32 1.442695, %v2369_v37  ;;  %v2353_v20 = vmul.f32 %v4740_v30, %v2347_v45  ;;  %v6432_v33 = vld [vmem:[#allocation5_spill] sm:$0xff] }
 0x23f   : > { %v2321_v1 = vpop.f32.mrf.mxu2  ;;  %v2293_v3 = vpop.f32.mrf.mxu0  ;;  %v2377_v10 = vmul.f32 1.442695, %v2370_v26  ;;  %v2351_v54 = vmul.f32 %v4738_v28, %v2345_v27  ;;  %v2352_v50 = vmul.f32 %v4739_v7, %v2346_v21  ;;  %v6433_v37 = vld [vmem:[#allocation9_spill] sm:$0xff] }
 0x240   : > { %4979 = vpow2.f32 %v2379_v51  ;;  %v2329_v24 = vadd.f32 %v2321_v1, %v2240_v38  ;;  %v2307_v36 = vpop.f32.mrf.mxu1  ;;  %v2327_v5 = vadd.f32 %v2293_v3, %v2238_v46  ;;  %v2361_v18 = vmul.f32 1.442695, %v2353_v20 }
 0x241   : > { %4981 = vpow2.f32 %v2375_v63  ;;  %v2328_v43 = vadd.f32 %v2307_v36, %v2239_v25  ;;  %v2357_v19 = vmul.f32 1.442695, %v2351_v54  ;;  %v5753_v12 = vmul.f32 1.442695, %v2352_v50  ;;  %v5779_v63 = vpop.permute.xlu1 %2638  ;;  %v2471_v50 = vpop.permute.xlu0 %2470 }
 0x242   : > { %v4743_v16 = vclamps-f32 %v2329_v24, 100.0  ;;  %v5728_v14 = vclamps-f32 %v2327_v5, 100.0  ;;  %4983 = vpow2.f32 %v2377_v10  ;;  %v6434_v10 = vld [vmem:[#allocation4_spill] sm:$0xff] }
 0x243   : > { %v5730_v52 = vclamps-f32 %v2328_v43, 100.0 }
 0x244   : > { %v2374_v44 = vmul.f32 0.08, %v4743_v16  ;;  %v2372_v42 = vmul.f32 0.08, %v5728_v14  ;;  %v2350_v31 = vmul.f32 -0.0032, %v4743_v16 }
 0x245   : > { %v2373_v56 = vmul.f32 0.08, %v5730_v52  ;;  %v2348_v49 = vmul.f32 -0.0032, %v5728_v14  ;;  %v5772_v51 = vmul.f32 -0.0032, %v5730_v52 }
 0x246   : > { %v5733_v41 = vpop.eup %4979  ;;  %v2385_v8 = vmul.f32 1.442695, %v2374_v44  ;;  %v2381_v17 = vmul.f32 1.442695, %v2372_v42  ;;  %v2356_v20 = vmul.f32 %v4743_v16, %v2350_v31 }
 0x247   : > { %v5738_v62 = vpop.eup %4981  ;;  %4985 = vrcp.f32 %v5733_v41  ;;  %v2383_v53 = vmul.f32 1.442695, %v2373_v56  ;;  %v2405_v9 = vmul.f32 %v5733_v41, %v6430_v40 }
 0x248   : > { %4987 = vpow2.f32 %v2385_v8  ;;  %v2403_v39 = vmul.f32 %v5738_v62, %v6430_v40  ;;  %v5748_v58 = vpop.eup %4983  ;;  %v2354_v8 = vmul.f32 %v5728_v14, %v2348_v49 }
 0x249   : > { %4989 = vpow2.f32 %v2381_v17  ;;  %v2419_v6 = vadd.f32 %v6431_v32, %v2405_v9  ;;  %v2404_v13 = vmul.f32 %v5748_v58, %v6430_v40  ;;  %v5814_v9 = vpop.permute.xlu2 %2642 }
 0x24a   : > { %v2417_v11 = vadd.f32 %v6431_v32, %v2403_v39  ;;  %4991 = vpow2.f32 %v2361_v18 }
 0x24b   : > { %4993 = vpow2.f32 %v2357_v19  ;;  %v2425_v47 = vmul.f32 %v5733_v41, %v2419_v6  ;;  %v2418_v57 = vadd.f32 %v6431_v32, %v2404_v13 }
 0x24c   : > { %v2423_v30 = vmul.f32 %v5738_v62, %v2417_v11  ;;  %4995 = vpow2.f32 %v2383_v53 }
 0x24d   : > { %v5758_v28 = vpop.eup %4985  ;;  %4997 = vrcp.f32 %v5738_v62  ;;  %v2439_v25 = vadd.f32 %v6433_v37, %v2425_v47  ;;  %v2424_v1 = vmul.f32 %v5748_v58, %v2418_v57 }
 0x24e   : > { %v5762_v7 = vpop.eup %4987  ;;  %v2553_v48 = vmul.f32 %v5758_v28, %v6432_v33  ;;  %v2437_v26 = vadd.f32 %v6433_v37, %v2423_v30  ;;  %4999 = vrcp.f32 %v5748_v58 }
 0x24f   : > { %v5769_v38 = vpop.eup %4989  ;;  %v2408_v46 = vmul.f32 %v5762_v7, %v5713_v4  ;;  %v2445_v24 = vmul.f32 %v5733_v41, %v2439_v25  ;;  %v2438_v21 = vadd.f32 %v6433_v37, %v2424_v1  ;;  %v6435_v37 = vld [vmem:[#allocation6_spill] sm:$0xff] }
 0x250   : > { %v2567_v45 = vadd.f32 %v5724_v55, %v2553_v48  ;;  %5001 = vrcp.f32 %v5769_v38  ;;  %v2443_v3 = vmul.f32 %v5738_v62, %v2437_v26  ;;  %v5784_v27 = vpop.eup %4991  ;;  %v2406_v36 = vmul.f32 %v5769_v38, %v5713_v4 }
 0x251   : > { %5003 = vrcp.f32 %v5762_v7  ;;  %v2422_v5 = vadd.f32 %v6434_v10, %v2408_v46  ;;  %v5791_v43 = vpop.eup %4993  ;;  %v2459_v56 = vadd.f32 %v5680_v29, %v2445_v24  ;;  %v2444_v40 = vmul.f32 %v5748_v58, %v2438_v21 }
 0x252   : > { %v2573_v54 = vmul.f32 %v5758_v28, %v2567_v45  ;;  %v2457_v44 = vadd.f32 %v5680_v29, %v2443_v3  ;;  %v5796_v42 = vpop.eup %4995  ;;  %v2420_v18 = vadd.f32 %v6434_v10, %v2406_v36  ;;  %v6436_v3 = vld [vmem:[#allocation8_spill] sm:$0xff] }
 0x253   : > { %v5802_v17 = vmul.f32 %v5762_v7, %v2422_v5  ;;  %v5804_v19 = vpop.eup %4997  ;;  %5005 = vrcp.f32 %v5796_v42  ;;  %v2465_v32 = vmul.f32 %v5733_v41, %v2459_v56  ;;  %v2407_v11 = vmul.f32 %v5796_v42, %v5713_v4 }
 0x254   : > { %v2587_v16 = vadd.f32 %v5670_v23, %v2573_v54  ;;  %v2463_v39 = vmul.f32 %v5738_v62, %v2457_v44  ;;  %v5810_v53 = vpop.eup %4999  ;;  %v2551_v14 = vmul.f32 %v5804_v19, %v6432_v33  ;;  %v2426_v6 = vmul.f32 %v5769_v38, %v2420_v18  ;;  %v5846_v44 = vpop.permute.xlu1 %2510 }
 0x255   : > { %v2552_v30 = vmul.f32 %v5810_v53, %v6432_v33  ;;  %v2458_v49 = vadd.f32 %v5680_v29, %v2444_v40  ;;  %v2479_v4 = vadd.f32 %v2471_v50, %v2465_v32  ;;  %v2421_v25 = vadd.f32 %v6434_v10, %v2407_v11 }
 0x256   : > { %v5820_v13 = vpop.eup %5001  ;;  %v2593_v31 = vmul.f32 %v5758_v28, %v2587_v16  ;;  %v2477_v47 = vadd.f32 %v2471_v50, %v2463_v39  ;;  %v2565_v57 = vadd.f32 %v5724_v55, %v2551_v14  ;;  %5007 = vpow2.f32 %v5753_v12 }
 0x257   : > { %v5826_v48 = vpop.eup %5003  ;;  %v2554_v26 = vmul.f32 %v5820_v13, %v6435_v37  ;;  %v2566_v46 = vadd.f32 %v5724_v55, %v2552_v30  ;;  %v2464_v29 = vmul.f32 %v5748_v58, %v2458_v49  ;;  %v2485_v5 = vmul.f32 %v5733_v41, %v2479_v4 }
 0x258   : > { %v2607_v45 = vadd.f32 %v5702_v34, %v2593_v31  ;;  %v2556_v33 = vmul.f32 %v5826_v48, %v6435_v37  ;;  %v2571_v1 = vmul.f32 %v5804_v19, %v2565_v57  ;;  %v2483_v36 = vmul.f32 %v5738_v62, %v2477_v47 }
 0x259   : > { %v2568_v24 = vadd.f32 %v6436_v3, %v2554_v26  ;;  %v5841_v54 = vpop.eup %5005  ;;  %v2572_v10 = vmul.f32 %v5810_v53, %v2566_v46  ;;  %v2478_v56 = vadd.f32 %v2471_v50, %v2464_v29  ;;  %v5855_v39 = vmul.f32 %v5730_v52, %v5772_v51 }
 0x25a   : > { %v2613_v55 = vmul.f32 %v5758_v28, %v2607_v45  ;;  %v2570_v21 = vadd.f32 %v6436_v3, %v2556_v33  ;;  %v2585_v18 = vadd.f32 %v5670_v23, %v2571_v1  ;;  %v2555_v16 = vmul.f32 %v5841_v54, %v6435_v37  ;;  %v5873_v37 = vpop.permute.xlu2 %2514 }
 0x25b   : > { %v2574_v40 = vmul.f32 %v5820_v13, %v2568_v24  ;;  %v2586_v14 = vadd.f32 %v5670_v23, %v2572_v10  ;;  %v2484_v11 = vmul.f32 %v5748_v58, %v2478_v56  ;;  %v5860_v50 = vmul.f32 1.442695, %v2356_v20 }
 0x25c   : > { %v2576_v32 = vmul.f32 %v5826_v48, %v2570_v21  ;;  %v2591_v12 = vmul.f32 %v5804_v19, %v2585_v18  ;;  %v2569_v30 = vadd.f32 %v6436_v3, %v2555_v16  ;;  %v5865_v49 = vmul.f32 1.442695, %v2354_v8  ;;  %v5880_v33 = vpop.eup %5007  ;;  %v5897_v16 = vpop.permute.xlu1 %2662 }
 0x25d   : > { %v2588_v31 = vadd.f32 %v5745_v15, %v2574_v40  ;;  %v2592_v47 = vmul.f32 %v5810_v53, %v2586_v14  ;;  %v2627_v52 = vadd.f32 %v5726_v35, %v2613_v55  ;;  %v2427_v26 = vmul.f32 %v5796_v42, %v2421_v25 }
 0x25e   : > { %v2590_v23 = vadd.f32 %v5745_v15, %v2576_v32  ;;  %v2605_v51 = vadd.f32 %v5702_v34, %v2591_v12  ;;  %v2575_v57 = vmul.f32 %v5841_v54, %v2569_v30  ;;  %v2497_v46 = vadd.f32 %v5750_v60, %v2483_v36 }
 0x25f   : > { %v2594_v20 = vmul.f32 %v5820_v13, %v2588_v31  ;;  %v2606_v4 = vadd.f32 %v5702_v34, %v2592_v47  ;;  %v2440_v45 = vadd.f32 %v5656_v59, %v2426_v6  ;;  %v2441_v24 = vadd.f32 %v5656_v59, %v2427_v26  ;;  %v2495_v26 = vpop.permute.xlu0 %2494 }
 0x260   : > { %v2596_v8 = vmul.f32 %v5826_v48, %v2590_v23  ;;  %v2611_v29 = vmul.f32 %v5804_v19, %v2605_v51  ;;  %v2589_v1 = vadd.f32 %v5745_v15, %v2575_v57  ;;  %v2442_v10 = vadd.f32 %v5656_v59, %v5802_v17 }
 0x261   : > { %v2608_v3 = vadd.f32 %v5711_v0, %v2594_v20  ;;  %v2612_v25 = vmul.f32 %v5810_v53, %v2606_v4  ;;  %v2446_v36 = vmul.f32 %v5769_v38, %v2440_v45  ;;  %v2633_v6 = vmul.f32 %v5758_v28, %v2627_v52 }
 0x262   : > { %v2610_v34 = vadd.f32 %v5711_v0, %v2596_v8  ;;  %v2595_v55 = vmul.f32 %v5841_v54, %v2589_v1  ;;  %v2447_v15 = vmul.f32 %v5796_v42, %v2441_v24  ;;  %v2625_v56 = vadd.f32 %v5726_v35, %v2611_v29  ;;  %v2531_v29 = vpop.permute.xlu2 %2530 }
 0x263   : > { %v2614_v21 = vmul.f32 %v5820_v13, %v2608_v3  ;;  %v2448_v40 = vmul.f32 %v5762_v7, %v2442_v10  ;;  %v2460_v59 = vadd.f32 %v5692_v22, %v2446_v36  ;;  %v2498_v32 = vadd.f32 %v5750_v60, %v2484_v11 }
 0x264   : > { %v2616_v18 = vmul.f32 %v5826_v48, %v2610_v34  ;;  %v2609_v17 = vadd.f32 %v5711_v0, %v2595_v55  ;;  %v2461_v12 = vadd.f32 %v5692_v22, %v2447_v15  ;;  %v2626_v30 = vadd.f32 %v5726_v35, %v2612_v25 }
 0x265   : > { %v2628_v14 = vadd.f32 %v5735_v61, %v2614_v21  ;;  %v2462_v47 = vadd.f32 %v5692_v22, %v2448_v40  ;;  %v2466_v52 = vmul.f32 %v5769_v38, %v2460_v59  ;;  %v2499_v0 = vadd.f32 %v5750_v60, %v2485_v5 }
 0x266   : > { %v2630_v31 = vadd.f32 %v5735_v61, %v2616_v18  ;;  %v2615_v23 = vmul.f32 %v5841_v54, %v2609_v17  ;;  %v2467_v57 = vmul.f32 %v5796_v42, %v2461_v12  ;;  %v2631_v11 = vmul.f32 %v5804_v19, %v2625_v56 }
 0x267   : > { %v2634_v51 = vmul.f32 %v5820_v13, %v2628_v14  ;;  %v2647_v20 = vadd.f32 %v5779_v63, %v2633_v6  ;;  %v2468_v35 = vmul.f32 %v5762_v7, %v2462_v47  ;;  %v2480_v4 = vadd.f32 %v5720_v2, %v2466_v52  ;;  %v2535_v14 = vpop.permute.xlu1 %2534 }
 0x268   : > { %v2629_v22 = vadd.f32 %v5735_v61, %v2615_v23  ;;  %v2636_v8 = vmul.f32 %v5826_v48, %v2630_v31  ;;  %v2481_v45 = vadd.f32 %v5720_v2, %v2467_v57  ;;  %v2503_v60 = vmul.f32 %v5738_v62, %v2497_v46 }
 0x269   : > { %v2632_v5 = vmul.f32 %v5810_v53, %v2626_v30  ;;  %v2482_v1 = vadd.f32 %v5720_v2, %v2468_v35  ;;  %v2486_v3 = vmul.f32 %v5769_v38, %v2480_v4  ;;  %v2504_v24 = vmul.f32 %v5748_v58, %v2498_v32  ;;  %v2659_v35 = vpop.permute.xlu0 %2658 }
 0x26a   : > { %v2635_v25 = vmul.f32 %v5841_v54, %v2629_v22  ;;  %v2648_v34 = vadd.f32 %v5814_v9, %v2634_v51  ;;  %v2487_v61 = vmul.f32 %v5796_v42, %v2481_v45  ;;  %v2505_v10 = vmul.f32 %v5733_v41, %v2499_v0 }
 0x26b   : > { %v2645_v36 = vadd.f32 %v5779_v63, %v2631_v11  ;;  %v2488_v46 = vmul.f32 %v5762_v7, %v2482_v1  ;;  %v2500_v6 = vadd.f32 %v2495_v26, %v2486_v3  ;;  %v2517_v55 = vadd.f32 %v5846_v44, %v2503_v60 }
 0x26c   : > { %v2649_v2 = vadd.f32 %v5814_v9, %v2635_v25  ;;  %v2650_v21 = vadd.f32 %v5814_v9, %v2636_v8  ;;  %v2501_v15 = vadd.f32 %v2495_v26, %v2487_v61  ;;  %v2518_v56 = vadd.f32 %v5846_v44, %v2504_v24 }
 0x26d   : > { %v2646_v18 = vadd.f32 %v5779_v63, %v2632_v5  ;;  %v2502_v40 = vadd.f32 %v2495_v26, %v2488_v46  ;;  %v2506_v59 = vmul.f32 %v5769_v38, %v2500_v6  ;;  %v2519_v17 = vadd.f32 %v5846_v44, %v2505_v10  ;;  %v2679_v5 = vpop.permute.xlu2 %2678 }
 0x26e   : > { %v2654_v32 = vmul.f32 %v5820_v13, %v2648_v34  ;;  %v2507_v12 = vmul.f32 %v5796_v42, %v2501_v15  ;;  %v2523_v30 = vmul.f32 %v5738_v62, %v2517_v55  ;;  %v2524_v31 = vmul.f32 %v5748_v58, %v2518_v56 }
 0x26f   : > { %v2508_v9 = vmul.f32 %v5762_v7, %v2502_v40  ;;  %v2525_v47 = vmul.f32 %v5733_v41, %v2519_v17  ;;  %v2520_v63 = vadd.f32 %v5873_v37, %v2506_v59  ;;  %v2651_v52 = vmul.f32 %v5804_v19, %v2645_v36  ;;  %v2699_v40 = vpop.permute.xlu1 %2698 }
 0x270   : > { %v2655_v23 = vmul.f32 %v5841_v54, %v2649_v2  ;;  %v2656_v44 = vmul.f32 %v5826_v48, %v2650_v21  ;;  %v2537_v51 = vadd.f32 %v2531_v29, %v2523_v30  ;;  %v2521_v0 = vadd.f32 %v5873_v37, %v2507_v12 }
 0x271   : > { %v2538_v57 = vadd.f32 %v2531_v29, %v2524_v31  ;;  %v2522_v11 = vadd.f32 %v5873_v37, %v2508_v9  ;;  %v2526_v26 = vmul.f32 %v5769_v38, %v2520_v63  ;;  %v2652_v4 = vmul.f32 %v5810_v53, %v2646_v18  ;;  %v2683_v30 = vpop.permute.xlu0 %2682 }
 0x272   : > { %v2539_v22 = vadd.f32 %v2531_v29, %v2525_v47  ;;  %v2527_v8 = vmul.f32 %v5796_v42, %v2521_v0  ;;  %v2653_v45 = vmul.f32 %v5758_v28, %v2647_v20  ;;  %v2665_v60 = vadd.f32 %v2659_v35, %v2651_v52 }
 0x273   : > { %v2668_v1 = vadd.f32 %v5897_v16, %v2654_v32  ;;  %v2528_v3 = vmul.f32 %v5762_v7, %v2522_v11  ;;  %v2540_v24 = vadd.f32 %v2535_v14, %v2526_v26  ;;  %v2666_v25 = vadd.f32 %v2659_v35, %v2652_v4 }
 0x274   : > { %v2669_v37 = vadd.f32 %v5897_v16, %v2655_v23  ;;  %v2541_v34 = vadd.f32 %v2535_v14, %v2527_v8  ;;  %v2667_v61 = vadd.f32 %v2659_v35, %v2653_v45  ;;  %v2671_v10 = vmul.f32 %v5804_v19, %v2665_v60 }
 0x275   : > { %v2542_v36 = vadd.f32 %v2535_v14, %v2528_v3  ;;  %v2672_v29 = vmul.f32 %v5810_v53, %v2666_v25  ;;  %v2691_v46 = vmul.f32 %v5738_v62, %v2537_v51  ;;  %v2692_v20 = vmul.f32 %v5748_v58, %v2538_v57 }
 0x276   : > { %v2673_v6 = vmul.f32 %v5758_v28, %v2667_v61  ;;  %v2685_v55 = vadd.f32 %v2679_v5, %v2671_v10  ;;  %v2693_v2 = vmul.f32 %v5733_v41, %v2539_v22  ;;  %v2694_v21 = vmul.f32 %v5769_v38, %v2540_v24  ;;  %v2750_v10 = vld [vmem:[%s6412_s4] sm:$0x3] }
 0x277   : > { %v2365_v15 = vmul.f32 1.442695, %v5855_v39  ;;  %v2670_v56 = vadd.f32 %v5897_v16, %v2656_v44  ;;  %v2686_v18 = vadd.f32 %v2679_v5, %v2672_v29  ;;  %v2695_v59 = vmul.f32 %v5796_v42, %v2541_v34  ;;  %v2332_v44 = vld [vmem:[%s6409_s1] sm:$0x7]  ;;  %v4751_v29 = vld [vmem:[%s6412_s4 + $0x4] sm:$0x3] }
 0x278   : > { %v2687_v17 = vadd.f32 %v2679_v5, %v2673_v6  ;;  %v2711_v62 = vmul.f32 %v5804_v19, %v2685_v55  ;;  %v2705_v14 = vadd.f32 %v2699_v40, %v2691_v46  ;;  %v2696_v58 = vmul.f32 %v5762_v7, %v2542_v36  ;;  %v4747_v36 = vld [vmem:[%s6412_s4 + $0x2] sm:$0x3]  ;;  %v4755_v46 = vld [vmem:[%s6412_s4 + $0x6] sm:$0x3]  ;;  %v4763_v6 = vld [vmem:[%s6412_s4 + $0xa] sm:$0x3] }
 0x279   : > { %5009 = vpow2.f32 %v5865_v49  ;;  %v2712_v41 = vmul.f32 %v5810_v53, %v2686_v18  ;;  %v2706_v32 = vadd.f32 %v2699_v40, %v2692_v20  ;;  %v2674_v38 = vmul.f32 %v5820_v13, %v2668_v1  ;;  %v2703_v49 = vpop.permute.xlu2 %2702  ;;  %v4759_v20 = vld [vmem:[%s6412_s4 + $0x8] sm:$0x3]  ;;  %v4767_v55 = vld [vmem:[%s6412_s4 + $0xc] sm:$0x3]  ;;  %v4779_v18 = vld [vmem:[%s6412_s4 + $0x12] sm:$0x3] }
 0x27a   : > { %v2713_v39 = vmul.f32 %v5758_v28, %v2687_v17  ;;  %v2707_v16 = vadd.f32 %v2699_v40, %v2693_v2  ;;  %v2717_v12 = vadd.f32 %v2711_v62, %v2705_v14  ;;  %v2675_v42 = vmul.f32 %v5841_v54, %v2669_v37  ;;  %v4771_v2 = vld [vmem:[%s6412_s4 + $0xe] sm:$0x3]  ;;  %v4783_v40 = vld [vmem:[%s6412_s4 + $0x14] sm:$0x3]  ;;  %v4787_v14 = vld [vmem:[%s6412_s4 + $0x16] sm:$0x3] }
 0x27b   : > { %5011 = vpow2.f32 %v2365_v15  ;;  %v2718_v31 = vadd.f32 %v2712_v41, %v2706_v32  ;;  %v2676_v19 = vmul.f32 %v5826_v48, %v2670_v56  ;;  %v2688_v9 = vadd.f32 %v2683_v30, %v2674_v38  ;;  %v4775_v56 = vld [vmem:[%s6412_s4 + $0x10] sm:$0x3] }
 0x27c   : > { %5013 = vpow2.f32 %v5860_v50  ;;  %v2719_v7 = vadd.f32 %v2713_v39, %v2707_v16  ;;  %v2723_v53 = vmul.f32 %v5791_v43, %v2717_v12  ;;  %v2689_v47 = vadd.f32 %v2683_v30, %v2675_v42 }
 0x27d   : > { %v2724_v63 = vmul.f32 %v5880_v33, %v2718_v31  ;;  %v2708_v28 = vadd.f32 %v2703_v49, %v2694_v21  ;;  %v2690_v52 = vadd.f32 %v2683_v30, %v2676_v19  ;;  %v2714_v23 = vmul.f32 %v5820_v13, %v2688_v9 }
 0x27e   : > { %v2725_v51 = vmul.f32 %v5784_v27, %v2719_v7  ;;  %v2709_v0 = vadd.f32 %v2703_v49, %v2695_v59  ;;  %v2715_v50 = vmul.f32 %v5841_v54, %v2689_v47  ;;  %v2730_v11 = vperm.slane %v2332_v44, 0 }
 0x27f   : > { %v5010_v57 = vpop.eup %5009  ;;  %v2710_v43 = vadd.f32 %v2703_v49, %v2696_v58  ;;  %v2716_v26 = vmul.f32 %v5826_v48, %v2690_v52  ;;  %v2720_v35 = vadd.f32 %v2714_v23, %v2708_v28  ;;  %v2731_v33 = vperm.slane %v2332_v44, 1  ;;  %v4795_v49 = vld [vmem:[%s6412_s4 + $0x1a] sm:$0x3] }
 0x280   : > { %v2721_v4 = vadd.f32 %v2715_v50, %v2709_v0  ;;  %v2732_v8 = vperm.slane %v2332_v44, 2  ;;  %v2736_v1 = vmul.f32 %v2730_v11, %v2723_v53  ;;  %v5065_v15 = vmov 0.0   ;;  %v4791_v53 = vld [vmem:[%s6412_s4 + $0x18] sm:$0x3] }
 0x281   : > { %v5012_v22 = vpop.eup %5011  ;;  %v2722_v13 = vadd.f32 %v2716_v26, %v2710_v43  ;;  %v2726_v45 = vmul.f32 %v5010_v57, %v2720_v35  ;;  %v2737_v24 = vmul.f32 %v2731_v33, %v2724_v63  ;;  %2745 = vst [vmem:[%s6071_s14] sm:$0x77] %v5065_v15  ;;  %v4799_v26 = vld [vmem:[%s6412_s4 + $0x1c] sm:$0x3] }
 0x282   : > { %v5014_v60 = vpop.eup %5013  ;;  %v2727_v5 = vmul.f32 %v5012_v22, %v2721_v4  ;;  %v2738_v54 = vmul.f32 %v2732_v8, %v2725_v51  ;;  %2749 = vst.msk [vmem:[%s6071_s14 + $0x8] sm:$0x77] %vm6078_vm15, %v5065_v15 }
 0x283   : > { %v2728_v3 = vmul.f32 %v5014_v60, %v2722_v13  ;;  %v2739_v27 = vmul.f32 %v2730_v11, %v2726_v45 }
 0x284   : > { %v2740_v25 = vmul.f32 %v2731_v33, %v2727_v5 }
 0x285   : > { %v2741_v37 = vmul.f32 %v2732_v8, %v2728_v3  ;;  %v5985_v34 = vpack.c.bf16 %v2739_v27, %v2736_v1  ;;  %v4803_v3 = vld [vmem:[%s6412_s4 + $0x1e] sm:$0x3] }
 0x286   : > { %v5987_v61 = vpack.c.bf16 %v2740_v25, %v2737_v24 }
 0x287   : > { %v5989_v48 = vpack.c.bf16 %v2741_v37, %v2738_v54  ;;  %2762 = vmatpush.bf16.msra.mxu3 %v5985_v34  ;;  %2819 = vmatpush.bf16.msrb.mxu2 %v5985_v34 }
 0x288   : > { %2775 = vmatpush.bf16.msrb.mxu0 %v5987_v61  ;;  %v2794_v32 = vld [vmem:[%s6071_s14] sm:$0x77] }
 0x289   : > { %2788 = vmatpush.bf16.msrb.mxu1 %v5989_v48  ;;  %v2795_v59 = vld [vmem:[%s6071_s14 + $0x8] sm:$0x7] }
 0x28a   : > { %4744 = vmatmul.msk.bf16.vlgmr.msra.gmra.mxu3 %vm2751_vm12, %v2750_v10  ;;  %4748 = vmatmul.msk.bf16.vlgmr.msrb.gmra.mxu2 %vm2751_vm12, %v4747_v36 }
 0x28b   : > { %2832 = vmatpush.bf16.msrb.mxu3 %v5987_v61  ;;  %2901 = vmatpush.bf16.msra.mxu2 %v5987_v61 }
 0x28c   : > { %2845 = vmatpush.bf16.msra.mxu0 %v5989_v48  ;;  %4746 = vmatmul.msk.bf16.vlgmr.msrb.gmra.mxu1 %vm2751_vm12, %v2750_v10 }
 0x28d   : > { %2888 = vmatpush.bf16.msra.mxu1 %v5985_v34  ;;  %4745 = vmatmul.msk.bf16.vlgmr.msrb.gmra.mxu0 %vm2751_vm12, %v2750_v10 }
 0x28f   : > { %2914 = vmatpush.bf16.msra.mxu3 %v5989_v48  ;;  %2982 = vmatpush.bf16.msrb.mxu2 %v5989_v48 }
 0x290   : > { %2956 = vmatpush.bf16.msrb.mxu0 %v5985_v34 }
 0x291   : > { %2969 = vmatpush.bf16.msrb.mxu1 %v5987_v61 }
 0x29a   : > { %4749 = vmatmul.msk.bf16.vlgmr.msrb.gmra.mxu3 %vm2751_vm12, %v4747_v36  ;;  %4753 = vmatmul.msk.bf16.vlgmr.msra.gmra.mxu2 %vm2751_vm12, %v4751_v29 }
 0x29b   : > { %3023 = vmatpush.bf16.msrb.mxu3 %v5985_v34  ;;  %3091 = vmatpush.bf16.msra.mxu2 %v5985_v34 }
 0x29c   : > { %4752 = vmatmul.msk.bf16.vlgmr.msra.gmra.mxu1 %vm2751_vm12, %v4751_v29 }
 0x29d   : > { %4750 = vmatmul.msk.bf16.vlgmr.msra.gmra.mxu0 %vm2751_vm12, %v4747_v36  ;;  %3049 = vmatpush.bf16.msra.mxu1 %v5989_v48 }
 0x29e   : > { %3036 = vmatpush.bf16.msra.mxu0 %v5987_v61 }
 0x2aa   : > { %4754 = vmatmul.msk.bf16.vlgmr.msra.gmra.mxu3 %vm2751_vm12, %v4751_v29  ;;  %4758 = vmatmul.msk.bf16.vlgmr.msrb.gmra.mxu2 %vm2751_vm12, %v4755_v46 }
 0x2ab   : > { %3104 = vmatpush.bf16.msra.mxu3 %v5987_v61  ;;  %3172 = vmatpush.bf16.msrb.mxu2 %v5987_v61 }
 0x2ac   : > { %4757 = vmatmul.msk.bf16.vlgmr.msrb.gmra.mxu1 %vm2751_vm12, %v4755_v46 }
 0x2ad   : > { %4756 = vmatmul.msk.bf16.vlgmr.msrb.gmra.mxu0 %vm2751_vm12, %v4755_v46  ;;  %3159 = vmatpush.bf16.msrb.mxu1 %v5985_v34 }
 0x2ae   : > { %3117 = vmatpush.bf16.msrb.mxu0 %v5989_v48 }
 0x2ba   : > { %4760 = vmatmul.msk.bf16.vlgmr.msrb.gmra.mxu3 %vm2751_vm12, %v4759_v20  ;;  %4764 = vmatmul.msk.bf16.vlgmr.msra.gmra.mxu2 %vm2751_vm12, %v4763_v6 }
 0x2bb   : > { %3185 = vmatpush.bf16.msrb.mxu3 %v5989_v48  ;;  %3253 = vmatpush.bf16.msra.mxu2 %v5989_v48 }
 0x2bc   : > { %4762 = vmatmul.msk.bf16.vlgmr.msra.gmra.mxu1 %vm2751_vm12, %v4759_v20 }
 0x2bd   : > { %4761 = vmatmul.msk.bf16.vlgmr.msra.gmra.mxu0 %vm2751_vm12, %v4759_v20  ;;  %3240 = vmatpush.bf16.msra.mxu1 %v5987_v61 }
 0x2be   : > { %3227 = vmatpush.bf16.msra.mxu0 %v5985_v34 }
 0x2ca   : > { %4765 = vmatmul.msk.bf16.vlgmr.msra.gmra.mxu3 %vm2751_vm12, %v4763_v6  ;;  %4769 = vmatmul.msk.bf16.vlgmr.msrb.gmra.mxu2 %vm2751_vm12, %v4767_v55 }
 0x2cb   : > { %3295 = vmatpush.bf16.msra.mxu3 %v5985_v34  ;;  %3363 = vmatpush.bf16.msrb.mxu2 %v5985_v34 }
 0x2cc   : > { %4768 = vmatmul.msk.bf16.vlgmr.msrb.gmra.mxu1 %vm2751_vm12, %v4767_v55 }
 0x2cd   : > { %4766 = vmatmul.msk.bf16.vlgmr.msrb.gmra.mxu0 %vm2751_vm12, %v4763_v6  ;;  %3321 = vmatpush.bf16.msrb.mxu1 %v5989_v48  ;;  %v4807_v6 = vld [vmem:[%s6412_s4 + $0x20] sm:$0x3] }
 0x2ce   : > { %3308 = vmatpush.bf16.msrb.mxu0 %v5987_v61 }
 0x2da   : > { %4770 = vmatmul.msk.bf16.vlgmr.msrb.gmra.mxu3 %vm2751_vm12, %v4767_v55  ;;  %4774 = vmatmul.msk.bf16.vlgmr.msra.gmra.mxu2 %vm2751_vm12, %v4771_v2  ;;  %v4811_v55 = vld [vmem:[%s6412_s4 + $0x22] sm:$0x3] }
 0x2db   : > { %3376 = vmatpush.bf16.msrb.mxu3 %v5987_v61  ;;  %3444 = vmatpush.bf16.msra.mxu2 %v5987_v61 }
 0x2dc   : > { %4773 = vmatmul.msk.bf16.vlgmr.msra.gmra.mxu1 %vm2751_vm12, %v4771_v2 }
 0x2dd   : > { %4772 = vmatmul.msk.bf16.vlgmr.msra.gmra.mxu0 %vm2751_vm12, %v4771_v2  ;;  %3431 = vmatpush.bf16.msra.mxu1 %v5985_v34 }
 0x2de   : > { %3389 = vmatpush.bf16.msra.mxu0 %v5989_v48 }
 0x2ea   : > { %4776 = vmatmul.msk.bf16.vlgmr.msra.gmra.mxu3 %vm2751_vm12, %v4775_v56  ;;  %4780 = vmatmul.msk.bf16.vlgmr.msrb.gmra.mxu2 %vm2751_vm12, %v4779_v18 }
 0x2eb   : > { %3457 = vmatpush.bf16.msra.mxu3 %v5989_v48  ;;  %3525 = vmatpush.bf16.msrb.mxu2 %v5989_v48 }
 0x2ec   : > { %4778 = vmatmul.msk.bf16.vlgmr.msrb.gmra.mxu1 %vm2751_vm12, %v4775_v56 }
 0x2ed   : > { %4777 = vmatmul.msk.bf16.vlgmr.msrb.gmra.mxu0 %vm2751_vm12, %v4775_v56  ;;  %3512 = vmatpush.bf16.msrb.mxu1 %v5987_v61 }
 0x2ee   : > { %3499 = vmatpush.bf16.msrb.mxu0 %v5985_v34 }
 0x2fa   : > { %4781 = vmatmul.msk.bf16.vlgmr.msrb.gmra.mxu3 %vm2751_vm12, %v4779_v18  ;;  %4785 = vmatmul.msk.bf16.vlgmr.msra.gmra.mxu2 %vm2751_vm12, %v4783_v40 }
 0x2fb   : > { %3567 = vmatpush.bf16.msrb.mxu3 %v5985_v34  ;;  %3635 = vmatpush.bf16.msra.mxu2 %v5985_v34 }
 0x2fc   : > { %4784 = vmatmul.msk.bf16.vlgmr.msra.gmra.mxu1 %vm2751_vm12, %v4783_v40 }
 0x2fd   : > { %4782 = vmatmul.msk.bf16.vlgmr.msra.gmra.mxu0 %vm2751_vm12, %v4779_v18  ;;  %3593 = vmatpush.bf16.msra.mxu1 %v5989_v48 }
 0x2fe   : > { %3580 = vmatpush.bf16.msra.mxu0 %v5987_v61 }
 0x309   : > { %v2790_v62 = vpop.f32.mrf.mxu1 }
 0x30a   : > { %v2777_v17 = vpop.f32.mrf.mxu0  ;;  %v2803_v58 = vadd.f32 %v2795_v59, %v2790_v62  ;;  %4786 = vmatmul.msk.bf16.vlgmr.msra.gmra.mxu3 %vm2751_vm12, %v4783_v40  ;;  %4790 = vmatmul.msk.bf16.vlgmr.msrb.gmra.mxu2 %vm2751_vm12, %v4787_v14 }
 0x30b   : > { %v2798_v41 = vrot.slane %v2777_v17, 4  ;;  %3648 = vmatpush.bf16.msra.mxu3 %v5987_v61  ;;  %3716 = vmatpush.bf16.msrb.mxu2 %v5987_v61 }
 0x30c   : > { %2806 = vst.msk [vmem:[%s6071_s14 + $0x8] sm:$0x7] %vm2805_vm1, %v2803_v58  ;;  %4789 = vmatmul.msk.bf16.vlgmr.msrb.gmra.mxu1 %vm2751_vm12, %v4787_v14  ;;  %vm2940_vm1 = vmor %vm2871_vm7, %vm2939_vm14  ;;  %vm3074_vm14 = vcmask 1042464  }
 0x30d   : > { %4788 = vmatmul.msk.bf16.vlgmr.msrb.gmra.mxu0 %vm2751_vm12, %v4787_v14  ;;  %3703 = vmatpush.bf16.msrb.mxu1 %v5985_v34  ;;  %v2764_v38 = vpop.f32.mrf.mxu3  ;;  %v2821_v16 = vpop.f32.mrf.mxu2 }
 0x30e   : > { %3661 = vmatpush.bf16.msrb.mxu0 %v5989_v48  ;;  %v2800_v39 = vsel %vm2799_vm3, %v2764_v38, %v2798_v41  ;;  %v4815_v38 = vld [vmem:[%s6412_s4 + $0x24] sm:$0x3] }
 0x30f   : > { %v2802_v12 = vadd.f32 %v2800_v39, %v2794_v32 }
 0x311   : > { %v2792_v42 = vpop.f32.mrf.mxu1  ;;  %2804 = vst [vmem:[%s6071_s14] sm:$0x77] %v2802_v12 }
 0x312   : > { %v2779_v30 = vpop.f32.mrf.mxu0 }
 0x315   : > { %v2766_v31 = vpop.f32.mrf.mxu3  ;;  %v2823_v19 = vpop.f32.mrf.mxu2 }
 0x319   : > { %v2890_v7 = vpop.f32.mrf.mxu1 }
 0x31a   : > { %v2847_v9 = vpop.f32.mrf.mxu0  ;;  %4792 = vmatmul.msk.bf16.vlgmr.msrb.gmra.mxu3 %vm2751_vm12, %v4791_v53  ;;  %4796 = vmatmul.msk.bf16.vlgmr.msra.gmra.mxu2 %vm2751_vm12, %v4795_v49 }
 0x31b   : > { %2860 = vrot.lane.b32.xlu2 %v2847_v9, %s5066_s30  ;;  %3729 = vmatpush.bf16.msrb.mxu3 %v5989_v48 }
 0x31c   : > { %4794 = vmatmul.msk.bf16.vlgmr.msra.gmra.mxu1 %vm2751_vm12, %v4791_v53  ;;  %3797 = vmatpush.bf16.msra.mxu2 %v5989_v48 }
 0x31d   : > { %4793 = vmatmul.msk.bf16.vlgmr.msra.gmra.mxu0 %vm2751_vm12, %v4791_v53  ;;  %3784 = vmatpush.bf16.msra.mxu1 %v5987_v61  ;;  %v2834_v47 = vpop.f32.mrf.mxu3  ;;  %v2903_v28 = vpop.f32.mrf.mxu2 }
 0x31e   : > { %3771 = vmatpush.bf16.msra.mxu0 %v5985_v34  ;;  %v2856_v63 = vrot.slane %v2834_v47, 4  ;;  %v2925_v52 = vrot.slane %v2903_v28, 4 }
 0x320   : > { %v2857_v51 = vsel %vm2799_vm3, %v2821_v16, %v2856_v63  ;;  %v2926_v0 = vsel %vm2799_vm3, %v2890_v7, %v2925_v52 }
 0x321   : > { %v2892_v44 = vpop.f32.mrf.mxu1  ;;  %2858 = vrot.lane.b32.xlu1 %v2857_v51, %s5066_s30  ;;  %2927 = vrot.lane.b32.xlu0 %v2926_v0, %s5067_s6  ;;  %s5086_s30 = smov 83  }
 0x322   : > { %v2849_v23 = vpop.f32.mrf.mxu0 }
 0x325   : > { %v2836_v50 = vpop.f32.mrf.mxu3  ;;  %v2905_v57 = vpop.f32.mrf.mxu2 }
 0x329   : > { %v2971_v43 = vpop.f32.mrf.mxu1 }
 0x32a   : > { %v2958_v11 = vpop.f32.mrf.mxu0  ;;  %v2993_v35 = vrot.slane %v2971_v43, 4  ;;  %4797 = vmatmul.msk.bf16.vlgmr.msra.gmra.mxu3 %vm2751_vm12, %v4795_v49  ;;  %4801 = vmatmul.msk.bf16.vlgmr.msrb.gmra.mxu2 %vm2751_vm12, %v4799_v26  ;;  %v4827_v43 = vld [vmem:[%s6412_s4 + $0x2a] sm:$0x3] }
 0x32b   : > { %3839 = vmatpush.bf16.msra.mxu3 %v5985_v34  ;;  %3907 = vmatpush.bf16.msrb.mxu2 %v5985_v34 }
 0x32c   : > { %4800 = vmatmul.msk.bf16.vlgmr.msrb.gmra.mxu1 %vm2751_vm12, %v4799_v26  ;;  %v2994_v33 = vsel %vm2799_vm3, %v2958_v11, %v2993_v35  ;;  %v4823_v11 = vld [vmem:[%s6412_s4 + $0x28] sm:$0x3] }
 0x32d   : > { %4798 = vmatmul.msk.bf16.vlgmr.msrb.gmra.mxu0 %vm2751_vm12, %v4795_v49  ;;  %3865 = vmatpush.bf16.msrb.mxu1 %v5989_v48  ;;  %v2916_v4 = vpop.f32.mrf.mxu3  ;;  %v2984_v22 = vpop.f32.mrf.mxu2  ;;  %v4819_v49 = vld [vmem:[%s6412_s4 + $0x26] sm:$0x3] }
 0x32e   : > { %3852 = vmatpush.bf16.msrb.mxu0 %v5987_v61  ;;  %2929 = vrot.lane.b32.xlu1 %v2916_v4, %s5067_s6 }
 0x32f   : > { %2995 = vrot.lane.b32.xlu2 %v2994_v33, %s5068_s10  ;;  %2997 = vrot.lane.b32.xlu0 %v2984_v22, %s5068_s10 }
 0x331   : > { %v2973_v13 = vpop.f32.mrf.mxu1 }
 0x332   : > { %v2960_v8 = vpop.f32.mrf.mxu0 }
 0x335   : > { %v2918_v45 = vpop.f32.mrf.mxu3  ;;  %v2986_v60 = vpop.f32.mrf.mxu2 }
 0x339   : > { %v3051_v1 = vpop.f32.mrf.mxu1 }
 0x33a   : > { %v3038_v5 = vpop.f32.mrf.mxu0  ;;  %3064 = vrot.lane.b32.xlu2 %v3051_v1, %s5069_s13  ;;  %4802 = vmatmul.msk.bf16.vlgmr.msrb.gmra.mxu3 %vm2751_vm12, %v4799_v26 }
 0x33b   : > { %4806 = vmatmul.msk.bf16.vlgmr.msra.gmra.mxu2 %vm2751_vm12, %v4803_v3  ;;  %v3060_v27 = vrot.slane %v3038_v5, 4  ;;  %3920 = vmatpush.bf16.msrb.mxu3 %v5987_v61 }
 0x33c   : > { %4805 = vmatmul.msk.bf16.vlgmr.msra.gmra.mxu1 %vm2751_vm12, %v4803_v3  ;;  %3988 = vmatpush.bf16.msra.mxu2 %v5987_v61 }
 0x33d   : > { %4804 = vmatmul.msk.bf16.vlgmr.msra.gmra.mxu0 %vm2751_vm12, %v4803_v3  ;;  %3975 = vmatpush.bf16.msra.mxu1 %v5985_v34  ;;  %v3025_v24 = vpop.f32.mrf.mxu3  ;;  %v3093_v25 = vpop.f32.mrf.mxu2 }
 0x33e   : > { %3933 = vmatpush.bf16.msra.mxu0 %v5989_v48  ;;  %v3061_v54 = vsel %vm2799_vm3, %v3025_v24, %v3060_v27  ;;  %v4831_v27 = vld [vmem:[%s6412_s4 + $0x2c] sm:$0x3] }
 0x33f   : > { %3062 = vrot.lane.b32.xlu1 %v3061_v54, %s5069_s13 }
 0x341   : > { %v3053_v10 = vpop.f32.mrf.mxu1 }
 0x342   : > { %v3040_v37 = vpop.f32.mrf.mxu0 }
 0x345   : > { %v3027_v36 = vpop.f32.mrf.mxu3  ;;  %v3095_v29 = vpop.f32.mrf.mxu2 }
 0x349   : > { %v3161_v20 = vpop.f32.mrf.mxu1 }
 0x34a   : > { %v3119_v46 = vpop.f32.mrf.mxu0  ;;  %4808 = vmatmul.msk.bf16.vlgmr.msra.gmra.mxu3 %vm2751_vm12, %v4807_v6 }
 0x34b   : > { %3132 = vrot.lane.b32.xlu1 %v3119_v46, %s5070_s21  ;;  %4812 = vmatmul.msk.bf16.vlgmr.msrb.gmra.mxu2 %vm2751_vm12, %v4811_v55 }
 0x34c   : > { %4810 = vmatmul.msk.bf16.vlgmr.msrb.gmra.mxu1 %vm2751_vm12, %v4807_v6  ;;  %4001 = vmatpush.bf16.msra.mxu3 %v5989_v48 }
 0x34d   : > { %4809 = vmatmul.msk.bf16.vlgmr.msrb.gmra.mxu0 %vm2751_vm12, %v4807_v6  ;;  %4056 = vmatpush.bf16.msrb.mxu1 %v5987_v61  ;;  %v3106_v2 = vpop.f32.mrf.mxu3  ;;  %v3174_v56 = vpop.f32.mrf.mxu2 }
 0x34e   : > { %4043 = vmatpush.bf16.msrb.mxu0 %v5985_v34  ;;  %4069 = vmatpush.bf16.msrb.mxu2 %v5989_v48  ;;  %v3128_v15 = vrot.slane %v3106_v2, 4  ;;  %v3196_v18 = vrot.slane %v3174_v56, 4 }
 0x350   : > { %v3129_v17 = vsel %vm2799_vm3, %v3093_v25, %v3128_v15  ;;  %v3197_v62 = vsel %vm2799_vm3, %v3161_v20, %v3196_v18  ;;  %v2852_v20 = vld [vmem:[%s6071_s14 + $0x8] sm:$0x7] }
 0x351   : > { %v3163_v59 = vpop.f32.mrf.mxu1  ;;  %3130 = vrot.lane.b32.xlu0 %v3129_v17, %s5070_s21  ;;  %3198 = vrot.lane.b32.xlu2 %v3197_v62, %s5071_s22 }
 0x352   : > { %v3121_v40 = vpop.f32.mrf.mxu0  ;;  %v4835_v59 = vld [vmem:[%s6412_s4 + $0x2e] sm:$0x3] }
 0x355   : > { %v3108_v14 = vpop.f32.mrf.mxu3  ;;  %v3176_v58 = vpop.f32.mrf.mxu2 }
 0x359   : > { %v3242_v32 = vpop.f32.mrf.mxu1 }
 0x35a   : > { %v3229_v41 = vpop.f32.mrf.mxu0  ;;  %v3264_v39 = vrot.slane %v3242_v32, 4  ;;  %4813 = vmatmul.msk.bf16.vlgmr.msrb.gmra.mxu3 %vm2751_vm12, %v4811_v55 }
 0x35b   : > { %4817 = vmatmul.msk.bf16.vlgmr.msra.gmra.mxu2 %vm2751_vm12, %v4815_v38  ;;  %4110 = vmatpush.bf16.msrb.mxu3 %v5985_v34 }
 0x35c   : > { %4816 = vmatmul.msk.bf16.vlgmr.msra.gmra.mxu1 %vm2751_vm12, %v4815_v38  ;;  %v3265_v16 = vsel %vm2799_vm3, %v3229_v41, %v3264_v39  ;;  %4181 = vmatpush.bf16.msra.mxu2 %v5985_v34 }
 0x35d   : > { %4814 = vmatmul.msk.bf16.vlgmr.msra.gmra.mxu0 %vm2751_vm12, %v4811_v55  ;;  %4136 = vmatpush.bf16.msra.mxu1 %v5989_v48  ;;  %v3187_v12 = vpop.f32.mrf.mxu3  ;;  %v3255_v30 = vpop.f32.mrf.mxu2 }
 0x35e   : > { %3266 = vrot.lane.b32.xlu1 %v3265_v16, %s5072_s25  ;;  %4123 = vmatpush.bf16.msra.mxu0 %v5987_v61 }
 0x35f   : > { %3200 = vrot.lane.b32.xlu0 %v3187_v12, %s5071_s22  ;;  %3268 = vrot.lane.b32.xlu2 %v3255_v30, %s5072_s25  ;;  %s5081_s25 = smov 62  }
 0x361   : > { %v3244_v31 = vpop.f32.mrf.mxu1 }
 0x362   : > { %v3231_v42 = vpop.f32.mrf.mxu0 }
 0x365   : > { %v3189_v19 = vpop.f32.mrf.mxu3  ;;  %v3257_v9 = vpop.f32.mrf.mxu2 }
 0x369   : > { %v3323_v53 = vpop.f32.mrf.mxu1 }
 0x36a   : > { %v3310_v7 = vpop.f32.mrf.mxu0  ;;  %3336 = vrot.lane.b32.xlu1 %v3323_v53, %s5073_s29  ;;  %4818 = vmatmul.msk.bf16.vlgmr.msra.gmra.mxu3 %vm2751_vm12, %v4815_v38 }
 0x36b   : > { %4822 = vmatmul.msk.bf16.vlgmr.msrb.gmra.mxu2 %vm2751_vm12, %v4819_v49  ;;  %v3332_v47 = vrot.slane %v3310_v7, 4  ;;  %4194 = vmatpush.bf16.msra.mxu3 %v5987_v61 }
 0x36c   : > { %4821 = vmatmul.msk.bf16.vlgmr.msrb.gmra.mxu1 %vm2751_vm12, %v4819_v49  ;;  %4265 = vmatpush.bf16.msrb.mxu2 %v5987_v61 }
 0x36d   : > { %4820 = vmatmul.msk.bf16.vlgmr.msrb.gmra.mxu0 %vm2751_vm12, %v4819_v49  ;;  %4252 = vmatpush.bf16.msrb.mxu1 %v5985_v34  ;;  %v3297_v63 = vpop.f32.mrf.mxu3  ;;  %v3365_v28 = vpop.f32.mrf.mxu2 }
 0x36e   : > { %4207 = vmatpush.bf16.msrb.mxu0 %v5989_v48  ;;  %v3333_v52 = vsel %vm2799_vm3, %v3297_v63, %v3332_v47 }
 0x36f   : > { %3334 = vrot.lane.b32.xlu0 %v3333_v52, %s5073_s29  ;;  %s5085_s29 = smov 82  }
 0x371   : > { %v3325_v44 = vpop.f32.mrf.mxu1 }
 0x372   : > { %v3312_v23 = vpop.f32.mrf.mxu0 }
 0x373   : > { %v4839_v23 = vld [vmem:[%s6412_s4 + $0x30] sm:$0x3] }
 0x375   : > { %v3299_v51 = vpop.f32.mrf.mxu3  ;;  %v3367_v0 = vpop.f32.mrf.mxu2 }
 0x376   : > { %v2861_v46 = vpop.permute.xlu2 %2860 }
 0x379   : > { %v3433_v57 = vpop.f32.mrf.mxu1 }
 0x37a   : > { %v3391_v50 = vpop.f32.mrf.mxu0  ;;  %4824 = vmatmul.msk.bf16.vlgmr.msrb.gmra.mxu3 %vm2751_vm12, %v4823_v11 }
 0x37b   : > { %3404 = vrot.lane.b32.xlu0 %v3391_v50, %s5074_s7  ;;  %4828 = vmatmul.msk.bf16.vlgmr.msra.gmra.mxu2 %vm2751_vm12, %v4827_v43 }
 0x37c   : > { %4826 = vmatmul.msk.bf16.vlgmr.msra.gmra.mxu1 %vm2751_vm12, %v4823_v11  ;;  %4278 = vmatpush.bf16.msrb.mxu3 %v5989_v48 }
 0x37d   : > { %4825 = vmatmul.msk.bf16.vlgmr.msra.gmra.mxu0 %vm2751_vm12, %v4823_v11  ;;  %4336 = vmatpush.bf16.msra.mxu1 %v5987_v61  ;;  %v3378_v26 = vpop.f32.mrf.mxu3  ;;  %v3446_v33 = vpop.f32.mrf.mxu2 }
 0x37e   : > { %4323 = vmatpush.bf16.msra.mxu0 %v5985_v34  ;;  %4349 = vmatpush.bf16.msra.mxu2 %v5989_v48  ;;  %v3400_v35 = vrot.slane %v3378_v26, 4  ;;  %v3468_v4 = vrot.slane %v3446_v33, 4 }
 0x380   : > { %v3401_v13 = vsel %vm2799_vm3, %v3365_v28, %v3400_v35  ;;  %v3469_v45 = vsel %vm2799_vm3, %v3433_v57, %v3468_v4 }
 0x381   : > { %v3435_v8 = vpop.f32.mrf.mxu1  ;;  %3402 = vrot.lane.b32.xlu2 %v3401_v13, %s5074_s7  ;;  %3470 = vrot.lane.b32.xlu1 %v3469_v45, %s5075_s11 }
 0x382   : > { %v3393_v22 = vpop.f32.mrf.mxu0 }
 0x385   : > { %v3380_v60 = vpop.f32.mrf.mxu3  ;;  %v3448_v5 = vpop.f32.mrf.mxu2 }
 0x389   : > { %v3514_v3 = vpop.f32.mrf.mxu1  ;;  %v2996_v7 = vpop.permute.xlu2 %2995 }
 0x38a   : > { %v3501_v1 = vpop.f32.mrf.mxu0  ;;  %v3536_v24 = vrot.slane %v3514_v3, 4  ;;  %4829 = vmatmul.msk.bf16.vlgmr.msra.gmra.mxu3 %vm2751_vm12, %v4827_v43  ;;  %v2999_v49 = vrot.slane %v2996_v7, 4 }
 0x38b   : > { %4833 = vmatmul.msk.bf16.vlgmr.msrb.gmra.mxu2 %vm2751_vm12, %v4831_v27  ;;  %4394 = vmatpush.bf16.msra.mxu3 %v5985_v34 }
 0x38c   : > { %4832 = vmatmul.msk.bf16.vlgmr.msrb.gmra.mxu1 %vm2751_vm12, %v4831_v27  ;;  %v3537_v25 = vsel %vm2799_vm3, %v3501_v1, %v3536_v24  ;;  %v3000_v44 = vsel %vm254_vm2, %v2999_v49, %v2996_v7 }
 0x38d   : > { %4830 = vmatmul.msk.bf16.vlgmr.msrb.gmra.mxu0 %vm2751_vm12, %v4827_v43  ;;  %4420 = vmatpush.bf16.msrb.mxu1 %v5989_v48  ;;  %v3459_v54 = vpop.f32.mrf.mxu3  ;;  %v3527_v37 = vpop.f32.mrf.mxu2 }
 0x38e   : > { %4407 = vmatpush.bf16.msrb.mxu0 %v5987_v61  ;;  %3538 = vrot.lane.b32.xlu0 %v3537_v25, %s5076_s19  ;;  %v2851_v61 = vld [vmem:[%s6071_s14] sm:$0x77] }
 0x38f   : > { %3472 = vrot.lane.b32.xlu2 %v3459_v54, %s5075_s11  ;;  %3540 = vrot.lane.b32.xlu1 %v3527_v37, %s5076_s19 }
 0x391   : > { %v3516_v36 = vpop.f32.mrf.mxu1 }
 0x392   : > { %v3503_v10 = vpop.f32.mrf.mxu0 }
 0x393   : > { %v2859_v29 = vpop.permute.xlu1 %2858  ;;  %v2928_v17 = vpop.permute.xlu0 %2927 }
 0x394   : > { %v2862_v48 = vrot.slane %v2859_v29, 4  ;;  %v2931_v62 = vrot.slane %v2928_v17, 4  ;;  %v3065_v5 = vpop.permute.xlu2 %3064 }
 0x395   : > { %v3461_v34 = vpop.f32.mrf.mxu3  ;;  %v3529_v2 = vpop.f32.mrf.mxu2 }
 0x396   : > { %v2864_v6 = vsel %vm2863_vm4, %v2862_v48, %v2859_v29  ;;  %v2865_v55 = vsel %vm2863_vm4, %v2862_v48, %v2861_v46  ;;  %v2933_v16 = vsel %vm2932_vm10, %v2931_v62, %v2928_v17  ;;  %vm2942_vm4 = vcmask 534528  }
 0x397   : > { %v2868_v15 = vadd.f32 %v2864_v6, %v2851_v61  ;;  %v2869_v56 = vadd.f32 %v2865_v55, %v2852_v20 }
 0x399   : > { %v3595_v40 = vpop.f32.mrf.mxu1  ;;  %2873 = vst.msk [vmem:[%s6071_s14] sm:$0x77] %vm2872_vm8, %v2868_v15  ;;  %vm3007_vm8 = vmor %vm2871_vm7, %vm3006_vm5 }
 0x39a   : > { %v3582_v18 = vpop.f32.mrf.mxu0  ;;  %3608 = vrot.lane.b32.xlu0 %v3595_v40, %s5077_s17  ;;  %2875 = vst.msk [vmem:[%s6071_s14 + $0x8] sm:$0x7] %vm2874_vm9, %v2869_v56  ;;  %4834 = vmatmul.msk.bf16.vlgmr.msrb.gmra.mxu3 %vm2751_vm12, %v4831_v27  ;;  %vm3009_vm9 = vcmask 542720  }
 0x39b   : > { %4838 = vmatmul.msk.bf16.vlgmr.msra.gmra.mxu2 %vm2751_vm12, %v4835_v59  ;;  %v3604_v14 = vrot.slane %v3582_v18, 4 }
 0x39c   : > { %4837 = vmatmul.msk.bf16.vlgmr.msra.gmra.mxu1 %vm2751_vm12, %v4835_v59 }
 0x39d   : > { %4836 = vmatmul.msk.bf16.vlgmr.msra.gmra.mxu0 %vm2751_vm12, %v4835_v59  ;;  %v3569_v58 = vpop.f32.mrf.mxu3  ;;  %v3637_v41 = vpop.f32.mrf.mxu2 }
 0x39e   : > { %v3605_v32 = vsel %vm2799_vm3, %v3569_v58, %v3604_v14 }
 0x39f   : > { %3606 = vrot.lane.b32.xlu2 %v3605_v32, %s5077_s17 }
 0x3a0   : > { %v2920_v39 = vld [vmem:[%s6071_s14] sm:$0x77]  ;;  %v2930_v30 = vpop.permute.xlu1 %2929 }
 0x3a1   : > { %v3597_v12 = vpop.f32.mrf.mxu1  ;;  %v2921_v42 = vld [vmem:[%s6071_s14 + $0x8] sm:$0x7]  ;;  %v2937_v31 = vadd.f32 %v2933_v16, %v2920_v39  ;;  %v2934_v19 = vsel %vm2932_vm10, %v2931_v62, %v2930_v30  ;;  %v2998_v28 = vpop.permute.xlu0 %2997  ;;  %vm3067_vm10 = vcmask 31744  }
 0x3a2   : > { %v3584_v38 = vpop.f32.mrf.mxu0  ;;  %v2938_v9 = vadd.f32 %v2934_v19, %v2921_v42  ;;  %v3001_v50 = vsel %vm254_vm2, %v2999_v49, %v2998_v28  ;;  %vm3075_vm2 = vmor %vm2871_vm7, %vm3074_vm14 }
 0x3a3   : > { %2941 = vst.msk [vmem:[%s6071_s14] sm:$0x77] %vm2940_vm1, %v2937_v31  ;;  %vm3135_vm1 = vcmask 162816  }
 0x3a4   : > { %2943 = vst.msk [vmem:[%s6071_s14 + $0x8] sm:$0x7] %vm2942_vm4, %v2938_v9  ;;  %vm3142_vm4 = vcmask 1042592  }
 0x3a5   : > { %v3571_v53 = vpop.f32.mrf.mxu3  ;;  %v3639_v47 = vpop.f32.mrf.mxu2  ;;  %vm3143_vm5 = vmor %vm2871_vm7, %vm3142_vm4 }
 0x3a9   : > { %v3705_v52 = vpop.f32.mrf.mxu1 }
 0x3aa   : > { %v3663_v63 = vpop.f32.mrf.mxu0  ;;  %v2988_v51 = vld [vmem:[%s6071_s14] sm:$0x77]  ;;  %4840 = vmatmul.msk.bf16.vlgmr.msra.gmra.mxu3 %vm2751_vm12, %v4839_v23 }
 0x3ab   : > { %3676 = vrot.lane.b32.xlu2 %v3663_v63, %s5078_s23  ;;  %v3004_v0 = vadd.f32 %v3000_v44, %v2988_v51  ;;  %v2989_v57 = vld [vmem:[%s6071_s14 + $0x8] sm:$0x7]  ;;  %v3199_v38 = vpop.permute.xlu2 %3198 }
 0x3ac   : > { %4842 = vmatmul.msk.bf16.vlgmr.msrb.gmra.mxu1 %vm2751_vm12, %v4839_v23  ;;  %v3005_v11 = vadd.f32 %v3001_v50, %v2989_v57  ;;  %v3202_v39 = vrot.slane %v3199_v38, 4 }
 0x3ad   : > { %4841 = vmatmul.msk.bf16.vlgmr.msrb.gmra.mxu0 %vm2751_vm12, %v4839_v23  ;;  %3008 = vst.msk [vmem:[%s6071_s14] sm:$0x77] %vm3007_vm8, %v3004_v0  ;;  %v3650_v43 = vpop.f32.mrf.mxu3  ;;  %v3718_v35 = vpop.f32.mrf.mxu2  ;;  %vm3077_vm12 = vcmask 550912   ;;  %vm3145_vm8 = vcmask 681984  }
 0x3ae   : > { %3010 = vst.msk [vmem:[%s6071_s14 + $0x8] sm:$0x7] %vm3009_vm9, %v3005_v11  ;;  %v3672_v26 = vrot.slane %v3650_v43, 4  ;;  %v3740_v33 = vrot.slane %v3718_v35, 4  ;;  %vm3203_vm9 = vcmask 171008  }
 0x3af   : > { %v3204_v19 = vsel %vm3203_vm9, %v3202_v39, %v3199_v38 }
 0x3b0   : > { %v3673_v8 = vsel %vm2799_vm3, %v3637_v41, %v3672_v26  ;;  %v3741_v45 = vsel %vm2799_vm3, %v3705_v52, %v3740_v33 }
 0x3b1   : > { %v3707_v22 = vpop.f32.mrf.mxu1  ;;  %v3063_v13 = vpop.permute.xlu1 %3062  ;;  %3674 = vrot.lane.b32.xlu1 %v3673_v8, %s5078_s23  ;;  %3742 = vrot.lane.b32.xlu0 %v3741_v45, %s5047_s26 }
 0x3b2   : > { %v3665_v4 = vpop.f32.mrf.mxu0  ;;  %v3066_v60 = vrot.slane %v3063_v13, 4 }
 0x3b4   : > { %v3055_v1 = vld [vmem:[%s6071_s14] sm:$0x77]  ;;  %v3068_v3 = vsel %vm3067_vm10, %v3066_v60, %v3063_v13  ;;  %v3069_v27 = vsel %vm3067_vm10, %v3066_v60, %v3065_v5  ;;  %vm3210_vm10 = vcmask 1042600  }
 0x3b5   : > { %v3056_v24 = vld [vmem:[%s6071_s14 + $0x8] sm:$0x7]  ;;  %v3072_v25 = vadd.f32 %v3068_v3, %v3055_v1  ;;  %v3652_v54 = vpop.f32.mrf.mxu3  ;;  %v3720_v10 = vpop.f32.mrf.mxu2  ;;  %vm3211_vm14 = vmor %vm2871_vm7, %vm3210_vm10 }
 0x3b6   : > { %v3073_v37 = vadd.f32 %v3069_v27, %v3056_v24 }
 0x3b7   : > { %3076 = vst.msk [vmem:[%s6071_s14] sm:$0x77] %vm3075_vm2, %v3072_v25  ;;  %vm3213_vm2 = vcmask 690176  }
 0x3b8   : > { %3078 = vst.msk [vmem:[%s6071_s14 + $0x8] sm:$0x7] %vm3077_vm12, %v3073_v37  ;;  %vm3271_vm12 = vcmask 179200  }
 0x3b9   : > { %v3786_v29 = vpop.f32.mrf.mxu1  ;;  %v3269_v57 = vpop.permute.xlu2 %3268 }
 0x3ba   : > { %v3773_v36 = vpop.f32.mrf.mxu0  ;;  %v3808_v48 = vrot.slane %v3786_v29, 4 }
 0x3bc   : > { %v3809_v46 = vsel %vm2799_vm3, %v3773_v36, %v3808_v48 }
 0x3bd   : > { %3810 = vrot.lane.b32.xlu2 %v3809_v46, %s5079_s24  ;;  %v3731_v34 = vpop.f32.mrf.mxu3  ;;  %v3133_v15 = vpop.permute.xlu1 %3132 }
 0x3be   : > { %v3799_v20 = vpop.f32.mrf.mxu2  ;;  %3744 = vrot.lane.b32.xlu1 %v3731_v34, %s5047_s26  ;;  %v3123_v18 = vld [vmem:[%s6071_s14] sm:$0x77]  ;;  %s5080_s26 = smov 61  }
 0x3bf   : > { %3812 = vrot.lane.b32.xlu0 %v3799_v20, %s5079_s24  ;;  %v3124_v40 = vld [vmem:[%s6071_s14 + $0x8] sm:$0x7] }
 0x3c1   : > { %v3788_v6 = vpop.f32.mrf.mxu1 }
 0x3c2   : > { %v3775_v61 = vpop.f32.mrf.mxu0 }
 0x3c3   : > { %v3131_v55 = vpop.permute.xlu0 %3130 }
 0x3c4   : > { %v3134_v2 = vrot.slane %v3131_v55, 4 }
 0x3c5   : > { %v3733_v56 = vpop.f32.mrf.mxu3 }
 0x3c6   : > { %v3136_v59 = vsel %vm3135_vm1, %v3134_v2, %v3131_v55  ;;  %v3137_v17 = vsel %vm3135_vm1, %v3134_v2, %v3133_v15  ;;  %v3801_v62 = vpop.f32.mrf.mxu2  ;;  %vm3278_vm1 = vcmask 1042608  }
 0x3c7   : > { %v3140_v14 = vadd.f32 %v3136_v59, %v3123_v18  ;;  %v3141_v58 = vadd.f32 %v3137_v17, %v3124_v40  ;;  %vm3279_vm4 = vmor %vm2871_vm7, %vm3278_vm1 }
 0x3c9   : > { %v3867_v32 = vpop.f32.mrf.mxu1  ;;  %3144 = vst.msk [vmem:[%s6071_s14] sm:$0x77] %vm3143_vm5, %v3140_v14  ;;  %vm3281_vm5 = vcmask 698368  }
 0x3ca   : > { %v3854_v41 = vpop.f32.mrf.mxu0  ;;  %3880 = vrot.lane.b32.xlu2 %v3867_v32, %s5080_s26  ;;  %3146 = vst.msk [vmem:[%s6071_s14 + $0x8] sm:$0x7] %vm3145_vm8, %v3141_v58  ;;  %vm3339_vm8 = vcmask 187392  }
 0x3cb   : > { %v3876_v16 = vrot.slane %v3854_v41, 4 }
 0x3cd   : > { %v3841_v12 = vpop.f32.mrf.mxu3 }
 0x3ce   : > { %v3877_v30 = vsel %vm2799_vm3, %v3841_v12, %v3876_v16  ;;  %v3909_v42 = vpop.f32.mrf.mxu2 }
 0x3cf   : > { %3878 = vrot.lane.b32.xlu1 %v3877_v30, %s5080_s26 }
 0x3d0   : > { %v3191_v9 = vld [vmem:[%s6071_s14] sm:$0x77]  ;;  %v3267_v52 = vpop.permute.xlu1 %3266 }
 0x3d1   : > { %v3869_v7 = vpop.f32.mrf.mxu1  ;;  %v3201_v53 = vpop.permute.xlu0 %3200  ;;  %v3192_v49 = vld [vmem:[%s6071_s14 + $0x8] sm:$0x7]  ;;  %v3208_v47 = vadd.f32 %v3204_v19, %v3191_v9  ;;  %v3270_v44 = vrot.slane %v3267_v52, 4 }
 0x3d2   : > { %v3856_v31 = vpop.f32.mrf.mxu0  ;;  %v3205_v63 = vsel %vm3203_vm9, %v3202_v39, %v3201_v53  ;;  %vm3346_vm9 = vcmask 1042616  }
 0x3d3   : > { %v3209_v28 = vadd.f32 %v3205_v63, %v3192_v49  ;;  %3212 = vst.msk [vmem:[%s6071_s14] sm:$0x77] %vm3211_vm14, %v3208_v47  ;;  %v3272_v43 = vsel %vm3271_vm12, %v3270_v44, %v3267_v52  ;;  %v3273_v26 = vsel %vm3271_vm12, %v3270_v44, %v3269_v57  ;;  %vm3347_vm10 = vmor %vm2871_vm7, %vm3346_vm9  ;;  %vm3349_vm14 = vcmask 706560  }
 0x3d4   : > { %vm3414_vm12 = vcmask 1042624  }
 0x3d5   : > { %3214 = vst.msk [vmem:[%s6071_s14 + $0x8] sm:$0x7] %vm3213_vm2, %v3209_v28  ;;  %v3843_v23 = vpop.f32.mrf.mxu3  ;;  %vm3407_vm2 = vcmask 195584   ;;  %vm3415_vm1 = vmor %vm2871_vm7, %vm3414_vm12 }
 0x3d6   : > { %v3911_v51 = vpop.f32.mrf.mxu2 }
 0x3d9   : > { %v3977_v50 = vpop.f32.mrf.mxu1 }
 0x3da   : > { %v3935_v0 = vpop.f32.mrf.mxu0  ;;  %v3259_v11 = vld [vmem:[%s6071_s14] sm:$0x77] }
 0x3db   : > { %3948 = vrot.lane.b32.xlu1 %v3935_v0, %s5081_s25  ;;  %v3276_v35 = vadd.f32 %v3272_v43, %v3259_v11  ;;  %v3403_v20 = vpop.permute.xlu2 %3402 }
 0x3dc   : > { %v3260_v33 = vld [vmem:[%s6071_s14 + $0x8] sm:$0x7]  ;;  %v3337_v25 = vpop.permute.xlu1 %3336  ;;  %v3406_v2 = vrot.slane %v3403_v20, 4 }
 0x3dd   : > { %v3277_v4 = vadd.f32 %v3273_v26, %v3260_v33  ;;  %3280 = vst.msk [vmem:[%s6071_s14] sm:$0x77] %vm3279_vm4, %v3276_v35  ;;  %v3922_v22 = vpop.f32.mrf.mxu3  ;;  %vm3417_vm4 = vcmask 714752  }
 0x3de   : > { %v3944_v8 = vrot.slane %v3922_v22, 4  ;;  %v3990_v13 = vpop.f32.mrf.mxu2  ;;  %v3408_v40 = vsel %vm3407_vm2, %v3406_v2, %v3403_v20 }
 0x3df   : > { %3282 = vst.msk [vmem:[%s6071_s14 + $0x8] sm:$0x7] %vm3281_vm5, %v3277_v4  ;;  %v4012_v45 = vrot.slane %v3990_v13, 4  ;;  %vm3475_vm5 = vcmask 326656  }
 0x3e0   : > { %v3945_v1 = vsel %vm2799_vm3, %v3909_v42, %v3944_v8 }
 0x3e1   : > { %v3979_v5 = vpop.f32.mrf.mxu1  ;;  %v3335_v3 = vpop.permute.xlu0 %3334  ;;  %3946 = vrot.lane.b32.xlu0 %v3945_v1, %s5081_s25  ;;  %v4013_v27 = vsel %vm2799_vm3, %v3977_v50, %v4012_v45 }
 0x3e2   : > { %v3937_v60 = vpop.f32.mrf.mxu0  ;;  %v3338_v24 = vrot.slane %v3335_v3, 4  ;;  %4014 = vrot.lane.b32.xlu2 %v4013_v27, %s5082_s27 }
 0x3e4   : > { %v3327_v54 = vld [vmem:[%s6071_s14] sm:$0x77]  ;;  %v3340_v37 = vsel %vm3339_vm8, %v3338_v24, %v3335_v3  ;;  %v3341_v10 = vsel %vm3339_vm8, %v3338_v24, %v3337_v25  ;;  %vm3482_vm8 = vcmask 1042752  }
 0x3e5   : > { %v3344_v36 = vadd.f32 %v3340_v37, %v3327_v54  ;;  %v3924_v48 = vpop.f32.mrf.mxu3  ;;  %vm3483_vm9 = vmor %vm2871_vm7, %vm3482_vm8 }
 0x3e6   : > { %v3328_v29 = vld [vmem:[%s6071_s14 + $0x8] sm:$0x7]  ;;  %v3992_v34 = vpop.f32.mrf.mxu2 }
 0x3e7   : > { %v3345_v46 = vadd.f32 %v3341_v10, %v3328_v29  ;;  %3348 = vst.msk [vmem:[%s6071_s14] sm:$0x77] %vm3347_vm10, %v3344_v36  ;;  %vm3485_vm10 = vcmask 845824  }
 0x3e9   : > { %3350 = vst.msk [vmem:[%s6071_s14 + $0x8] sm:$0x7] %vm3349_vm14, %v3345_v46  ;;  %v4058_v6 = vpop.f32.mrf.mxu1  ;;  %v3473_v9 = vpop.permute.xlu2 %3472  ;;  %vm3543_vm14 = vcmask 334848  }
 0x3ea   : > { %v4045_v61 = vpop.f32.mrf.mxu0  ;;  %v4080_v55 = vrot.slane %v4058_v6, 4 }
 0x3ec   : > { %v4081_v15 = vsel %vm2799_vm3, %v4045_v61, %v4080_v55 }
 0x3ed   : > { %4082 = vrot.lane.b32.xlu1 %v4081_v15, %s5042_s8  ;;  %v3405_v56 = vpop.permute.xlu0 %3404  ;;  %v4003_v18 = vpop.f32.mrf.mxu3 }
 0x3ee   : > { %v3395_v59 = vld [vmem:[%s6071_s14] sm:$0x77]  ;;  %v4071_v17 = vpop.f32.mrf.mxu2  ;;  %4016 = vrot.lane.b32.xlu0 %v4003_v18, %s5082_s27  ;;  %v3409_v58 = vsel %vm3407_vm2, %v3406_v2, %v3405_v56  ;;  %vm3550_vm2 = vcmask 1042760  }
 0x3ef   : > { %v3412_v62 = vadd.f32 %v3408_v40, %v3395_v59  ;;  %4084 = vrot.lane.b32.xlu2 %v4071_v17, %s5042_s8  ;;  %s5083_s8 = smov 80   ;;  %vm3551_vm12 = vmor %vm2871_vm7, %vm3550_vm2 }
 0x3f0   : > { %v3396_v14 = vld [vmem:[%s6071_s14 + $0x8] sm:$0x7] }
 0x3f1   : > { %v3413_v32 = vadd.f32 %v3409_v58, %v3396_v14  ;;  %v4060_v38 = vpop.f32.mrf.mxu1  ;;  %3416 = vst.msk [vmem:[%s6071_s14] sm:$0x77] %vm3415_vm1, %v3412_v62  ;;  %vm3553_vm1 = vcmask 854016  }
 0x3f2   : > { %v4047_v41 = vpop.f32.mrf.mxu0 }
 0x3f3   : > { %3418 = vst.msk [vmem:[%s6071_s14 + $0x8] sm:$0x7] %vm3417_vm4, %v3413_v32  ;;  %v3471_v39 = vpop.permute.xlu1 %3470  ;;  %vm3611_vm4 = vcmask 343040  }
 0x3f4   : > { %v3474_v16 = vrot.slane %v3471_v39, 4 }
 0x3f5   : > { %v4005_v12 = vpop.f32.mrf.mxu3 }
 0x3f6   : > { %v4073_v30 = vpop.f32.mrf.mxu2  ;;  %v3476_v19 = vsel %vm3475_vm5, %v3474_v16, %v3471_v39  ;;  %v3477_v47 = vsel %vm3475_vm5, %v3474_v16, %v3473_v9  ;;  %vm3618_vm5 = vcmask 1042768  }
 0x3f7   : > { %vm3619_vm8 = vmor %vm2871_vm7, %vm3618_vm5  ;;  %vm3757_vm5 = vcmask 878592  }
 0x3f8   : > { %v3463_v31 = vld [vmem:[%s6071_s14] sm:$0x77] }
 0x3f9   : > { %v4138_v7 = vpop.f32.mrf.mxu1  ;;  %v3480_v53 = vadd.f32 %v3476_v19, %v3463_v31  ;;  %v3607_v8 = vpop.permute.xlu2 %3606 }
 0x3fa   : > { %v4125_v42 = vpop.f32.mrf.mxu0  ;;  %v3464_v49 = vld [vmem:[%s6071_s14 + $0x8] sm:$0x7]  ;;  %4151 = vrot.lane.b32.xlu1 %v4138_v7, %s5083_s8  ;;  %v3610_v5 = vrot.slane %v3607_v8, 4 }
 0x3fb   : > { %v3481_v63 = vadd.f32 %v3477_v47, %v3464_v49  ;;  %3484 = vst.msk [vmem:[%s6071_s14] sm:$0x77] %vm3483_vm9, %v3480_v53  ;;  %v4147_v28 = vrot.slane %v4125_v42, 4  ;;  %vm3621_vm9 = vcmask 862208  }
 0x3fc   : > { %v3612_v24 = vsel %vm3611_vm4, %v3610_v5, %v3607_v8 }
 0x3fd   : > { %3486 = vst.msk [vmem:[%s6071_s14 + $0x8] sm:$0x7] %vm3485_vm10, %v3481_v63  ;;  %v4112_v52 = vpop.f32.mrf.mxu3  ;;  %vm3679_vm10 = vcmask 351232  }
 0x3fe   : > { %v4183_v23 = vpop.f32.mrf.mxu2  ;;  %v4148_v44 = vsel %vm2799_vm3, %v4112_v52, %v4147_v28 }
 0x3ff   : > { %4149 = vrot.lane.b32.xlu0 %v4148_v44, %s5083_s8 }
 0x400   : > { %v3539_v0 = vpop.permute.xlu0 %3538 }
 0x401   : > { %v4140_v50 = vpop.f32.mrf.mxu1  ;;  %v3542_v57 = vrot.slane %v3539_v0, 4  ;;  %v3541_v11 = vpop.permute.xlu1 %3540 }
 0x402   : > { %v4127_v51 = vpop.f32.mrf.mxu0  ;;  %v3531_v43 = vld [vmem:[%s6071_s14] sm:$0x77] }
 0x403   : > { %v3544_v26 = vsel %vm3543_vm14, %v3542_v57, %v3539_v0  ;;  %v3545_v4 = vsel %vm3543_vm14, %v3542_v57, %v3541_v11  ;;  %vm3686_vm14 = vcmask 1042776  }
 0x404   : > { %v3548_v35 = vadd.f32 %v3544_v26, %v3531_v43  ;;  %v3532_v33 = vld [vmem:[%s6071_s14 + $0x8] sm:$0x7]  ;;  %vm3687_vm2 = vmor %vm2871_vm7, %vm3686_vm14  ;;  %vm3883_vm14 = vcmask 498688  }
 0x405   : > { %v3549_v22 = vadd.f32 %v3545_v4, %v3532_v33  ;;  %v4114_v13 = vpop.f32.mrf.mxu3  ;;  %v3677_v32 = vpop.permute.xlu2 %3676 }
 0x406   : > { %3552 = vst.msk [vmem:[%s6071_s14] sm:$0x77] %vm3551_vm12, %v3548_v35  ;;  %v4185_v45 = vpop.f32.mrf.mxu2  ;;  %vm3689_vm12 = vcmask 870400  }
 0x407   : > { %3554 = vst.msk [vmem:[%s6071_s14 + $0x8] sm:$0x7] %vm3553_vm1, %v3549_v22  ;;  %vm3754_vm1 = vcmask 1042784  }
 0x409   : > { %v4254_v1 = vpop.f32.mrf.mxu1 }
 0x40a   : > { %v4209_v60 = vpop.f32.mrf.mxu0 }
 0x40b   : > { %4222 = vrot.lane.b32.xlu0 %v4209_v60, %s5084_s28 }
 0x40c   : > { %v3609_v3 = vpop.permute.xlu0 %3608 }
 0x40d   : > { %v3599_v27 = vld [vmem:[%s6071_s14] sm:$0x77]  ;;  %v3613_v37 = vsel %vm3611_vm4, %v3610_v5, %v3609_v3  ;;  %v4196_v10 = vpop.f32.mrf.mxu3  ;;  %vm3755_vm4 = vmor %vm2871_vm7, %vm3754_vm1  ;;  %vm3893_vm1 = vcmask 1017856  }
 0x40e   : > { %v3616_v25 = vadd.f32 %v3612_v24, %v3599_v27  ;;  %v3600_v54 = vld [vmem:[%s6071_s14 + $0x8] sm:$0x7]  ;;  %v4218_v29 = vrot.slane %v4196_v10, 4  ;;  %v4267_v48 = vpop.f32.mrf.mxu2 }
 0x40f   : > { %v3617_v36 = vadd.f32 %v3613_v37, %v3600_v54  ;;  %v4289_v46 = vrot.slane %v4267_v48, 4 }
 0x410   : > { %3620 = vst.msk [vmem:[%s6071_s14] sm:$0x77] %vm3619_vm8, %v3616_v25  ;;  %v4219_v61 = vsel %vm2799_vm3, %v4183_v23, %v4218_v29  ;;  %vm3815_vm8 = vcmask 490496  }
 0x411   : > { %3622 = vst.msk [vmem:[%s6071_s14 + $0x8] sm:$0x7] %vm3621_vm9, %v3617_v36  ;;  %v4256_v20 = vpop.f32.mrf.mxu1  ;;  %4220 = vrot.lane.b32.xlu2 %v4219_v61, %s5084_s28  ;;  %v4290_v6 = vsel %vm2799_vm3, %v4254_v1, %v4289_v46  ;;  %vm3822_vm9 = vcmask 1042912  }
 0x412   : > { %v4211_v34 = vpop.f32.mrf.mxu0  ;;  %4291 = vrot.lane.b32.xlu1 %v4290_v6, %s5085_s29 }
 0x415   : > { %v4198_v55 = vpop.f32.mrf.mxu3 }
 0x416   : > { %v4269_v2 = vpop.f32.mrf.mxu2 }
 0x417   : > { %v3667_v39 = vld [vmem:[%s6071_s14] sm:$0x77]  ;;  %v3811_v26 = vpop.permute.xlu2 %3810 }
 0x418   : > { %v3668_v16 = vld [vmem:[%s6071_s14 + $0x8] sm:$0x7]  ;;  %v3814_v33 = vrot.slane %v3811_v26, 4 }
 0x419   : > { %v4338_v56 = vpop.f32.mrf.mxu1 }
 0x41a   : > { %v4325_v15 = vpop.f32.mrf.mxu0  ;;  %v4360_v18 = vrot.slane %v4338_v56, 4  ;;  %v3816_v22 = vsel %vm3815_vm8, %v3814_v33, %v3811_v26 }
 0x41c   : > { %v4361_v40 = vsel %vm2799_vm3, %v4325_v15, %v4360_v18 }
 0x41d   : > { %4362 = vrot.lane.b32.xlu0 %v4361_v40, %s5086_s30  ;;  %v4280_v59 = vpop.f32.mrf.mxu3 }
 0x41e   : > { %v4351_v17 = vpop.f32.mrf.mxu2  ;;  %4293 = vrot.lane.b32.xlu2 %v4280_v59, %s5085_s29 }
 0x41f   : > { %4364 = vrot.lane.b32.xlu1 %v4351_v17, %s5086_s30 }
 0x421   : > { %v4340_v14 = vpop.f32.mrf.mxu1 }
 0x422   : > { %v4327_v62 = vpop.f32.mrf.mxu0 }
 0x423   : > { %v3675_v58 = vpop.permute.xlu1 %3674  ;;  %v3743_v53 = vpop.permute.xlu0 %3742 }
 0x424   : > { %v3678_v41 = vrot.slane %v3675_v58, 4  ;;  %v3746_v47 = vrot.slane %v3743_v53, 4  ;;  %v3881_v27 = vpop.permute.xlu2 %3880 }
 0x425   : > { %v4282_v38 = vpop.f32.mrf.mxu3 }
 0x426   : > { %v3680_v12 = vsel %vm3679_vm10, %v3678_v41, %v3675_v58  ;;  %v3681_v30 = vsel %vm3679_vm10, %v3678_v41, %v3677_v32  ;;  %v4353_v42 = vpop.f32.mrf.mxu2  ;;  %v3748_v44 = vsel %vm2266_vm11, %v3746_v47, %v3743_v53  ;;  %vm3823_vm10 = vmor %vm2871_vm7, %vm3822_vm9  ;;  %vm3961_vm9 = vcmask 1026048  }
 0x427   : > { %v3684_v31 = vadd.f32 %v3680_v12, %v3667_v39  ;;  %v3685_v19 = vadd.f32 %v3681_v30, %v3668_v16 }
 0x429   : > { %v4422_v7 = vpop.f32.mrf.mxu1  ;;  %3688 = vst.msk [vmem:[%s6071_s14] sm:$0x77] %vm3687_vm2, %v3684_v31  ;;  %vm3890_vm2 = vcmask 1042920  }
 0x42a   : > { %v4409_v9 = vpop.f32.mrf.mxu0  ;;  %4435 = vrot.lane.b32.xlu0 %v4422_v7, %s5037_s20  ;;  %3690 = vst.msk [vmem:[%s6071_s14 + $0x8] sm:$0x7] %vm3689_vm12, %v3685_v19  ;;  %vm3891_vm12 = vmor %vm2871_vm7, %vm3890_vm2  ;;  %vm4029_vm2 = vcmask 1034240  }
 0x42b   : > { %v4431_v49 = vrot.slane %v4409_v9, 4 }
 0x42d   : > { %v4396_v63 = vpop.f32.mrf.mxu3 }
 0x42e   : > { %v4432_v28 = vsel %vm2799_vm3, %v4396_v63, %v4431_v49 }
 0x42f   : > { %4433 = vrot.lane.b32.xlu2 %v4432_v28, %s5037_s20 }
 0x430   : > { %v3735_v23 = vld [vmem:[%s6071_s14] sm:$0x77]  ;;  %v3745_v51 = vpop.permute.xlu1 %3744 }
 0x431   : > { %v4424_v0 = vpop.f32.mrf.mxu1  ;;  %v3752_v50 = vadd.f32 %v3748_v44, %v3735_v23  ;;  %v3736_v57 = vld [vmem:[%s6071_s14 + $0x8] sm:$0x7]  ;;  %v3749_v11 = vsel %vm2266_vm11, %v3746_v47, %v3745_v51  ;;  %v3813_v4 = vpop.permute.xlu0 %3812  ;;  %vm3825_vm11 = vcmask 1009664  }
 0x432   : > { %v4411_v52 = vpop.f32.mrf.mxu0  ;;  %v3753_v43 = vadd.f32 %v3749_v11, %v3736_v57  ;;  %v3817_v45 = vsel %vm3815_vm8, %v3814_v33, %v3813_v4 }
 0x433   : > { %3756 = vst.msk [vmem:[%s6071_s14] sm:$0x77] %vm3755_vm4, %v3752_v50  ;;  %vm3951_vm4 = vcmask 506880  }
 0x434   : > { %3758 = vst.msk [vmem:[%s6071_s14 + $0x8] sm:$0x7] %vm3757_vm5, %v3753_v43  ;;  %vm3958_vm5 = vcmask 1042928  }
 0x435   : > { %v4398_v35 = vpop.f32.mrf.mxu3  ;;  %vm3959_vm8 = vmor %vm2871_vm7, %vm3958_vm5  ;;  %vm4163_vm5 = vcmask 1043072  }
 0x43a   : > { %v3803_v8 = vld [vmem:[%s6071_s14] sm:$0x77] }
 0x43b   : > { %v3820_v13 = vadd.f32 %v3816_v22, %v3803_v8  ;;  %v3804_v60 = vld [vmem:[%s6071_s14 + $0x8] sm:$0x7] }
 0x43c   : > { %v3821_v5 = vadd.f32 %v3817_v45, %v3804_v60  ;;  %v4015_v15 = vpop.permute.xlu2 %4014 }
 0x43d   : > { %3824 = vst.msk [vmem:[%s6071_s14] sm:$0x77] %vm3823_vm10, %v3820_v13  ;;  %v4018_v56 = vrot.slane %v4015_v15, 4  ;;  %vm4019_vm10 = vcmask 515072  }
 0x43e   : > { %3826 = vst.msk [vmem:[%s6071_s14 + $0x8] sm:$0x7] %vm3825_vm11, %v3821_v5  ;;  %vm4026_vm11 = vcmask 1042936  }
 0x43f   : > { %v4020_v18 = vsel %vm4019_vm10, %v4018_v56, %v4015_v15 }
 0x441   : > { %v3879_v1 = vpop.permute.xlu1 %3878 }
 0x442   : > { %v3882_v3 = vrot.slane %v3879_v1, 4 }
 0x444   : > { %v3871_v24 = vld [vmem:[%s6071_s14] sm:$0x77]  ;;  %v3884_v25 = vsel %vm3883_vm14, %v3882_v3, %v3879_v1  ;;  %v3885_v54 = vsel %vm3883_vm14, %v3882_v3, %v3881_v27  ;;  %vm4027_vm14 = vmor %vm2871_vm7, %vm4026_vm11  ;;  %vm4234_vm11 = vcmask 1043080  }
 0x445   : > { %v3872_v37 = vld [vmem:[%s6071_s14 + $0x8] sm:$0x7]  ;;  %v3888_v10 = vadd.f32 %v3884_v25, %v3871_v24 }
 0x446   : > { %v3889_v36 = vadd.f32 %v3885_v54, %v3872_v37 }
 0x447   : > { %3892 = vst.msk [vmem:[%s6071_s14] sm:$0x77] %vm3891_vm12, %v3888_v10  ;;  %vm4094_vm12 = vcmask 1042944  }
 0x448   : > { %3894 = vst.msk [vmem:[%s6071_s14 + $0x8] sm:$0x7] %vm3893_vm1, %v3889_v36  ;;  %vm4095_vm1 = vmor %vm2871_vm7, %vm4094_vm12 }
 0x449   : > { %v4085_v38 = vpop.permute.xlu2 %4084 }
 0x44d   : > { %v3949_v46 = vpop.permute.xlu1 %3948 }
 0x44e   : > { %v3939_v34 = vld [vmem:[%s6071_s14] sm:$0x77] }
 0x44f   : > { %v3940_v20 = vld [vmem:[%s6071_s14 + $0x8] sm:$0x7] }
 0x453   : > { %v3947_v29 = vpop.permute.xlu0 %3946 }
 0x454   : > { %v3950_v48 = vrot.slane %v3947_v29, 4 }
 0x456   : > { %v3952_v61 = vsel %vm3951_vm4, %v3950_v48, %v3947_v29  ;;  %v3953_v6 = vsel %vm3951_vm4, %v3950_v48, %v3949_v46  ;;  %vm4155_vm4 = vcmask 654336  }
 0x457   : > { %v3956_v55 = vadd.f32 %v3952_v61, %v3939_v34  ;;  %v3957_v2 = vadd.f32 %v3953_v6, %v3940_v20 }
 0x459   : > { %3960 = vst.msk [vmem:[%s6071_s14] sm:$0x77] %vm3959_vm8, %v3956_v55  ;;  %vm4166_vm8 = vcmask 129028  }
 0x45a   : > { %3962 = vst.msk [vmem:[%s6071_s14 + $0x8] sm:$0x7] %vm3961_vm9, %v3957_v2  ;;  %vm4164_vm9 = vmor %vm2871_vm7, %vm4163_vm5  ;;  %vm4308_vm5 = vcmask 145412  }
 0x45f   : > { %v4083_v41 = vpop.permute.xlu1 %4082 }
 0x460   : > { %v4007_v40 = vld [vmem:[%s6071_s14] sm:$0x77]  ;;  %v4017_v59 = vpop.permute.xlu0 %4016  ;;  %v4086_v32 = vrot.slane %v4083_v41, 4 }
 0x461   : > { %v4024_v17 = vadd.f32 %v4020_v18, %v4007_v40  ;;  %v4008_v62 = vld [vmem:[%s6071_s14 + $0x8] sm:$0x7]  ;;  %v4021_v14 = vsel %vm4019_vm10, %v4018_v56, %v4017_v59  ;;  %vm4226_vm10 = vcmask 662528  }
 0x462   : > { %v4025_v58 = vadd.f32 %v4021_v14, %v4008_v62  ;;  %v4088_v16 = vsel %vm1822_vm6, %v4086_v32, %v4083_v41  ;;  %v4089_v12 = vsel %vm1822_vm6, %v4086_v32, %v4085_v38  ;;  %vm4167_vm6 = vmor %vm4166_vm8, %vm2746_vm13 }
 0x463   : > { %4028 = vst.msk [vmem:[%s6071_s14] sm:$0x77] %vm4027_vm14, %v4024_v17  ;;  %vm4237_vm14 = vcmask 137220  }
 0x464   : > { %4030 = vst.msk [vmem:[%s6071_s14 + $0x8] sm:$0x7] %vm4029_vm2, %v4025_v58  ;;  %vm4235_vm2 = vmor %vm2871_vm7, %vm4234_vm11  ;;  %vm4379_vm11 = vcmask 153604  }
 0x465   : > { %vm4238_vm12 = vmor %vm4237_vm14, %vm2746_vm13 }
 0x46a   : > { %v4075_v39 = vld [vmem:[%s6071_s14] sm:$0x77] }
 0x46b   : > { %v4092_v30 = vadd.f32 %v4088_v16, %v4075_v39  ;;  %v4076_v42 = vld [vmem:[%s6071_s14 + $0x8] sm:$0x7]  ;;  %v4221_v51 = vpop.permute.xlu2 %4220 }
 0x46c   : > { %v4093_v31 = vadd.f32 %v4089_v12, %v4076_v42  ;;  %v4152_v19 = vpop.permute.xlu1 %4151  ;;  %v4224_v0 = vrot.slane %v4221_v51, 4 }
 0x46d   : > { %4096 = vst.msk [vmem:[%s6071_s14] sm:$0x77] %vm4095_vm1, %v4092_v30  ;;  %v4154_v7 = vrot.slane %v4152_v19, 4  ;;  %vm4297_vm1 = vcmask 670720  }
 0x46e   : > { %4097 = vst [vmem:[%s6071_s14 + $0x8] sm:$0x7] %v4093_v31  ;;  %v4227_v43 = vsel %vm4226_vm10, %v4224_v0, %v4221_v51 }
 0x471   : > { %v4150_v9 = vpop.permute.xlu0 %4149 }
 0x472   : > { %v4153_v53 = vrot.slane %v4150_v9, 4 }
 0x474   : > { %v4142_v49 = vld [vmem:[%s6071_s14] sm:$0x77]  ;;  %v4156_v47 = vsel %vm4155_vm4, %v4153_v53, %v4150_v9  ;;  %v4157_v63 = vsel %vm2799_vm3, %v4153_v53, %v4154_v7 }
 0x475   : > { %v4143_v28 = vld [vmem:[%s6071_s14 + $0x8] sm:$0x77]  ;;  %v4158_v52 = vsel %vm4155_vm4, %v4157_v63, %v4152_v19  ;;  %v4161_v23 = vadd.f32 %v4156_v47, %v4142_v49  ;;  %vm4305_vm4 = vcmask 1043088  }
 0x476   : > { %v4162_v44 = vadd.f32 %v4158_v52, %v4143_v28  ;;  %vm4306_vm8 = vmor %vm2871_vm7, %vm4305_vm4 }
 0x477   : > { %4165 = vst.msk [vmem:[%s6071_s14] sm:$0x77] %vm4164_vm9, %v4161_v23  ;;  %vm4309_vm9 = vmor %vm4308_vm5, %vm2746_vm13 }
 0x478   : > { %4168 = vst.msk [vmem:[%s6071_s14 + $0x8] sm:$0x77] %vm4167_vm6, %v4162_v44  ;;  %v4294_v8 = vpop.permute.xlu2 %4293  ;;  %vm4368_vm6 = vcmask 678912  }
 0x479   : > { %v4296_v13 = vrot.slane %v4294_v8, 4 }
 0x47d   : > { %v4223_v50 = vpop.permute.xlu0 %4222 }
 0x47e   : > { %v4225_v57 = vrot.slane %v4223_v50, 4  ;;  %v4213_v26 = vld [vmem:[%s6071_s14] sm:$0x77] }
 0x47f   : > { %v4232_v33 = vadd.f32 %v4227_v43, %v4213_v26  ;;  %v4214_v4 = vld [vmem:[%s6071_s14 + $0x8] sm:$0x77] }
 0x480   : > { %v4228_v11 = vsel %vm2799_vm3, %v4224_v0, %v4225_v57 }
 0x481   : > { %v4229_v35 = vsel %vm4226_vm10, %v4228_v11, %v4223_v50  ;;  %4236 = vst.msk [vmem:[%s6071_s14] sm:$0x77] %vm4235_vm2, %v4232_v33  ;;  %vm4376_vm10 = vcmask 1043096   ;;  %vm4380_vm2 = vmor %vm4379_vm11, %vm2746_vm13 }
 0x482   : > { %v4233_v22 = vadd.f32 %v4229_v35, %v4214_v4  ;;  %vm4377_vm14 = vmor %vm2871_vm7, %vm4376_vm10 }
 0x484   : > { %4239 = vst.msk [vmem:[%s6071_s14 + $0x8] sm:$0x77] %vm4238_vm12, %v4233_v22  ;;  %v4292_v45 = vpop.permute.xlu1 %4291  ;;  %vm4447_vm12 = vcmask 1043104  }
 0x485   : > { %v4295_v60 = vrot.slane %v4292_v45, 4 }
 0x487   : > { %v4299_v5 = vsel %vm2799_vm3, %v4295_v60, %v4296_v13  ;;  %v4298_v3 = vsel %vm4297_vm1, %v4295_v60, %v4292_v45 }
 0x488   : > { %v4284_v1 = vld [vmem:[%s6071_s14] sm:$0x77]  ;;  %v4300_v25 = vsel %vm4297_vm1, %v4299_v5, %v4294_v8  ;;  %vm4448_vm1 = vmor %vm2871_vm7, %vm4447_vm12 }
 0x489   : > { %v4303_v27 = vadd.f32 %v4298_v3, %v4284_v1  ;;  %v4434_v61 = vpop.permute.xlu2 %4433 }
 0x48a   : > { %v4437_v15 = vrot.slane %v4434_v61, 4 }
 0x48b   : > { %v4285_v24 = vld [vmem:[%s6071_s14 + $0x8] sm:$0x77]  ;;  %4307 = vst.msk [vmem:[%s6071_s14] sm:$0x77] %vm4306_vm8, %v4303_v27 }
 0x48c   : > { %v4304_v54 = vadd.f32 %v4300_v25, %v4285_v24  ;;  %v4440_v56 = vsel %vm1402_vm0, %v4437_v15, %v4434_v61 }
 0x48e   : > { %4310 = vst.msk [vmem:[%s6071_s14 + $0x8] sm:$0x77] %vm4309_vm9, %v4304_v54 }
 0x48f   : > { %v4363_v37 = vpop.permute.xlu0 %4362 }
 0x490   : > { %v4366_v10 = vrot.slane %v4363_v37, 4 }
 0x491   : > { %v4365_v36 = vpop.permute.xlu1 %4364 }
 0x492   : > { %v4355_v29 = vld [vmem:[%s6071_s14] sm:$0x77]  ;;  %v4369_v48 = vsel %vm4368_vm6, %v4366_v10, %v4363_v37  ;;  %v4367_v46 = vrot.slane %v4365_v36, 4 }
 0x493   : > { %v4374_v34 = vadd.f32 %v4369_v48, %v4355_v29 }
 0x494   : > { %v4370_v6 = vsel %vm2799_vm3, %v4366_v10, %v4367_v46 }
 0x495   : > { %v4356_v20 = vld [vmem:[%s6071_s14 + $0x8] sm:$0x77]  ;;  %v4371_v55 = vsel %vm4368_vm6, %v4370_v6, %v4365_v36  ;;  %4378 = vst.msk [vmem:[%s6071_s14] sm:$0x77] %vm4377_vm14, %v4374_v34 }
 0x496   : > { %v4375_v2 = vadd.f32 %v4371_v55, %v4356_v20 }
 0x498   : > { %4381 = vst.msk [vmem:[%s6071_s14 + $0x8] sm:$0x77] %vm4380_vm2, %v4375_v2 }
 0x49c   : > { %v4436_v18 = vpop.permute.xlu0 %4435  ;;  %v4426_v40 = vld [vmem:[%s6071_s14] sm:$0x77] }
 0x49d   : > { %v4438_v59 = vrot.slane %v4436_v18, 4  ;;  %v4445_v17 = vadd.f32 %v4440_v56, %v4426_v40 }
 0x49f   : > { %v4441_v62 = vsel %vm2799_vm3, %v4437_v15, %v4438_v59  ;;  %4449 = vst.msk [vmem:[%s6071_s14] sm:$0x77] %vm4448_vm1, %v4445_v17  ;;  %v4427_v14 = vld [vmem:[%s6071_s14 + $0x8] sm:$0x77] }
 0x4a0   : > { %v4442_v58 = vsel %vm1402_vm0, %v4441_v62, %v4436_v18 }
 0x4a1   : > { %v4446_v41 = vadd.f32 %v4442_v58, %v4427_v14 }
 0x4a3   : > { %4450 = vst.msk [vmem:[%s6071_s14 + $0x8] sm:$0x77] %vm6078_vm15, %v4446_v41 }
 0x4a4 PF: > { %s15_s18 = sadd.s32 1, %s5021_s18  }
 0x4a5   : > { %p12_p4 = scmp.ge.s32.totalorder %s15_s18, 4  }
 0x4a7   :  { %14 = sbr.rel (!%p12_p4) target bundleno = 1 (0x1), region = 118 }

</bundles_post_ra>
